<compile_context>
chip_gen: v7x
topology: tpu7x:2x2x1
jax: 0.10.0
libtpu: 0.0.40
codegen_flags: <defaults>
</compile_context>

<pallas_src>
import jax
import jax.numpy as jnp
from jax.experimental import pallas as pl
from jax.experimental.pallas import tpu as pltpu

# ---- module hyperparameters (defaults of the PyTorch module) ----
B_FEATURE_NUM = 2
B_HIDDEN_SIZE = 8
B_HYPER_EMBEDDING_SIZE = 16
B_HYPER_HIDDEN_SIZE = 16
B_NUM_LAYERS = 2
B_TASK_NUM = 5  # unused, see TODO above

F = B_FEATURE_NUM            # input / output feature size
H = B_HIDDEN_SIZE            # main LSTM hidden
E = B_HYPER_EMBEDDING_SIZE   # hyper embedding size
NH = B_HYPER_HIDDEN_SIZE     # hyper LSTM hidden
L = B_NUM_LAYERS
DIN = max(F, H)              # layer-0 input zero-padded to DIN so per-layer weights stack

G = 4 * H                    # main gate width   (32)
GH = 4 * NH                  # hyper gate width  (64)
GE = 4 * E                   # embedding width   (64)
CIN = DIN + H + NH           # per-layer fused input width [x|h|hh]      (32)
COUT = 2 * G + GH            # per-layer fused gate width [pre_x|pre_h|hg] (128)
LIN = L * CIN                # rows of the block-diag W1 slab            (64)


def meta_lstm_kernel(x_ref, state_ref, wbd_ref, bias_ref, fc_ref, out_ref):
    T, Bsz, _ = x_ref.shape
    f32 = jnp.float32

    # ---- hoisted loads / broadcasts (once per kernel, not per step) ----
    W1 = wbd_ref[0:LIN, :]                      # (L*CIN, L*COUT) bf16, block-diag over layers
    W23 = wbd_ref[LIN:LIN + L * NH, :]          # (L*NH,  L*COUT) bf16, block-diag (3G cols used/layer)
    b1b = jnp.broadcast_to(bias_ref[0:1, :], (Bsz, L * COUT))
    b23b = jnp.broadcast_to(bias_ref[1:2, :], (Bsz, L * COUT))
    xs = [x_ref[t] for t in range(T)]           # tiny VMEM loads, off the recurrence chain

    # ---- carried state (values; single grid step) ----
    hs = [state_ref[l] for l in range(L)]
    cs = [state_ref[L + l] for l in range(L)]
    hhs = [jnp.zeros((Bsz, NH), f32) for _ in range(L)]
    hcs = [jnp.zeros((Bsz, NH), f32) for _ in range(L)]
    pipes = [jnp.zeros((Bsz, DIN), f32) for _ in range(L)]  # pipes[l] = layer l-1 output, 1 step old
    zero_x = jnp.zeros((Bsz, DIN), f32)

    hlast = []
    # Layer wavefront: wavefront step s computes cell (t = s - l, layer = l) for every layer
    # with ONE block-diagonal W1 matmul and ONE block-diagonal (pre-fused W2@W3) matmul
    # -> T+L-1 serially dependent matmul stages instead of T*L.
    # TODO(synk): for long sequences switch this Python unroll to a chunked lax.fori_loop.
    for s in range(T + L - 1):
        pieces = []
        for l in range(L):
            layer_in = (xs[s] if s < T else zero_x) if l == 0 else pipes[l]
            pieces += [layer_in, hs[l], hhs[l]]
        sx = jnp.concatenate(pieces, axis=-1)                           # (B, L*CIN)
        g = jnp.dot(sx.astype(jnp.bfloat16), W1,
                    preferred_element_type=f32) + b1b                   # (B, L*COUT)

        pre_x, pre_h, hh_new, hc_new = [], [], [], []
        for l in range(L):
            gl = g[:, l * COUT:(l + 1) * COUT]
            pre_x.append(gl[:, :G])                                     # layer_in @ Wx
            pre_h.append(gl[:, G:2 * G])                                # h_prev  @ Wh
            hg = gl[:, 2 * G:]                                          # hyper gates (B, GH)
            # hyper LSTM cell: one sigmoid + one tanh on the packed gate vector
            sg = jax.nn.sigmoid(hg)
            th = jnp.tanh(hg)
            hc_n = sg[:, NH:2 * NH] * hcs[l] + sg[:, :NH] * th[:, 2 * NH:3 * NH]
            hh_n = sg[:, 3 * NH:] * jnp.tanh(hc_n)
            hh_new.append(hh_n)
            hc_new.append(hc_n)

        # pre-fused hyper projection: d = hh @ (Wz@Wd) + (bz@Wd + b0)   -> [d_h | d_x | bias]
        hhcat = jnp.concatenate(hh_new, axis=-1)                        # (B, L*NH)
        d = jnp.dot(hhcat.astype(jnp.bfloat16), W23,
                    preferred_element_type=f32) + b23b                  # (B, L*COUT)

        new_pipes = list(pipes)
        for l in range(L):
            t = s - l
            if not (0 <= t < T):
                continue                                                # wavefront edge: discard
            dl = d[:, l * COUT:l * COUT + 3 * G]
            gm = dl[:, G:2 * G] * pre_x[l] + dl[:, :G] * pre_h[l] + dl[:, 2 * G:]
            sgm = jax.nn.sigmoid(gm)
            thm = jnp.tanh(gm)
            c_n = sgm[:, H:2 * H] * cs[l] + sgm[:, :H] * thm[:, 2 * H:3 * H]
            h_n = sgm[:, 3 * H:] * jnp.tanh(c_n)
            hs[l], cs[l], hhs[l], hcs[l] = h_n, c_n, hh_new[l], hc_new[l]
            if l + 1 < L:
                new_pipes[l + 1] = h_n
            if l == L - 1:
                hlast.append(h_n)                                       # time t, in order
        pipes = new_pipes

    # ---- fc head: ONE matmul for all T time steps (off the recurrence critical path) ----
    Wfc = fc_ref[0:T * H, :]                                            # (T*H, T*F) block-diag
    bfc = jnp.broadcast_to(fc_ref[T * H:T * H + 1, :], (Bsz, T * F))
    hstack = jnp.concatenate(hlast, axis=-1)                            # (B, T*H)
    y = jnp.dot(hstack, Wfc, preferred_element_type=f32) + bfc          # (B, T*F)

    # ---- single packed output slab -> one HBM writeback DMA, full-width row stores ----
    pad_y = jnp.zeros((Bsz, 128 - T * F), f32)
    pad_s = jnp.zeros((Bsz, 128 - L * H), f32)
    out_ref[0] = jnp.concatenate([y, pad_y], axis=-1)
    out_ref[1] = jnp.concatenate(hs + [pad_s], axis=-1)
    out_ref[2] = jnp.concatenate(cs + [pad_s], axis=-1)


def _full_spec(shape):
    nd = len(shape)
    return pl.BlockSpec(shape, lambda i, nd=nd: (0,) * nd)


def pack_recurrent(p):
    """Build the block-diagonal wavefront slabs (with W2@W3 pre-fused) from natural weights."""
    f32 = jnp.float32

    # per-layer fused projection: [x | h | hh] -> [pre_x | pre_h | hyper_gates]
    W1 = jnp.zeros((L, CIN, COUT), f32)
    W1 = W1.at[:, :DIN, :G].set(p["Wx"])
    W1 = W1.at[:, :DIN, 2 * G:].set(p["hWix"])
    W1 = W1.at[:, DIN:DIN + H, G:2 * G].set(p["Wh"])
    W1 = W1.at[:, DIN:DIN + H, 2 * G:].set(p["hWih"])
    W1 = W1.at[:, DIN + H:, 2 * G:].set(p["hWhh"])
    b1 = jnp.zeros((L, COUT), f32).at[:, 2 * G:].set(p["hb"][:, 0, :])

    # algebraic pre-fusion of the hyper projection: d = hh @ (Wz@Wd) + (bz@Wd [+ b0])
    W23 = jnp.concatenate([
        jnp.einsum("lne,leg->lng", p["Wzh"], p["Wdh"]),
        jnp.einsum("lne,leg->lng", p["Wzx"], p["Wdx"]),
        jnp.einsum("lne,leg->lng", p["Wzb"], p["Wdb"])], axis=-1)        # (L, NH, 3G)
    b23 = jnp.concatenate([
        jnp.einsum("lbe,leg->lbg", p["bzh"], p["Wdh"])[:, 0, :],
        jnp.einsum("lbe,leg->lbg", p["bzx"], p["Wdx"])[:, 0, :],
        p["b0"][:, 0, :]], axis=-1)                                      # (L, 3G)

    # block-diagonal stacking over layers so the wavefront does all layers in one matmul
    W1_bd = jnp.zeros((L * CIN, L * COUT), f32)
    W23_bd = jnp.zeros((L * NH, L * COUT), f32)
    b1_bd = jnp.zeros((1, L * COUT), f32)
    b23_bd = jnp.zeros((1, L * COUT), f32)
    for l in range(L):
        W1_bd = W1_bd.at[l * CIN:(l + 1) * CIN, l * COUT:(l + 1) * COUT].set(W1[l])
        W23_bd = W23_bd.at[l * NH:(l + 1) * NH, l * COUT:l * COUT + 3 * G].set(W23[l])
        b1_bd = b1_bd.at[0, l * COUT:(l + 1) * COUT].set(b1[l])
        b23_bd = b23_bd.at[0, l * COUT:l * COUT + 3 * G].set(b23[l])

    # MXU operands in bf16; accumulation + all elementwise/activation math stay f32.
    Wbd = jnp.concatenate([W1_bd, W23_bd], axis=0).astype(jnp.bfloat16)  # (L*(CIN+NH), L*COUT)
    bias = jnp.concatenate([b1_bd, b23_bd], axis=0)                      # (2, L*COUT) f32
    return Wbd, bias


def pack_fc(p, T):
    """Block-diag fc head over the T time steps: one (B, T*H) @ (T*H, T*F) matmul in-kernel."""
    f32 = jnp.float32
    Wfc = p["Wfc"].astype(f32)
    bfc = p["bfc"].astype(f32)
    slab = jnp.zeros((T * H + 1, T * F), f32)
    for t in range(T):
        slab = slab.at[t * H:(t + 1) * H, t * F:(t + 1) * F].set(Wfc)
        slab = slab.at[T * H, t * F:(t + 1) * F].set(bfc[0])
    return slab


def meta_viewport_lstm(x, hidden, params):
    """x: (T, B, F) float32 time-major. hidden: (h0, c0), each (L, B, H)."""
    T, B, Fdim = x.shape
    assert Fdim == F and DIN == H and T * F <= 128 and L * H <= 128
    h0, c0 = hidden

    x_pad = jnp.zeros((T, B, DIN), jnp.float32).at[:, :, :F].set(x.astype(jnp.float32))
    state0 = jnp.concatenate([h0.astype(jnp.float32), c0.astype(jnp.float32)], axis=0)  # (2L,B,H)
    Wbd, bias = pack_recurrent(params)
    fcslab = pack_fc(params, T)

    args = (x_pad, state0, Wbd, bias, fcslab)
    out = pl.pallas_call(
        meta_lstm_kernel,
        out_shape=jax.ShapeDtypeStruct((3, B, 128), jnp.float32),
        grid_spec=pltpu.PrefetchScalarGridSpec(
            num_scalar_prefetch=0,
            grid=(1,),                                   # whole recurrence in one grid step
            in_specs=[_full_spec(a.shape) for a in args],
            out_specs=_full_spec((3, B, 128))),
        compiler_params=pltpu.CompilerParams(dimension_semantics=("arbitrary",)),
    )(*args)

    # layout plumbing only (wrapper side): split the packed slab back into y / hT / cT
    y = out[0, :, :T * F].reshape(B, T, F).transpose(1, 0, 2)
    hT = out[1, :, :L * H].reshape(B, L, H).transpose(1, 0, 2)
    cT = out[2, :, :L * H].reshape(B, L, H).transpose(1, 0, 2)
    return y, hT, cT


def init_params(key):
    ks = list(jax.random.split(key, 24))

    def w(k, shape, scale=0.1):
        return (scale * jax.random.normal(k, shape)).astype(jnp.float32)

    def blockdiag_stack(k, scale=0.1):
        blocks = scale * jax.random.normal(k, (L, 4, E, H))
        M = jnp.zeros((L, 4 * E, 4 * H), jnp.float32)
        for g in range(4):
            M = M.at[:, g * E:(g + 1) * E, g * H:(g + 1) * H].set(blocks[:, g])
        return M

    return dict(
        Wx=w(ks[0], (L, DIN, 4 * H)),
        Wh=w(ks[1], (L, H, 4 * H)),
        hWix=w(ks[2], (L, DIN, 4 * NH)),
        hWih=w(ks[3], (L, H, 4 * NH)),
        hWhh=w(ks[4], (L, NH, 4 * NH)),
        hb=w(ks[5], (L, 1, 4 * NH)),
        Wzh=w(ks[6], (L, NH, 4 * E)),
        bzh=w(ks[7], (L, 1, 4 * E)),
        Wzx=w(ks[8], (L, NH, 4 * E)),
        bzx=w(ks[9], (L, 1, 4 * E)),
        Wzb=w(ks[10], (L, NH, 4 * E)),
        Wdh=blockdiag_stack(ks[11]),
        Wdx=blockdiag_stack(ks[12]),
        Wdb=blockdiag_stack(ks[13]),
        b0=w(ks[14], (L, 1, 4 * H)),
        Wfc=w(ks[15], (H, F)),
        bfc=w(ks[16], (1, F)),
    )


def reference(x, h0, c0, p):
    """Pure-JAX f32 reference of the same forward pass (unfused weights, t/l order)."""
    T, B, _ = x.shape
    x_pad = jnp.zeros((T, B, DIN), jnp.float32).at[:, :, :F].set(x)
    h, c = h0, c0
    hh = jnp.zeros((L, B, NH), jnp.float32)
    hc = jnp.zeros((L, B, NH), jnp.float32)
    ys = []
    for t in range(T):
        layer_in = x_pad[t]
        hn, cn, hhn, hcn = [], [], [], []
        for l in range(L):
            hg = (layer_in @ p["hWix"][l] + h[l] @ p["hWih"][l]
                  + hh[l] @ p["hWhh"][l] + p["hb"][l])
            hi = jax.nn.sigmoid(hg[:, :NH]); hf = jax.nn.sigmoid(hg[:, NH:2 * NH])
            hgg = jnp.tanh(hg[:, 2 * NH:3 * NH]); ho = jax.nn.sigmoid(hg[:, 3 * NH:])
            hc_n = hf * hc[l] + hi * hgg
            hh_n = ho * jnp.tanh(hc_n)
            z_h = hh_n @ p["Wzh"][l] + p["bzh"][l]
            z_x = hh_n @ p["Wzx"][l] + p["bzx"][l]
            z_b = hh_n @ p["Wzb"][l]
            d_h = z_h @ p["Wdh"][l]; d_x = z_x @ p["Wdx"][l]
            bias = z_b @ p["Wdb"][l] + p["b0"][l]
            g = d_x * (layer_in @ p["Wx"][l]) + d_h * (h[l] @ p["Wh"][l]) + bias
            i_g = jax.nn.sigmoid(g[:, :H]); f_g = jax.nn.sigmoid(g[:, H:2 * H])
            g_g = jnp.tanh(g[:, 2 * H:3 * H]); o_g = jax.nn.sigmoid(g[:, 3 * H:])
            c_n = f_g * c[l] + i_g * g_g
            h_n = o_g * jnp.tanh(c_n)
            hn.append(h_n); cn.append(c_n); hhn.append(hh_n); hcn.append(hc_n)
            layer_in = h_n
        h, c = jnp.stack(hn), jnp.stack(cn)
        hh, hc = jnp.stack(hhn), jnp.stack(hcn)
        ys.append(layer_in @ p["Wfc"] + p["bfc"])
    return jnp.stack(ys), h, c


if __name__ == "__main__":
    key = jax.random.PRNGKey(0)
    kx, kh, kc, kp = jax.random.split(key, 4)
    T, B = 8, 2
    x = jax.random.normal(kx, (T, B, F), jnp.float32)    # (seq, batch, feature)
    h0 = jax.random.normal(kh, (L, B, H), jnp.float32)   # like init_hidden()
    c0 = jax.random.normal(kc, (L, B, H), jnp.float32)
    params = init_params(kp)

    y, hT, cT = jax.block_until_ready(meta_viewport_lstm(x, (h0, c0), params))

    # tolerance loosened for bf16 MXU operands (elementwise math stays f32)
    y_ref, h_ref, c_ref = reference(x, h0, c0, params)
    assert jnp.allclose(y, y_ref, atol=5e-2, rtol=5e-2)
    assert jnp.allclose(hT, h_ref, atol=5e-2, rtol=5e-2)
    assert jnp.allclose(cT, c_ref, atol=5e-2, rtol=5e-2)
    print("KERNEL_OK")
</pallas_src>

<mosaic_0001>
module attributes {stable_mosaic.version = 11 : i64} {
  func.func @meta_lstm_kernel(%arg0: i32, %arg1: memref<8x2x8xf32, #tpu.memory_space<vmem>>, %arg2: memref<4x2x8xf32, #tpu.memory_space<vmem>>, %arg3: memref<96x256xbf16, #tpu.memory_space<vmem>>, %arg4: memref<2x256xf32, #tpu.memory_space<vmem>>, %arg5: memref<65x16xf32, #tpu.memory_space<vmem>>, %arg6: memref<3x2x128xf32, #tpu.memory_space<vmem>>) attributes {dimension_semantics = [#tpu.dimension_semantics<arbitrary>], iteration_bounds = array<i64: 1>, scalar_prefetch = 0 : i64, scratch_operands = 0 : i64, tpu.core_type = #tpu.core_type<tc>, window_params = [{pipeline_mode = #tpu.pipeline_mode<synchronous>, transform_indices = @transform_0, window_bounds = array<i64: 8, 2, 8>}, {pipeline_mode = #tpu.pipeline_mode<synchronous>, transform_indices = @transform_1, window_bounds = array<i64: 4, 2, 8>}, {pipeline_mode = #tpu.pipeline_mode<synchronous>, transform_indices = @transform_2, window_bounds = array<i64: 96, 256>}, {pipeline_mode = #tpu.pipeline_mode<synchronous>, transform_indices = @transform_3, window_bounds = array<i64: 2, 256>}, {pipeline_mode = #tpu.pipeline_mode<synchronous>, transform_indices = @transform_4, window_bounds = array<i64: 65, 16>}, {pipeline_mode = #tpu.pipeline_mode<synchronous>, transform_indices = @transform_5, window_bounds = array<i64: 3, 2, 128>}]} {
    %c0 = arith.constant 0 : index
    %c0_0 = arith.constant 0 : index
    %0 = vector.load %arg3[%c0, %c0_0] : memref<96x256xbf16, #tpu.memory_space<vmem>>, vector<64x256xbf16>
    %c64 = arith.constant 64 : index
    %c0_1 = arith.constant 0 : index
    %1 = vector.load %arg3[%c64, %c0_1] : memref<96x256xbf16, #tpu.memory_space<vmem>>, vector<32x256xbf16>
    %c0_2 = arith.constant 0 : index
    %c0_3 = arith.constant 0 : index
    %2 = vector.load %arg4[%c0_2, %c0_3] : memref<2x256xf32, #tpu.memory_space<vmem>>, vector<1x256xf32>
    %3 = vector.shape_cast %2 : vector<1x256xf32> to vector<1x256xf32>
    %4 = vector.broadcast %3 : vector<1x256xf32> to vector<2x256xf32>
    %c1 = arith.constant 1 : index
    %c0_4 = arith.constant 0 : index
    %5 = vector.load %arg4[%c1, %c0_4] : memref<2x256xf32, #tpu.memory_space<vmem>>, vector<1x256xf32>
    %6 = vector.shape_cast %5 : vector<1x256xf32> to vector<1x256xf32>
    %7 = vector.broadcast %6 : vector<1x256xf32> to vector<2x256xf32>
    %c0_5 = arith.constant 0 : index
    %c0_6 = arith.constant 0 : index
    %c0_7 = arith.constant 0 : index
    %8 = vector.load %arg1[%c0_5, %c0_6, %c0_7] : memref<8x2x8xf32, #tpu.memory_space<vmem>>, vector<1x2x8xf32>
    %9 = vector.shape_cast %8 : vector<1x2x8xf32> to vector<2x8xf32>
    %c1_8 = arith.constant 1 : index
    %c0_9 = arith.constant 0 : index
    %c0_10 = arith.constant 0 : index
    %10 = vector.load %arg1[%c1_8, %c0_9, %c0_10] : memref<8x2x8xf32, #tpu.memory_space<vmem>>, vector<1x2x8xf32>
    %11 = vector.shape_cast %10 : vector<1x2x8xf32> to vector<2x8xf32>
    %c2 = arith.constant 2 : index
    %c0_11 = arith.constant 0 : index
    %c0_12 = arith.constant 0 : index
    %12 = vector.load %arg1[%c2, %c0_11, %c0_12] : memref<8x2x8xf32, #tpu.memory_space<vmem>>, vector<1x2x8xf32>
    %13 = vector.shape_cast %12 : vector<1x2x8xf32> to vector<2x8xf32>
    %c3 = arith.constant 3 : index
    %c0_13 = arith.constant 0 : index
    %c0_14 = arith.constant 0 : index
    %14 = vector.load %arg1[%c3, %c0_13, %c0_14] : memref<8x2x8xf32, #tpu.memory_space<vmem>>, vector<1x2x8xf32>
    %15 = vector.shape_cast %14 : vector<1x2x8xf32> to vector<2x8xf32>
    %c4 = arith.constant 4 : index
    %c0_15 = arith.constant 0 : index
    %c0_16 = arith.constant 0 : index
    %16 = vector.load %arg1[%c4, %c0_15, %c0_16] : memref<8x2x8xf32, #tpu.memory_space<vmem>>, vector<1x2x8xf32>
    %17 = vector.shape_cast %16 : vector<1x2x8xf32> to vector<2x8xf32>
    %c5 = arith.constant 5 : index
    %c0_17 = arith.constant 0 : index
    %c0_18 = arith.constant 0 : index
    %18 = vector.load %arg1[%c5, %c0_17, %c0_18] : memref<8x2x8xf32, #tpu.memory_space<vmem>>, vector<1x2x8xf32>
    %19 = vector.shape_cast %18 : vector<1x2x8xf32> to vector<2x8xf32>
    %c6 = arith.constant 6 : index
    %c0_19 = arith.constant 0 : index
    %c0_20 = arith.constant 0 : index
    %20 = vector.load %arg1[%c6, %c0_19, %c0_20] : memref<8x2x8xf32, #tpu.memory_space<vmem>>, vector<1x2x8xf32>
    %21 = vector.shape_cast %20 : vector<1x2x8xf32> to vector<2x8xf32>
    %c7 = arith.constant 7 : index
    %c0_21 = arith.constant 0 : index
    %c0_22 = arith.constant 0 : index
    %22 = vector.load %arg1[%c7, %c0_21, %c0_22] : memref<8x2x8xf32, #tpu.memory_space<vmem>>, vector<1x2x8xf32>
    %23 = vector.shape_cast %22 : vector<1x2x8xf32> to vector<2x8xf32>
    %c0_23 = arith.constant 0 : index
    %c0_24 = arith.constant 0 : index
    %c0_25 = arith.constant 0 : index
    %24 = vector.load %arg2[%c0_23, %c0_24, %c0_25] : memref<4x2x8xf32, #tpu.memory_space<vmem>>, vector<1x2x8xf32>
    %25 = vector.shape_cast %24 : vector<1x2x8xf32> to vector<2x8xf32>
    %c1_26 = arith.constant 1 : index
    %c0_27 = arith.constant 0 : index
    %c0_28 = arith.constant 0 : index
    %26 = vector.load %arg2[%c1_26, %c0_27, %c0_28] : memref<4x2x8xf32, #tpu.memory_space<vmem>>, vector<1x2x8xf32>
    %27 = vector.shape_cast %26 : vector<1x2x8xf32> to vector<2x8xf32>
    %c2_29 = arith.constant 2 : index
    %c0_30 = arith.constant 0 : index
    %c0_31 = arith.constant 0 : index
    %28 = vector.load %arg2[%c2_29, %c0_30, %c0_31] : memref<4x2x8xf32, #tpu.memory_space<vmem>>, vector<1x2x8xf32>
    %29 = vector.shape_cast %28 : vector<1x2x8xf32> to vector<2x8xf32>
    %c3_32 = arith.constant 3 : index
    %c0_33 = arith.constant 0 : index
    %c0_34 = arith.constant 0 : index
    %30 = vector.load %arg2[%c3_32, %c0_33, %c0_34] : memref<4x2x8xf32, #tpu.memory_space<vmem>>, vector<1x2x8xf32>
    %31 = vector.shape_cast %30 : vector<1x2x8xf32> to vector<2x8xf32>
    %cst = arith.constant 0.000000e+00 : f32
    %32 = vector.broadcast %cst : f32 to vector<2x16xf32>
    %cst_35 = arith.constant 0.000000e+00 : f32
    %33 = vector.broadcast %cst_35 : f32 to vector<2x16xf32>
    %cst_36 = arith.constant 0.000000e+00 : f32
    %34 = vector.broadcast %cst_36 : f32 to vector<2x16xf32>
    %cst_37 = arith.constant 0.000000e+00 : f32
    %35 = vector.broadcast %cst_37 : f32 to vector<2x16xf32>
    %cst_38 = arith.constant 0.000000e+00 : f32
    %36 = vector.broadcast %cst_38 : f32 to vector<2x8xf32>
    %cst_39 = arith.constant 0.000000e+00 : f32
    %37 = vector.broadcast %cst_39 : f32 to vector<2x8xf32>
    %38 = tpu.concatenate %9, %25, %32, %36, %27, %33 in 1 : vector<2x8xf32>, vector<2x8xf32>, vector<2x16xf32>, vector<2x8xf32>, vector<2x8xf32>, vector<2x16xf32> -> vector<2x64xf32>
    %39 = arith.truncf %38 : vector<2x64xf32> to vector<2x64xbf16>
    %cst_40 = arith.constant dense<0.000000e+00> : vector<2x256xf32>
    %40 = tpu.matmul %39, %0, %cst_40 {dimension_numbers = #tpu.dot_dimension_numbers<[1], [0], [0], [1], [0, 0, 1, 1], [], []>} : vector<2x64xbf16>, vector<64x256xbf16>, vector<2x256xf32> -> vector<2x256xf32>
    %41 = arith.addf %40, %4 : vector<2x256xf32>
    %42 = vector.extract_strided_slice %41 {offsets = [0, 0], sizes = [2, 128], strides = [1, 1]} : vector<2x256xf32> to vector<2x128xf32>
    %43 = vector.extract_strided_slice %42 {offsets = [0, 0], sizes = [2, 32], strides = [1, 1]} : vector<2x128xf32> to vector<2x32xf32>
    %44 = vector.extract_strided_slice %42 {offsets = [0, 32], sizes = [2, 32], strides = [1, 1]} : vector<2x128xf32> to vector<2x32xf32>
    %45 = vector.extract_strided_slice %42 {offsets = [0, 64], sizes = [2, 64], strides = [1, 1]} : vector<2x128xf32> to vector<2x64xf32>
    %46 = arith.negf %45 : vector<2x64xf32>
    %47 = math.exp %46 : vector<2x64xf32>
    %cst_41 = arith.constant 1.000000e+00 : f32
    %48 = vector.broadcast %cst_41 : f32 to vector<2x64xf32>
    %49 = arith.addf %48, %47 : vector<2x64xf32>
    %50 = arith.divf %48, %49 : vector<2x64xf32>
    %51 = math.tanh %45 : vector<2x64xf32>
    %52 = vector.extract_strided_slice %50 {offsets = [0, 16], sizes = [2, 16], strides = [1, 1]} : vector<2x64xf32> to vector<2x16xf32>
    %53 = arith.mulf %52, %34 : vector<2x16xf32>
    %54 = vector.extract_strided_slice %50 {offsets = [0, 0], sizes = [2, 16], strides = [1, 1]} : vector<2x64xf32> to vector<2x16xf32>
    %55 = vector.extract_strided_slice %51 {offsets = [0, 32], sizes = [2, 16], strides = [1, 1]} : vector<2x64xf32> to vector<2x16xf32>
    %56 = arith.mulf %54, %55 : vector<2x16xf32>
    %57 = arith.addf %53, %56 : vector<2x16xf32>
    %58 = vector.extract_strided_slice %50 {offsets = [0, 48], sizes = [2, 16], strides = [1, 1]} : vector<2x64xf32> to vector<2x16xf32>
    %59 = math.tanh %57 : vector<2x16xf32>
    %60 = arith.mulf %58, %59 : vector<2x16xf32>
    %61 = vector.extract_strided_slice %41 {offsets = [0, 128], sizes = [2, 128], strides = [1, 1]} : vector<2x256xf32> to vector<2x128xf32>
    %62 = vector.extract_strided_slice %61 {offsets = [0, 64], sizes = [2, 64], strides = [1, 1]} : vector<2x128xf32> to vector<2x64xf32>
    %63 = arith.negf %62 : vector<2x64xf32>
    %64 = math.exp %63 : vector<2x64xf32>
    %cst_42 = arith.constant 1.000000e+00 : f32
    %65 = vector.broadcast %cst_42 : f32 to vector<2x64xf32>
    %66 = arith.addf %65, %64 : vector<2x64xf32>
    %67 = arith.divf %65, %66 : vector<2x64xf32>
    %68 = math.tanh %62 : vector<2x64xf32>
    %69 = vector.extract_strided_slice %67 {offsets = [0, 16], sizes = [2, 16], strides = [1, 1]} : vector<2x64xf32> to vector<2x16xf32>
    %70 = arith.mulf %69, %35 : vector<2x16xf32>
    %71 = vector.extract_strided_slice %67 {offsets = [0, 0], sizes = [2, 16], strides = [1, 1]} : vector<2x64xf32> to vector<2x16xf32>
    %72 = vector.extract_strided_slice %68 {offsets = [0, 32], sizes = [2, 16], strides = [1, 1]} : vector<2x64xf32> to vector<2x16xf32>
    %73 = arith.mulf %71, %72 : vector<2x16xf32>
    %74 = arith.addf %70, %73 : vector<2x16xf32>
    %75 = vector.extract_strided_slice %67 {offsets = [0, 48], sizes = [2, 16], strides = [1, 1]} : vector<2x64xf32> to vector<2x16xf32>
    %76 = math.tanh %74 : vector<2x16xf32>
    %77 = arith.mulf %75, %76 : vector<2x16xf32>
    %78 = tpu.concatenate %60, %77 in 1 : vector<2x16xf32>, vector<2x16xf32> -> vector<2x32xf32>
    %79 = arith.truncf %78 : vector<2x32xf32> to vector<2x32xbf16>
    %cst_43 = arith.constant dense<0.000000e+00> : vector<2x256xf32>
    %80 = tpu.matmul %79, %1, %cst_43 {dimension_numbers = #tpu.dot_dimension_numbers<[1], [0], [0], [1], [0, 0, 1, 1], [], []>} : vector<2x32xbf16>, vector<32x256xbf16>, vector<2x256xf32> -> vector<2x256xf32>
    %81 = arith.addf %80, %7 : vector<2x256xf32>
    %82 = vector.extract_strided_slice %81 {offsets = [0, 0], sizes = [2, 96], strides = [1, 1]} : vector<2x256xf32> to vector<2x96xf32>
    %83 = vector.extract_strided_slice %82 {offsets = [0, 32], sizes = [2, 32], strides = [1, 1]} : vector<2x96xf32> to vector<2x32xf32>
    %84 = arith.mulf %83, %43 : vector<2x32xf32>
    %85 = vector.extract_strided_slice %82 {offsets = [0, 0], sizes = [2, 32], strides = [1, 1]} : vector<2x96xf32> to vector<2x32xf32>
    %86 = arith.mulf %85, %44 : vector<2x32xf32>
    %87 = arith.addf %84, %86 : vector<2x32xf32>
    %88 = vector.extract_strided_slice %82 {offsets = [0, 64], sizes = [2, 32], strides = [1, 1]} : vector<2x96xf32> to vector<2x32xf32>
    %89 = arith.addf %87, %88 : vector<2x32xf32>
    %90 = arith.negf %89 : vector<2x32xf32>
    %91 = math.exp %90 : vector<2x32xf32>
    %cst_44 = arith.constant 1.000000e+00 : f32
    %92 = vector.broadcast %cst_44 : f32 to vector<2x32xf32>
    %93 = arith.addf %92, %91 : vector<2x32xf32>
    %94 = arith.divf %92, %93 : vector<2x32xf32>
    %95 = math.tanh %89 : vector<2x32xf32>
    %96 = vector.extract_strided_slice %94 {offsets = [0, 8], sizes = [2, 8], strides = [1, 1]} : vector<2x32xf32> to vector<2x8xf32>
    %97 = arith.mulf %96, %29 : vector<2x8xf32>
    %98 = vector.extract_strided_slice %94 {offsets = [0, 0], sizes = [2, 8], strides = [1, 1]} : vector<2x32xf32> to vector<2x8xf32>
    %99 = vector.extract_strided_slice %95 {offsets = [0, 16], sizes = [2, 8], strides = [1, 1]} : vector<2x32xf32> to vector<2x8xf32>
    %100 = arith.mulf %98, %99 : vector<2x8xf32>
    %101 = arith.addf %97, %100 : vector<2x8xf32>
    %102 = vector.extract_strided_slice %94 {offsets = [0, 24], sizes = [2, 8], strides = [1, 1]} : vector<2x32xf32> to vector<2x8xf32>
    %103 = math.tanh %101 : vector<2x8xf32>
    %104 = arith.mulf %102, %103 : vector<2x8xf32>
    %105 = tpu.concatenate %11, %104, %60, %104, %27, %33 in 1 : vector<2x8xf32>, vector<2x8xf32>, vector<2x16xf32>, vector<2x8xf32>, vector<2x8xf32>, vector<2x16xf32> -> vector<2x64xf32>
    %106 = arith.truncf %105 : vector<2x64xf32> to vector<2x64xbf16>
    %cst_45 = arith.constant dense<0.000000e+00> : vector<2x256xf32>
    %107 = tpu.matmul %106, %0, %cst_45 {dimension_numbers = #tpu.dot_dimension_numbers<[1], [0], [0], [1], [0, 0, 1, 1], [], []>} : vector<2x64xbf16>, vector<64x256xbf16>, vector<2x256xf32> -> vector<2x256xf32>
    %108 = arith.addf %107, %4 : vector<2x256xf32>
    %109 = vector.extract_strided_slice %108 {offsets = [0, 0], sizes = [2, 128], strides = [1, 1]} : vector<2x256xf32> to vector<2x128xf32>
    %110 = vector.extract_strided_slice %109 {offsets = [0, 0], sizes = [2, 32], strides = [1, 1]} : vector<2x128xf32> to vector<2x32xf32>
    %111 = vector.extract_strided_slice %109 {offsets = [0, 32], sizes = [2, 32], strides = [1, 1]} : vector<2x128xf32> to vector<2x32xf32>
    %112 = vector.extract_strided_slice %109 {offsets = [0, 64], sizes = [2, 64], strides = [1, 1]} : vector<2x128xf32> to vector<2x64xf32>
    %113 = arith.negf %112 : vector<2x64xf32>
    %114 = math.exp %113 : vector<2x64xf32>
    %cst_46 = arith.constant 1.000000e+00 : f32
    %115 = vector.broadcast %cst_46 : f32 to vector<2x64xf32>
    %116 = arith.addf %115, %114 : vector<2x64xf32>
    %117 = arith.divf %115, %116 : vector<2x64xf32>
    %118 = math.tanh %112 : vector<2x64xf32>
    %119 = vector.extract_strided_slice %117 {offsets = [0, 16], sizes = [2, 16], strides = [1, 1]} : vector<2x64xf32> to vector<2x16xf32>
    %120 = arith.mulf %119, %57 : vector<2x16xf32>
    %121 = vector.extract_strided_slice %117 {offsets = [0, 0], sizes = [2, 16], strides = [1, 1]} : vector<2x64xf32> to vector<2x16xf32>
    %122 = vector.extract_strided_slice %118 {offsets = [0, 32], sizes = [2, 16], strides = [1, 1]} : vector<2x64xf32> to vector<2x16xf32>
    %123 = arith.mulf %121, %122 : vector<2x16xf32>
    %124 = arith.addf %120, %123 : vector<2x16xf32>
    %125 = vector.extract_strided_slice %117 {offsets = [0, 48], sizes = [2, 16], strides = [1, 1]} : vector<2x64xf32> to vector<2x16xf32>
    %126 = math.tanh %124 : vector<2x16xf32>
    %127 = arith.mulf %125, %126 : vector<2x16xf32>
    %128 = vector.extract_strided_slice %108 {offsets = [0, 128], sizes = [2, 128], strides = [1, 1]} : vector<2x256xf32> to vector<2x128xf32>
    %129 = vector.extract_strided_slice %128 {offsets = [0, 0], sizes = [2, 32], strides = [1, 1]} : vector<2x128xf32> to vector<2x32xf32>
    %130 = vector.extract_strided_slice %128 {offsets = [0, 32], sizes = [2, 32], strides = [1, 1]} : vector<2x128xf32> to vector<2x32xf32>
    %131 = vector.extract_strided_slice %128 {offsets = [0, 64], sizes = [2, 64], strides = [1, 1]} : vector<2x128xf32> to vector<2x64xf32>
    %132 = arith.negf %131 : vector<2x64xf32>
    %133 = math.exp %132 : vector<2x64xf32>
    %cst_47 = arith.constant 1.000000e+00 : f32
    %134 = vector.broadcast %cst_47 : f32 to vector<2x64xf32>
    %135 = arith.addf %134, %133 : vector<2x64xf32>
    %136 = arith.divf %134, %135 : vector<2x64xf32>
    %137 = math.tanh %131 : vector<2x64xf32>
    %138 = vector.extract_strided_slice %136 {offsets = [0, 16], sizes = [2, 16], strides = [1, 1]} : vector<2x64xf32> to vector<2x16xf32>
    %139 = arith.mulf %138, %35 : vector<2x16xf32>
    %140 = vector.extract_strided_slice %136 {offsets = [0, 0], sizes = [2, 16], strides = [1, 1]} : vector<2x64xf32> to vector<2x16xf32>
    %141 = vector.extract_strided_slice %137 {offsets = [0, 32], sizes = [2, 16], strides = [1, 1]} : vector<2x64xf32> to vector<2x16xf32>
    %142 = arith.mulf %140, %141 : vector<2x16xf32>
    %143 = arith.addf %139, %142 : vector<2x16xf32>
    %144 = vector.extract_strided_slice %136 {offsets = [0, 48], sizes = [2, 16], strides = [1, 1]} : vector<2x64xf32> to vector<2x16xf32>
    %145 = math.tanh %143 : vector<2x16xf32>
    %146 = arith.mulf %144, %145 : vector<2x16xf32>
    %147 = tpu.concatenate %127, %146 in 1 : vector<2x16xf32>, vector<2x16xf32> -> vector<2x32xf32>
    %148 = arith.truncf %147 : vector<2x32xf32> to vector<2x32xbf16>
    %cst_48 = arith.constant dense<0.000000e+00> : vector<2x256xf32>
    %149 = tpu.matmul %148, %1, %cst_48 {dimension_numbers = #tpu.dot_dimension_numbers<[1], [0], [0], [1], [0, 0, 1, 1], [], []>} : vector<2x32xbf16>, vector<32x256xbf16>, vector<2x256xf32> -> vector<2x256xf32>
    %150 = arith.addf %149, %7 : vector<2x256xf32>
    %151 = vector.extract_strided_slice %150 {offsets = [0, 0], sizes = [2, 96], strides = [1, 1]} : vector<2x256xf32> to vector<2x96xf32>
    %152 = vector.extract_strided_slice %151 {offsets = [0, 32], sizes = [2, 32], strides = [1, 1]} : vector<2x96xf32> to vector<2x32xf32>
    %153 = arith.mulf %152, %110 : vector<2x32xf32>
    %154 = vector.extract_strided_slice %151 {offsets = [0, 0], sizes = [2, 32], strides = [1, 1]} : vector<2x96xf32> to vector<2x32xf32>
    %155 = arith.mulf %154, %111 : vector<2x32xf32>
    %156 = arith.addf %153, %155 : vector<2x32xf32>
    %157 = vector.extract_strided_slice %151 {offsets = [0, 64], sizes = [2, 32], strides = [1, 1]} : vector<2x96xf32> to vector<2x32xf32>
    %158 = arith.addf %156, %157 : vector<2x32xf32>
    %159 = arith.negf %158 : vector<2x32xf32>
    %160 = math.exp %159 : vector<2x32xf32>
    %cst_49 = arith.constant 1.000000e+00 : f32
    %161 = vector.broadcast %cst_49 : f32 to vector<2x32xf32>
    %162 = arith.addf %161, %160 : vector<2x32xf32>
    %163 = arith.divf %161, %162 : vector<2x32xf32>
    %164 = math.tanh %158 : vector<2x32xf32>
    %165 = vector.extract_strided_slice %163 {offsets = [0, 8], sizes = [2, 8], strides = [1, 1]} : vector<2x32xf32> to vector<2x8xf32>
    %166 = arith.mulf %165, %101 : vector<2x8xf32>
    %167 = vector.extract_strided_slice %163 {offsets = [0, 0], sizes = [2, 8], strides = [1, 1]} : vector<2x32xf32> to vector<2x8xf32>
    %168 = vector.extract_strided_slice %164 {offsets = [0, 16], sizes = [2, 8], strides = [1, 1]} : vector<2x32xf32> to vector<2x8xf32>
    %169 = arith.mulf %167, %168 : vector<2x8xf32>
    %170 = arith.addf %166, %169 : vector<2x8xf32>
    %171 = vector.extract_strided_slice %163 {offsets = [0, 24], sizes = [2, 8], strides = [1, 1]} : vector<2x32xf32> to vector<2x8xf32>
    %172 = math.tanh %170 : vector<2x8xf32>
    %173 = arith.mulf %171, %172 : vector<2x8xf32>
    %174 = vector.extract_strided_slice %150 {offsets = [0, 128], sizes = [2, 96], strides = [1, 1]} : vector<2x256xf32> to vector<2x96xf32>
    %175 = vector.extract_strided_slice %174 {offsets = [0, 32], sizes = [2, 32], strides = [1, 1]} : vector<2x96xf32> to vector<2x32xf32>
    %176 = arith.mulf %175, %129 : vector<2x32xf32>
    %177 = vector.extract_strided_slice %174 {offsets = [0, 0], sizes = [2, 32], strides = [1, 1]} : vector<2x96xf32> to vector<2x32xf32>
    %178 = arith.mulf %177, %130 : vector<2x32xf32>
    %179 = arith.addf %176, %178 : vector<2x32xf32>
    %180 = vector.extract_strided_slice %174 {offsets = [0, 64], sizes = [2, 32], strides = [1, 1]} : vector<2x96xf32> to vector<2x32xf32>
    %181 = arith.addf %179, %180 : vector<2x32xf32>
    %182 = arith.negf %181 : vector<2x32xf32>
    %183 = math.exp %182 : vector<2x32xf32>
    %cst_50 = arith.constant 1.000000e+00 : f32
    %184 = vector.broadcast %cst_50 : f32 to vector<2x32xf32>
    %185 = arith.addf %184, %183 : vector<2x32xf32>
    %186 = arith.divf %184, %185 : vector<2x32xf32>
    %187 = math.tanh %181 : vector<2x32xf32>
    %188 = vector.extract_strided_slice %186 {offsets = [0, 8], sizes = [2, 8], strides = [1, 1]} : vector<2x32xf32> to vector<2x8xf32>
    %189 = arith.mulf %188, %31 : vector<2x8xf32>
    %190 = vector.extract_strided_slice %186 {offsets = [0, 0], sizes = [2, 8], strides = [1, 1]} : vector<2x32xf32> to vector<2x8xf32>
    %191 = vector.extract_strided_slice %187 {offsets = [0, 16], sizes = [2, 8], strides = [1, 1]} : vector<2x32xf32> to vector<2x8xf32>
    %192 = arith.mulf %190, %191 : vector<2x8xf32>
    %193 = arith.addf %189, %192 : vector<2x8xf32>
    %194 = vector.extract_strided_slice %186 {offsets = [0, 24], sizes = [2, 8], strides = [1, 1]} : vector<2x32xf32> to vector<2x8xf32>
    %195 = math.tanh %193 : vector<2x8xf32>
    %196 = arith.mulf %194, %195 : vector<2x8xf32>
    %197 = tpu.concatenate %13, %173, %127, %173, %196, %146 in 1 : vector<2x8xf32>, vector<2x8xf32>, vector<2x16xf32>, vector<2x8xf32>, vector<2x8xf32>, vector<2x16xf32> -> vector<2x64xf32>
    %198 = arith.truncf %197 : vector<2x64xf32> to vector<2x64xbf16>
    %cst_51 = arith.constant dense<0.000000e+00> : vector<2x256xf32>
    %199 = tpu.matmul %198, %0, %cst_51 {dimension_numbers = #tpu.dot_dimension_numbers<[1], [0], [0], [1], [0, 0, 1, 1], [], []>} : vector<2x64xbf16>, vector<64x256xbf16>, vector<2x256xf32> -> vector<2x256xf32>
    %200 = arith.addf %199, %4 : vector<2x256xf32>
    %201 = vector.extract_strided_slice %200 {offsets = [0, 0], sizes = [2, 128], strides = [1, 1]} : vector<2x256xf32> to vector<2x128xf32>
    %202 = vector.extract_strided_slice %201 {offsets = [0, 0], sizes = [2, 32], strides = [1, 1]} : vector<2x128xf32> to vector<2x32xf32>
    %203 = vector.extract_strided_slice %201 {offsets = [0, 32], sizes = [2, 32], strides = [1, 1]} : vector<2x128xf32> to vector<2x32xf32>
    %204 = vector.extract_strided_slice %201 {offsets = [0, 64], sizes = [2, 64], strides = [1, 1]} : vector<2x128xf32> to vector<2x64xf32>
    %205 = arith.negf %204 : vector<2x64xf32>
    %206 = math.exp %205 : vector<2x64xf32>
    %cst_52 = arith.constant 1.000000e+00 : f32
    %207 = vector.broadcast %cst_52 : f32 to vector<2x64xf32>
    %208 = arith.addf %207, %206 : vector<2x64xf32>
    %209 = arith.divf %207, %208 : vector<2x64xf32>
    %210 = math.tanh %204 : vector<2x64xf32>
    %211 = vector.extract_strided_slice %209 {offsets = [0, 16], sizes = [2, 16], strides = [1, 1]} : vector<2x64xf32> to vector<2x16xf32>
    %212 = arith.mulf %211, %124 : vector<2x16xf32>
    %213 = vector.extract_strided_slice %209 {offsets = [0, 0], sizes = [2, 16], strides = [1, 1]} : vector<2x64xf32> to vector<2x16xf32>
    %214 = vector.extract_strided_slice %210 {offsets = [0, 32], sizes = [2, 16], strides = [1, 1]} : vector<2x64xf32> to vector<2x16xf32>
    %215 = arith.mulf %213, %214 : vector<2x16xf32>
    %216 = arith.addf %212, %215 : vector<2x16xf32>
    %217 = vector.extract_strided_slice %209 {offsets = [0, 48], sizes = [2, 16], strides = [1, 1]} : vector<2x64xf32> to vector<2x16xf32>
    %218 = math.tanh %216 : vector<2x16xf32>
    %219 = arith.mulf %217, %218 : vector<2x16xf32>
    %220 = vector.extract_strided_slice %200 {offsets = [0, 128], sizes = [2, 128], strides = [1, 1]} : vector<2x256xf32> to vector<2x128xf32>
    %221 = vector.extract_strided_slice %220 {offsets = [0, 0], sizes = [2, 32], strides = [1, 1]} : vector<2x128xf32> to vector<2x32xf32>
    %222 = vector.extract_strided_slice %220 {offsets = [0, 32], sizes = [2, 32], strides = [1, 1]} : vector<2x128xf32> to vector<2x32xf32>
    %223 = vector.extract_strided_slice %220 {offsets = [0, 64], sizes = [2, 64], strides = [1, 1]} : vector<2x128xf32> to vector<2x64xf32>
    %224 = arith.negf %223 : vector<2x64xf32>
    %225 = math.exp %224 : vector<2x64xf32>
    %cst_53 = arith.constant 1.000000e+00 : f32
    %226 = vector.broadcast %cst_53 : f32 to vector<2x64xf32>
    %227 = arith.addf %226, %225 : vector<2x64xf32>
    %228 = arith.divf %226, %227 : vector<2x64xf32>
    %229 = math.tanh %223 : vector<2x64xf32>
    %230 = vector.extract_strided_slice %228 {offsets = [0, 16], sizes = [2, 16], strides = [1, 1]} : vector<2x64xf32> to vector<2x16xf32>
    %231 = arith.mulf %230, %143 : vector<2x16xf32>
    %232 = vector.extract_strided_slice %228 {offsets = [0, 0], sizes = [2, 16], strides = [1, 1]} : vector<2x64xf32> to vector<2x16xf32>
    %233 = vector.extract_strided_slice %229 {offsets = [0, 32], sizes = [2, 16], strides = [1, 1]} : vector<2x64xf32> to vector<2x16xf32>
    %234 = arith.mulf %232, %233 : vector<2x16xf32>
    %235 = arith.addf %231, %234 : vector<2x16xf32>
    %236 = vector.extract_strided_slice %228 {offsets = [0, 48], sizes = [2, 16], strides = [1, 1]} : vector<2x64xf32> to vector<2x16xf32>
    %237 = math.tanh %235 : vector<2x16xf32>
    %238 = arith.mulf %236, %237 : vector<2x16xf32>
    %239 = tpu.concatenate %219, %238 in 1 : vector<2x16xf32>, vector<2x16xf32> -> vector<2x32xf32>
    %240 = arith.truncf %239 : vector<2x32xf32> to vector<2x32xbf16>
    %cst_54 = arith.constant dense<0.000000e+00> : vector<2x256xf32>
    %241 = tpu.matmul %240, %1, %cst_54 {dimension_numbers = #tpu.dot_dimension_numbers<[1], [0], [0], [1], [0, 0, 1, 1], [], []>} : vector<2x32xbf16>, vector<32x256xbf16>, vector<2x256xf32> -> vector<2x256xf32>
    %242 = arith.addf %241, %7 : vector<2x256xf32>
    %243 = vector.extract_strided_slice %242 {offsets = [0, 0], sizes = [2, 96], strides = [1, 1]} : vector<2x256xf32> to vector<2x96xf32>
    %244 = vector.extract_strided_slice %243 {offsets = [0, 32], sizes = [2, 32], strides = [1, 1]} : vector<2x96xf32> to vector<2x32xf32>
    %245 = arith.mulf %244, %202 : vector<2x32xf32>
    %246 = vector.extract_strided_slice %243 {offsets = [0, 0], sizes = [2, 32], strides = [1, 1]} : vector<2x96xf32> to vector<2x32xf32>
    %247 = arith.mulf %246, %203 : vector<2x32xf32>
    %248 = arith.addf %245, %247 : vector<2x32xf32>
    %249 = vector.extract_strided_slice %243 {offsets = [0, 64], sizes = [2, 32], strides = [1, 1]} : vector<2x96xf32> to vector<2x32xf32>
    %250 = arith.addf %248, %249 : vector<2x32xf32>
    %251 = arith.negf %250 : vector<2x32xf32>
    %252 = math.exp %251 : vector<2x32xf32>
    %cst_55 = arith.constant 1.000000e+00 : f32
    %253 = vector.broadcast %cst_55 : f32 to vector<2x32xf32>
    %254 = arith.addf %253, %252 : vector<2x32xf32>
    %255 = arith.divf %253, %254 : vector<2x32xf32>
    %256 = math.tanh %250 : vector<2x32xf32>
    %257 = vector.extract_strided_slice %255 {offsets = [0, 8], sizes = [2, 8], strides = [1, 1]} : vector<2x32xf32> to vector<2x8xf32>
    %258 = arith.mulf %257, %170 : vector<2x8xf32>
    %259 = vector.extract_strided_slice %255 {offsets = [0, 0], sizes = [2, 8], strides = [1, 1]} : vector<2x32xf32> to vector<2x8xf32>
    %260 = vector.extract_strided_slice %256 {offsets = [0, 16], sizes = [2, 8], strides = [1, 1]} : vector<2x32xf32> to vector<2x8xf32>
    %261 = arith.mulf %259, %260 : vector<2x8xf32>
    %262 = arith.addf %258, %261 : vector<2x8xf32>
    %263 = vector.extract_strided_slice %255 {offsets = [0, 24], sizes = [2, 8], strides = [1, 1]} : vector<2x32xf32> to vector<2x8xf32>
    %264 = math.tanh %262 : vector<2x8xf32>
    %265 = arith.mulf %263, %264 : vector<2x8xf32>
    %266 = vector.extract_strided_slice %242 {offsets = [0, 128], sizes = [2, 96], strides = [1, 1]} : vector<2x256xf32> to vector<2x96xf32>
    %267 = vector.extract_strided_slice %266 {offsets = [0, 32], sizes = [2, 32], strides = [1, 1]} : vector<2x96xf32> to vector<2x32xf32>
    %268 = arith.mulf %267, %221 : vector<2x32xf32>
    %269 = vector.extract_strided_slice %266 {offsets = [0, 0], sizes = [2, 32], strides = [1, 1]} : vector<2x96xf32> to vector<2x32xf32>
    %270 = arith.mulf %269, %222 : vector<2x32xf32>
    %271 = arith.addf %268, %270 : vector<2x32xf32>
    %272 = vector.extract_strided_slice %266 {offsets = [0, 64], sizes = [2, 32], strides = [1, 1]} : vector<2x96xf32> to vector<2x32xf32>
    %273 = arith.addf %271, %272 : vector<2x32xf32>
    %274 = arith.negf %273 : vector<2x32xf32>
    %275 = math.exp %274 : vector<2x32xf32>
    %cst_56 = arith.constant 1.000000e+00 : f32
    %276 = vector.broadcast %cst_56 : f32 to vector<2x32xf32>
    %277 = arith.addf %276, %275 : vector<2x32xf32>
    %278 = arith.divf %276, %277 : vector<2x32xf32>
    %279 = math.tanh %273 : vector<2x32xf32>
    %280 = vector.extract_strided_slice %278 {offsets = [0, 8], sizes = [2, 8], strides = [1, 1]} : vector<2x32xf32> to vector<2x8xf32>
    %281 = arith.mulf %280, %193 : vector<2x8xf32>
    %282 = vector.extract_strided_slice %278 {offsets = [0, 0], sizes = [2, 8], strides = [1, 1]} : vector<2x32xf32> to vector<2x8xf32>
    %283 = vector.extract_strided_slice %279 {offsets = [0, 16], sizes = [2, 8], strides = [1, 1]} : vector<2x32xf32> to vector<2x8xf32>
    %284 = arith.mulf %282, %283 : vector<2x8xf32>
    %285 = arith.addf %281, %284 : vector<2x8xf32>
    %286 = vector.extract_strided_slice %278 {offsets = [0, 24], sizes = [2, 8], strides = [1, 1]} : vector<2x32xf32> to vector<2x8xf32>
    %287 = math.tanh %285 : vector<2x8xf32>
    %288 = arith.mulf %286, %287 : vector<2x8xf32>
    %289 = tpu.concatenate %15, %265, %219, %265, %288, %238 in 1 : vector<2x8xf32>, vector<2x8xf32>, vector<2x16xf32>, vector<2x8xf32>, vector<2x8xf32>, vector<2x16xf32> -> vector<2x64xf32>
    %290 = arith.truncf %289 : vector<2x64xf32> to vector<2x64xbf16>
    %cst_57 = arith.constant dense<0.000000e+00> : vector<2x256xf32>
    %291 = tpu.matmul %290, %0, %cst_57 {dimension_numbers = #tpu.dot_dimension_numbers<[1], [0], [0], [1], [0, 0, 1, 1], [], []>} : vector<2x64xbf16>, vector<64x256xbf16>, vector<2x256xf32> -> vector<2x256xf32>
    %292 = arith.addf %291, %4 : vector<2x256xf32>
    %293 = vector.extract_strided_slice %292 {offsets = [0, 0], sizes = [2, 128], strides = [1, 1]} : vector<2x256xf32> to vector<2x128xf32>
    %294 = vector.extract_strided_slice %293 {offsets = [0, 0], sizes = [2, 32], strides = [1, 1]} : vector<2x128xf32> to vector<2x32xf32>
    %295 = vector.extract_strided_slice %293 {offsets = [0, 32], sizes = [2, 32], strides = [1, 1]} : vector<2x128xf32> to vector<2x32xf32>
    %296 = vector.extract_strided_slice %293 {offsets = [0, 64], sizes = [2, 64], strides = [1, 1]} : vector<2x128xf32> to vector<2x64xf32>
    %297 = arith.negf %296 : vector<2x64xf32>
    %298 = math.exp %297 : vector<2x64xf32>
    %cst_58 = arith.constant 1.000000e+00 : f32
    %299 = vector.broadcast %cst_58 : f32 to vector<2x64xf32>
    %300 = arith.addf %299, %298 : vector<2x64xf32>
    %301 = arith.divf %299, %300 : vector<2x64xf32>
    %302 = math.tanh %296 : vector<2x64xf32>
    %303 = vector.extract_strided_slice %301 {offsets = [0, 16], sizes = [2, 16], strides = [1, 1]} : vector<2x64xf32> to vector<2x16xf32>
    %304 = arith.mulf %303, %216 : vector<2x16xf32>
    %305 = vector.extract_strided_slice %301 {offsets = [0, 0], sizes = [2, 16], strides = [1, 1]} : vector<2x64xf32> to vector<2x16xf32>
    %306 = vector.extract_strided_slice %302 {offsets = [0, 32], sizes = [2, 16], strides = [1, 1]} : vector<2x64xf32> to vector<2x16xf32>
    %307 = arith.mulf %305, %306 : vector<2x16xf32>
    %308 = arith.addf %304, %307 : vector<2x16xf32>
    %309 = vector.extract_strided_slice %301 {offsets = [0, 48], sizes = [2, 16], strides = [1, 1]} : vector<2x64xf32> to vector<2x16xf32>
    %310 = math.tanh %308 : vector<2x16xf32>
    %311 = arith.mulf %309, %310 : vector<2x16xf32>
    %312 = vector.extract_strided_slice %292 {offsets = [0, 128], sizes = [2, 128], strides = [1, 1]} : vector<2x256xf32> to vector<2x128xf32>
    %313 = vector.extract_strided_slice %312 {offsets = [0, 0], sizes = [2, 32], strides = [1, 1]} : vector<2x128xf32> to vector<2x32xf32>
    %314 = vector.extract_strided_slice %312 {offsets = [0, 32], sizes = [2, 32], strides = [1, 1]} : vector<2x128xf32> to vector<2x32xf32>
    %315 = vector.extract_strided_slice %312 {offsets = [0, 64], sizes = [2, 64], strides = [1, 1]} : vector<2x128xf32> to vector<2x64xf32>
    %316 = arith.negf %315 : vector<2x64xf32>
    %317 = math.exp %316 : vector<2x64xf32>
    %cst_59 = arith.constant 1.000000e+00 : f32
    %318 = vector.broadcast %cst_59 : f32 to vector<2x64xf32>
    %319 = arith.addf %318, %317 : vector<2x64xf32>
    %320 = arith.divf %318, %319 : vector<2x64xf32>
    %321 = math.tanh %315 : vector<2x64xf32>
    %322 = vector.extract_strided_slice %320 {offsets = [0, 16], sizes = [2, 16], strides = [1, 1]} : vector<2x64xf32> to vector<2x16xf32>
    %323 = arith.mulf %322, %235 : vector<2x16xf32>
    %324 = vector.extract_strided_slice %320 {offsets = [0, 0], sizes = [2, 16], strides = [1, 1]} : vector<2x64xf32> to vector<2x16xf32>
    %325 = vector.extract_strided_slice %321 {offsets = [0, 32], sizes = [2, 16], strides = [1, 1]} : vector<2x64xf32> to vector<2x16xf32>
    %326 = arith.mulf %324, %325 : vector<2x16xf32>
    %327 = arith.addf %323, %326 : vector<2x16xf32>
    %328 = vector.extract_strided_slice %320 {offsets = [0, 48], sizes = [2, 16], strides = [1, 1]} : vector<2x64xf32> to vector<2x16xf32>
    %329 = math.tanh %327 : vector<2x16xf32>
    %330 = arith.mulf %328, %329 : vector<2x16xf32>
    %331 = tpu.concatenate %311, %330 in 1 : vector<2x16xf32>, vector<2x16xf32> -> vector<2x32xf32>
    %332 = arith.truncf %331 : vector<2x32xf32> to vector<2x32xbf16>
    %cst_60 = arith.constant dense<0.000000e+00> : vector<2x256xf32>
    %333 = tpu.matmul %332, %1, %cst_60 {dimension_numbers = #tpu.dot_dimension_numbers<[1], [0], [0], [1], [0, 0, 1, 1], [], []>} : vector<2x32xbf16>, vector<32x256xbf16>, vector<2x256xf32> -> vector<2x256xf32>
    %334 = arith.addf %333, %7 : vector<2x256xf32>
    %335 = vector.extract_strided_slice %334 {offsets = [0, 0], sizes = [2, 96], strides = [1, 1]} : vector<2x256xf32> to vector<2x96xf32>
    %336 = vector.extract_strided_slice %335 {offsets = [0, 32], sizes = [2, 32], strides = [1, 1]} : vector<2x96xf32> to vector<2x32xf32>
    %337 = arith.mulf %336, %294 : vector<2x32xf32>
    %338 = vector.extract_strided_slice %335 {offsets = [0, 0], sizes = [2, 32], strides = [1, 1]} : vector<2x96xf32> to vector<2x32xf32>
    %339 = arith.mulf %338, %295 : vector<2x32xf32>
    %340 = arith.addf %337, %339 : vector<2x32xf32>
    %341 = vector.extract_strided_slice %335 {offsets = [0, 64], sizes = [2, 32], strides = [1, 1]} : vector<2x96xf32> to vector<2x32xf32>
    %342 = arith.addf %340, %341 : vector<2x32xf32>
    %343 = arith.negf %342 : vector<2x32xf32>
    %344 = math.exp %343 : vector<2x32xf32>
    %cst_61 = arith.constant 1.000000e+00 : f32
    %345 = vector.broadcast %cst_61 : f32 to vector<2x32xf32>
    %346 = arith.addf %345, %344 : vector<2x32xf32>
    %347 = arith.divf %345, %346 : vector<2x32xf32>
    %348 = math.tanh %342 : vector<2x32xf32>
    %349 = vector.extract_strided_slice %347 {offsets = [0, 8], sizes = [2, 8], strides = [1, 1]} : vector<2x32xf32> to vector<2x8xf32>
    %350 = arith.mulf %349, %262 : vector<2x8xf32>
    %351 = vector.extract_strided_slice %347 {offsets = [0, 0], sizes = [2, 8], strides = [1, 1]} : vector<2x32xf32> to vector<2x8xf32>
    %352 = vector.extract_strided_slice %348 {offsets = [0, 16], sizes = [2, 8], strides = [1, 1]} : vector<2x32xf32> to vector<2x8xf32>
    %353 = arith.mulf %351, %352 : vector<2x8xf32>
    %354 = arith.addf %350, %353 : vector<2x8xf32>
    %355 = vector.extract_strided_slice %347 {offsets = [0, 24], sizes = [2, 8], strides = [1, 1]} : vector<2x32xf32> to vector<2x8xf32>
    %356 = math.tanh %354 : vector<2x8xf32>
    %357 = arith.mulf %355, %356 : vector<2x8xf32>
    %358 = vector.extract_strided_slice %334 {offsets = [0, 128], sizes = [2, 96], strides = [1, 1]} : vector<2x256xf32> to vector<2x96xf32>
    %359 = vector.extract_strided_slice %358 {offsets = [0, 32], sizes = [2, 32], strides = [1, 1]} : vector<2x96xf32> to vector<2x32xf32>
    %360 = arith.mulf %359, %313 : vector<2x32xf32>
    %361 = vector.extract_strided_slice %358 {offsets = [0, 0], sizes = [2, 32], strides = [1, 1]} : vector<2x96xf32> to vector<2x32xf32>
    %362 = arith.mulf %361, %314 : vector<2x32xf32>
    %363 = arith.addf %360, %362 : vector<2x32xf32>
    %364 = vector.extract_strided_slice %358 {offsets = [0, 64], sizes = [2, 32], strides = [1, 1]} : vector<2x96xf32> to vector<2x32xf32>
    %365 = arith.addf %363, %364 : vector<2x32xf32>
    %366 = arith.negf %365 : vector<2x32xf32>
    %367 = math.exp %366 : vector<2x32xf32>
    %cst_62 = arith.constant 1.000000e+00 : f32
    %368 = vector.broadcast %cst_62 : f32 to vector<2x32xf32>
    %369 = arith.addf %368, %367 : vector<2x32xf32>
    %370 = arith.divf %368, %369 : vector<2x32xf32>
    %371 = math.tanh %365 : vector<2x32xf32>
    %372 = vector.extract_strided_slice %370 {offsets = [0, 8], sizes = [2, 8], strides = [1, 1]} : vector<2x32xf32> to vector<2x8xf32>
    %373 = arith.mulf %372, %285 : vector<2x8xf32>
    %374 = vector.extract_strided_slice %370 {offsets = [0, 0], sizes = [2, 8], strides = [1, 1]} : vector<2x32xf32> to vector<2x8xf32>
    %375 = vector.extract_strided_slice %371 {offsets = [0, 16], sizes = [2, 8], strides = [1, 1]} : vector<2x32xf32> to vector<2x8xf32>
    %376 = arith.mulf %374, %375 : vector<2x8xf32>
    %377 = arith.addf %373, %376 : vector<2x8xf32>
    %378 = vector.extract_strided_slice %370 {offsets = [0, 24], sizes = [2, 8], strides = [1, 1]} : vector<2x32xf32> to vector<2x8xf32>
    %379 = math.tanh %377 : vector<2x8xf32>
    %380 = arith.mulf %378, %379 : vector<2x8xf32>
    %381 = tpu.concatenate %17, %357, %311, %357, %380, %330 in 1 : vector<2x8xf32>, vector<2x8xf32>, vector<2x16xf32>, vector<2x8xf32>, vector<2x8xf32>, vector<2x16xf32> -> vector<2x64xf32>
    %382 = arith.truncf %381 : vector<2x64xf32> to vector<2x64xbf16>
    %cst_63 = arith.constant dense<0.000000e+00> : vector<2x256xf32>
    %383 = tpu.matmul %382, %0, %cst_63 {dimension_numbers = #tpu.dot_dimension_numbers<[1], [0], [0], [1], [0, 0, 1, 1], [], []>} : vector<2x64xbf16>, vector<64x256xbf16>, vector<2x256xf32> -> vector<2x256xf32>
    %384 = arith.addf %383, %4 : vector<2x256xf32>
    %385 = vector.extract_strided_slice %384 {offsets = [0, 0], sizes = [2, 128], strides = [1, 1]} : vector<2x256xf32> to vector<2x128xf32>
    %386 = vector.extract_strided_slice %385 {offsets = [0, 0], sizes = [2, 32], strides = [1, 1]} : vector<2x128xf32> to vector<2x32xf32>
    %387 = vector.extract_strided_slice %385 {offsets = [0, 32], sizes = [2, 32], strides = [1, 1]} : vector<2x128xf32> to vector<2x32xf32>
    %388 = vector.extract_strided_slice %385 {offsets = [0, 64], sizes = [2, 64], strides = [1, 1]} : vector<2x128xf32> to vector<2x64xf32>
    %389 = arith.negf %388 : vector<2x64xf32>
    %390 = math.exp %389 : vector<2x64xf32>
    %cst_64 = arith.constant 1.000000e+00 : f32
    %391 = vector.broadcast %cst_64 : f32 to vector<2x64xf32>
    %392 = arith.addf %391, %390 : vector<2x64xf32>
    %393 = arith.divf %391, %392 : vector<2x64xf32>
    %394 = math.tanh %388 : vector<2x64xf32>
    %395 = vector.extract_strided_slice %393 {offsets = [0, 16], sizes = [2, 16], strides = [1, 1]} : vector<2x64xf32> to vector<2x16xf32>
    %396 = arith.mulf %395, %308 : vector<2x16xf32>
    %397 = vector.extract_strided_slice %393 {offsets = [0, 0], sizes = [2, 16], strides = [1, 1]} : vector<2x64xf32> to vector<2x16xf32>
    %398 = vector.extract_strided_slice %394 {offsets = [0, 32], sizes = [2, 16], strides = [1, 1]} : vector<2x64xf32> to vector<2x16xf32>
    %399 = arith.mulf %397, %398 : vector<2x16xf32>
    %400 = arith.addf %396, %399 : vector<2x16xf32>
    %401 = vector.extract_strided_slice %393 {offsets = [0, 48], sizes = [2, 16], strides = [1, 1]} : vector<2x64xf32> to vector<2x16xf32>
    %402 = math.tanh %400 : vector<2x16xf32>
    %403 = arith.mulf %401, %402 : vector<2x16xf32>
    %404 = vector.extract_strided_slice %384 {offsets = [0, 128], sizes = [2, 128], strides = [1, 1]} : vector<2x256xf32> to vector<2x128xf32>
    %405 = vector.extract_strided_slice %404 {offsets = [0, 0], sizes = [2, 32], strides = [1, 1]} : vector<2x128xf32> to vector<2x32xf32>
    %406 = vector.extract_strided_slice %404 {offsets = [0, 32], sizes = [2, 32], strides = [1, 1]} : vector<2x128xf32> to vector<2x32xf32>
    %407 = vector.extract_strided_slice %404 {offsets = [0, 64], sizes = [2, 64], strides = [1, 1]} : vector<2x128xf32> to vector<2x64xf32>
    %408 = arith.negf %407 : vector<2x64xf32>
    %409 = math.exp %408 : vector<2x64xf32>
    %cst_65 = arith.constant 1.000000e+00 : f32
    %410 = vector.broadcast %cst_65 : f32 to vector<2x64xf32>
    %411 = arith.addf %410, %409 : vector<2x64xf32>
    %412 = arith.divf %410, %411 : vector<2x64xf32>
    %413 = math.tanh %407 : vector<2x64xf32>
    %414 = vector.extract_strided_slice %412 {offsets = [0, 16], sizes = [2, 16], strides = [1, 1]} : vector<2x64xf32> to vector<2x16xf32>
    %415 = arith.mulf %414, %327 : vector<2x16xf32>
    %416 = vector.extract_strided_slice %412 {offsets = [0, 0], sizes = [2, 16], strides = [1, 1]} : vector<2x64xf32> to vector<2x16xf32>
    %417 = vector.extract_strided_slice %413 {offsets = [0, 32], sizes = [2, 16], strides = [1, 1]} : vector<2x64xf32> to vector<2x16xf32>
    %418 = arith.mulf %416, %417 : vector<2x16xf32>
    %419 = arith.addf %415, %418 : vector<2x16xf32>
    %420 = vector.extract_strided_slice %412 {offsets = [0, 48], sizes = [2, 16], strides = [1, 1]} : vector<2x64xf32> to vector<2x16xf32>
    %421 = math.tanh %419 : vector<2x16xf32>
    %422 = arith.mulf %420, %421 : vector<2x16xf32>
    %423 = tpu.concatenate %403, %422 in 1 : vector<2x16xf32>, vector<2x16xf32> -> vector<2x32xf32>
    %424 = arith.truncf %423 : vector<2x32xf32> to vector<2x32xbf16>
    %cst_66 = arith.constant dense<0.000000e+00> : vector<2x256xf32>
    %425 = tpu.matmul %424, %1, %cst_66 {dimension_numbers = #tpu.dot_dimension_numbers<[1], [0], [0], [1], [0, 0, 1, 1], [], []>} : vector<2x32xbf16>, vector<32x256xbf16>, vector<2x256xf32> -> vector<2x256xf32>
    %426 = arith.addf %425, %7 : vector<2x256xf32>
    %427 = vector.extract_strided_slice %426 {offsets = [0, 0], sizes = [2, 96], strides = [1, 1]} : vector<2x256xf32> to vector<2x96xf32>
    %428 = vector.extract_strided_slice %427 {offsets = [0, 32], sizes = [2, 32], strides = [1, 1]} : vector<2x96xf32> to vector<2x32xf32>
    %429 = arith.mulf %428, %386 : vector<2x32xf32>
    %430 = vector.extract_strided_slice %427 {offsets = [0, 0], sizes = [2, 32], strides = [1, 1]} : vector<2x96xf32> to vector<2x32xf32>
    %431 = arith.mulf %430, %387 : vector<2x32xf32>
    %432 = arith.addf %429, %431 : vector<2x32xf32>
    %433 = vector.extract_strided_slice %427 {offsets = [0, 64], sizes = [2, 32], strides = [1, 1]} : vector<2x96xf32> to vector<2x32xf32>
    %434 = arith.addf %432, %433 : vector<2x32xf32>
    %435 = arith.negf %434 : vector<2x32xf32>
    %436 = math.exp %435 : vector<2x32xf32>
    %cst_67 = arith.constant 1.000000e+00 : f32
    %437 = vector.broadcast %cst_67 : f32 to vector<2x32xf32>
    %438 = arith.addf %437, %436 : vector<2x32xf32>
    %439 = arith.divf %437, %438 : vector<2x32xf32>
    %440 = math.tanh %434 : vector<2x32xf32>
    %441 = vector.extract_strided_slice %439 {offsets = [0, 8], sizes = [2, 8], strides = [1, 1]} : vector<2x32xf32> to vector<2x8xf32>
    %442 = arith.mulf %441, %354 : vector<2x8xf32>
    %443 = vector.extract_strided_slice %439 {offsets = [0, 0], sizes = [2, 8], strides = [1, 1]} : vector<2x32xf32> to vector<2x8xf32>
    %444 = vector.extract_strided_slice %440 {offsets = [0, 16], sizes = [2, 8], strides = [1, 1]} : vector<2x32xf32> to vector<2x8xf32>
    %445 = arith.mulf %443, %444 : vector<2x8xf32>
    %446 = arith.addf %442, %445 : vector<2x8xf32>
    %447 = vector.extract_strided_slice %439 {offsets = [0, 24], sizes = [2, 8], strides = [1, 1]} : vector<2x32xf32> to vector<2x8xf32>
    %448 = math.tanh %446 : vector<2x8xf32>
    %449 = arith.mulf %447, %448 : vector<2x8xf32>
    %450 = vector.extract_strided_slice %426 {offsets = [0, 128], sizes = [2, 96], strides = [1, 1]} : vector<2x256xf32> to vector<2x96xf32>
    %451 = vector.extract_strided_slice %450 {offsets = [0, 32], sizes = [2, 32], strides = [1, 1]} : vector<2x96xf32> to vector<2x32xf32>
    %452 = arith.mulf %451, %405 : vector<2x32xf32>
    %453 = vector.extract_strided_slice %450 {offsets = [0, 0], sizes = [2, 32], strides = [1, 1]} : vector<2x96xf32> to vector<2x32xf32>
    %454 = arith.mulf %453, %406 : vector<2x32xf32>
    %455 = arith.addf %452, %454 : vector<2x32xf32>
    %456 = vector.extract_strided_slice %450 {offsets = [0, 64], sizes = [2, 32], strides = [1, 1]} : vector<2x96xf32> to vector<2x32xf32>
    %457 = arith.addf %455, %456 : vector<2x32xf32>
    %458 = arith.negf %457 : vector<2x32xf32>
    %459 = math.exp %458 : vector<2x32xf32>
    %cst_68 = arith.constant 1.000000e+00 : f32
    %460 = vector.broadcast %cst_68 : f32 to vector<2x32xf32>
    %461 = arith.addf %460, %459 : vector<2x32xf32>
    %462 = arith.divf %460, %461 : vector<2x32xf32>
    %463 = math.tanh %457 : vector<2x32xf32>
    %464 = vector.extract_strided_slice %462 {offsets = [0, 8], sizes = [2, 8], strides = [1, 1]} : vector<2x32xf32> to vector<2x8xf32>
    %465 = arith.mulf %464, %377 : vector<2x8xf32>
    %466 = vector.extract_strided_slice %462 {offsets = [0, 0], sizes = [2, 8], strides = [1, 1]} : vector<2x32xf32> to vector<2x8xf32>
    %467 = vector.extract_strided_slice %463 {offsets = [0, 16], sizes = [2, 8], strides = [1, 1]} : vector<2x32xf32> to vector<2x8xf32>
    %468 = arith.mulf %466, %467 : vector<2x8xf32>
    %469 = arith.addf %465, %468 : vector<2x8xf32>
    %470 = vector.extract_strided_slice %462 {offsets = [0, 24], sizes = [2, 8], strides = [1, 1]} : vector<2x32xf32> to vector<2x8xf32>
    %471 = math.tanh %469 : vector<2x8xf32>
    %472 = arith.mulf %470, %471 : vector<2x8xf32>
    %473 = tpu.concatenate %19, %449, %403, %449, %472, %422 in 1 : vector<2x8xf32>, vector<2x8xf32>, vector<2x16xf32>, vector<2x8xf32>, vector<2x8xf32>, vector<2x16xf32> -> vector<2x64xf32>
    %474 = arith.truncf %473 : vector<2x64xf32> to vector<2x64xbf16>
    %cst_69 = arith.constant dense<0.000000e+00> : vector<2x256xf32>
    %475 = tpu.matmul %474, %0, %cst_69 {dimension_numbers = #tpu.dot_dimension_numbers<[1], [0], [0], [1], [0, 0, 1, 1], [], []>} : vector<2x64xbf16>, vector<64x256xbf16>, vector<2x256xf32> -> vector<2x256xf32>
    %476 = arith.addf %475, %4 : vector<2x256xf32>
    %477 = vector.extract_strided_slice %476 {offsets = [0, 0], sizes = [2, 128], strides = [1, 1]} : vector<2x256xf32> to vector<2x128xf32>
    %478 = vector.extract_strided_slice %477 {offsets = [0, 0], sizes = [2, 32], strides = [1, 1]} : vector<2x128xf32> to vector<2x32xf32>
    %479 = vector.extract_strided_slice %477 {offsets = [0, 32], sizes = [2, 32], strides = [1, 1]} : vector<2x128xf32> to vector<2x32xf32>
    %480 = vector.extract_strided_slice %477 {offsets = [0, 64], sizes = [2, 64], strides = [1, 1]} : vector<2x128xf32> to vector<2x64xf32>
    %481 = arith.negf %480 : vector<2x64xf32>
    %482 = math.exp %481 : vector<2x64xf32>
    %cst_70 = arith.constant 1.000000e+00 : f32
    %483 = vector.broadcast %cst_70 : f32 to vector<2x64xf32>
    %484 = arith.addf %483, %482 : vector<2x64xf32>
    %485 = arith.divf %483, %484 : vector<2x64xf32>
    %486 = math.tanh %480 : vector<2x64xf32>
    %487 = vector.extract_strided_slice %485 {offsets = [0, 16], sizes = [2, 16], strides = [1, 1]} : vector<2x64xf32> to vector<2x16xf32>
    %488 = arith.mulf %487, %400 : vector<2x16xf32>
    %489 = vector.extract_strided_slice %485 {offsets = [0, 0], sizes = [2, 16], strides = [1, 1]} : vector<2x64xf32> to vector<2x16xf32>
    %490 = vector.extract_strided_slice %486 {offsets = [0, 32], sizes = [2, 16], strides = [1, 1]} : vector<2x64xf32> to vector<2x16xf32>
    %491 = arith.mulf %489, %490 : vector<2x16xf32>
    %492 = arith.addf %488, %491 : vector<2x16xf32>
    %493 = vector.extract_strided_slice %485 {offsets = [0, 48], sizes = [2, 16], strides = [1, 1]} : vector<2x64xf32> to vector<2x16xf32>
    %494 = math.tanh %492 : vector<2x16xf32>
    %495 = arith.mulf %493, %494 : vector<2x16xf32>
    %496 = vector.extract_strided_slice %476 {offsets = [0, 128], sizes = [2, 128], strides = [1, 1]} : vector<2x256xf32> to vector<2x128xf32>
    %497 = vector.extract_strided_slice %496 {offsets = [0, 0], sizes = [2, 32], strides = [1, 1]} : vector<2x128xf32> to vector<2x32xf32>
    %498 = vector.extract_strided_slice %496 {offsets = [0, 32], sizes = [2, 32], strides = [1, 1]} : vector<2x128xf32> to vector<2x32xf32>
    %499 = vector.extract_strided_slice %496 {offsets = [0, 64], sizes = [2, 64], strides = [1, 1]} : vector<2x128xf32> to vector<2x64xf32>
    %500 = arith.negf %499 : vector<2x64xf32>
    %501 = math.exp %500 : vector<2x64xf32>
    %cst_71 = arith.constant 1.000000e+00 : f32
    %502 = vector.broadcast %cst_71 : f32 to vector<2x64xf32>
    %503 = arith.addf %502, %501 : vector<2x64xf32>
    %504 = arith.divf %502, %503 : vector<2x64xf32>
    %505 = math.tanh %499 : vector<2x64xf32>
    %506 = vector.extract_strided_slice %504 {offsets = [0, 16], sizes = [2, 16], strides = [1, 1]} : vector<2x64xf32> to vector<2x16xf32>
    %507 = arith.mulf %506, %419 : vector<2x16xf32>
    %508 = vector.extract_strided_slice %504 {offsets = [0, 0], sizes = [2, 16], strides = [1, 1]} : vector<2x64xf32> to vector<2x16xf32>
    %509 = vector.extract_strided_slice %505 {offsets = [0, 32], sizes = [2, 16], strides = [1, 1]} : vector<2x64xf32> to vector<2x16xf32>
    %510 = arith.mulf %508, %509 : vector<2x16xf32>
    %511 = arith.addf %507, %510 : vector<2x16xf32>
    %512 = vector.extract_strided_slice %504 {offsets = [0, 48], sizes = [2, 16], strides = [1, 1]} : vector<2x64xf32> to vector<2x16xf32>
    %513 = math.tanh %511 : vector<2x16xf32>
    %514 = arith.mulf %512, %513 : vector<2x16xf32>
    %515 = tpu.concatenate %495, %514 in 1 : vector<2x16xf32>, vector<2x16xf32> -> vector<2x32xf32>
    %516 = arith.truncf %515 : vector<2x32xf32> to vector<2x32xbf16>
    %cst_72 = arith.constant dense<0.000000e+00> : vector<2x256xf32>
    %517 = tpu.matmul %516, %1, %cst_72 {dimension_numbers = #tpu.dot_dimension_numbers<[1], [0], [0], [1], [0, 0, 1, 1], [], []>} : vector<2x32xbf16>, vector<32x256xbf16>, vector<2x256xf32> -> vector<2x256xf32>
    %518 = arith.addf %517, %7 : vector<2x256xf32>
    %519 = vector.extract_strided_slice %518 {offsets = [0, 0], sizes = [2, 96], strides = [1, 1]} : vector<2x256xf32> to vector<2x96xf32>
    %520 = vector.extract_strided_slice %519 {offsets = [0, 32], sizes = [2, 32], strides = [1, 1]} : vector<2x96xf32> to vector<2x32xf32>
    %521 = arith.mulf %520, %478 : vector<2x32xf32>
    %522 = vector.extract_strided_slice %519 {offsets = [0, 0], sizes = [2, 32], strides = [1, 1]} : vector<2x96xf32> to vector<2x32xf32>
    %523 = arith.mulf %522, %479 : vector<2x32xf32>
    %524 = arith.addf %521, %523 : vector<2x32xf32>
    %525 = vector.extract_strided_slice %519 {offsets = [0, 64], sizes = [2, 32], strides = [1, 1]} : vector<2x96xf32> to vector<2x32xf32>
    %526 = arith.addf %524, %525 : vector<2x32xf32>
    %527 = arith.negf %526 : vector<2x32xf32>
    %528 = math.exp %527 : vector<2x32xf32>
    %cst_73 = arith.constant 1.000000e+00 : f32
    %529 = vector.broadcast %cst_73 : f32 to vector<2x32xf32>
    %530 = arith.addf %529, %528 : vector<2x32xf32>
    %531 = arith.divf %529, %530 : vector<2x32xf32>
    %532 = math.tanh %526 : vector<2x32xf32>
    %533 = vector.extract_strided_slice %531 {offsets = [0, 8], sizes = [2, 8], strides = [1, 1]} : vector<2x32xf32> to vector<2x8xf32>
    %534 = arith.mulf %533, %446 : vector<2x8xf32>
    %535 = vector.extract_strided_slice %531 {offsets = [0, 0], sizes = [2, 8], strides = [1, 1]} : vector<2x32xf32> to vector<2x8xf32>
    %536 = vector.extract_strided_slice %532 {offsets = [0, 16], sizes = [2, 8], strides = [1, 1]} : vector<2x32xf32> to vector<2x8xf32>
    %537 = arith.mulf %535, %536 : vector<2x8xf32>
    %538 = arith.addf %534, %537 : vector<2x8xf32>
    %539 = vector.extract_strided_slice %531 {offsets = [0, 24], sizes = [2, 8], strides = [1, 1]} : vector<2x32xf32> to vector<2x8xf32>
    %540 = math.tanh %538 : vector<2x8xf32>
    %541 = arith.mulf %539, %540 : vector<2x8xf32>
    %542 = vector.extract_strided_slice %518 {offsets = [0, 128], sizes = [2, 96], strides = [1, 1]} : vector<2x256xf32> to vector<2x96xf32>
    %543 = vector.extract_strided_slice %542 {offsets = [0, 32], sizes = [2, 32], strides = [1, 1]} : vector<2x96xf32> to vector<2x32xf32>
    %544 = arith.mulf %543, %497 : vector<2x32xf32>
    %545 = vector.extract_strided_slice %542 {offsets = [0, 0], sizes = [2, 32], strides = [1, 1]} : vector<2x96xf32> to vector<2x32xf32>
    %546 = arith.mulf %545, %498 : vector<2x32xf32>
    %547 = arith.addf %544, %546 : vector<2x32xf32>
    %548 = vector.extract_strided_slice %542 {offsets = [0, 64], sizes = [2, 32], strides = [1, 1]} : vector<2x96xf32> to vector<2x32xf32>
    %549 = arith.addf %547, %548 : vector<2x32xf32>
    %550 = arith.negf %549 : vector<2x32xf32>
    %551 = math.exp %550 : vector<2x32xf32>
    %cst_74 = arith.constant 1.000000e+00 : f32
    %552 = vector.broadcast %cst_74 : f32 to vector<2x32xf32>
    %553 = arith.addf %552, %551 : vector<2x32xf32>
    %554 = arith.divf %552, %553 : vector<2x32xf32>
    %555 = math.tanh %549 : vector<2x32xf32>
    %556 = vector.extract_strided_slice %554 {offsets = [0, 8], sizes = [2, 8], strides = [1, 1]} : vector<2x32xf32> to vector<2x8xf32>
    %557 = arith.mulf %556, %469 : vector<2x8xf32>
    %558 = vector.extract_strided_slice %554 {offsets = [0, 0], sizes = [2, 8], strides = [1, 1]} : vector<2x32xf32> to vector<2x8xf32>
    %559 = vector.extract_strided_slice %555 {offsets = [0, 16], sizes = [2, 8], strides = [1, 1]} : vector<2x32xf32> to vector<2x8xf32>
    %560 = arith.mulf %558, %559 : vector<2x8xf32>
    %561 = arith.addf %557, %560 : vector<2x8xf32>
    %562 = vector.extract_strided_slice %554 {offsets = [0, 24], sizes = [2, 8], strides = [1, 1]} : vector<2x32xf32> to vector<2x8xf32>
    %563 = math.tanh %561 : vector<2x8xf32>
    %564 = arith.mulf %562, %563 : vector<2x8xf32>
    %565 = tpu.concatenate %21, %541, %495, %541, %564, %514 in 1 : vector<2x8xf32>, vector<2x8xf32>, vector<2x16xf32>, vector<2x8xf32>, vector<2x8xf32>, vector<2x16xf32> -> vector<2x64xf32>
    %566 = arith.truncf %565 : vector<2x64xf32> to vector<2x64xbf16>
    %cst_75 = arith.constant dense<0.000000e+00> : vector<2x256xf32>
    %567 = tpu.matmul %566, %0, %cst_75 {dimension_numbers = #tpu.dot_dimension_numbers<[1], [0], [0], [1], [0, 0, 1, 1], [], []>} : vector<2x64xbf16>, vector<64x256xbf16>, vector<2x256xf32> -> vector<2x256xf32>
    %568 = arith.addf %567, %4 : vector<2x256xf32>
    %569 = vector.extract_strided_slice %568 {offsets = [0, 0], sizes = [2, 128], strides = [1, 1]} : vector<2x256xf32> to vector<2x128xf32>
    %570 = vector.extract_strided_slice %569 {offsets = [0, 0], sizes = [2, 32], strides = [1, 1]} : vector<2x128xf32> to vector<2x32xf32>
    %571 = vector.extract_strided_slice %569 {offsets = [0, 32], sizes = [2, 32], strides = [1, 1]} : vector<2x128xf32> to vector<2x32xf32>
    %572 = vector.extract_strided_slice %569 {offsets = [0, 64], sizes = [2, 64], strides = [1, 1]} : vector<2x128xf32> to vector<2x64xf32>
    %573 = arith.negf %572 : vector<2x64xf32>
    %574 = math.exp %573 : vector<2x64xf32>
    %cst_76 = arith.constant 1.000000e+00 : f32
    %575 = vector.broadcast %cst_76 : f32 to vector<2x64xf32>
    %576 = arith.addf %575, %574 : vector<2x64xf32>
    %577 = arith.divf %575, %576 : vector<2x64xf32>
    %578 = math.tanh %572 : vector<2x64xf32>
    %579 = vector.extract_strided_slice %577 {offsets = [0, 16], sizes = [2, 16], strides = [1, 1]} : vector<2x64xf32> to vector<2x16xf32>
    %580 = arith.mulf %579, %492 : vector<2x16xf32>
    %581 = vector.extract_strided_slice %577 {offsets = [0, 0], sizes = [2, 16], strides = [1, 1]} : vector<2x64xf32> to vector<2x16xf32>
    %582 = vector.extract_strided_slice %578 {offsets = [0, 32], sizes = [2, 16], strides = [1, 1]} : vector<2x64xf32> to vector<2x16xf32>
    %583 = arith.mulf %581, %582 : vector<2x16xf32>
    %584 = arith.addf %580, %583 : vector<2x16xf32>
    %585 = vector.extract_strided_slice %577 {offsets = [0, 48], sizes = [2, 16], strides = [1, 1]} : vector<2x64xf32> to vector<2x16xf32>
    %586 = math.tanh %584 : vector<2x16xf32>
    %587 = arith.mulf %585, %586 : vector<2x16xf32>
    %588 = vector.extract_strided_slice %568 {offsets = [0, 128], sizes = [2, 128], strides = [1, 1]} : vector<2x256xf32> to vector<2x128xf32>
    %589 = vector.extract_strided_slice %588 {offsets = [0, 0], sizes = [2, 32], strides = [1, 1]} : vector<2x128xf32> to vector<2x32xf32>
    %590 = vector.extract_strided_slice %588 {offsets = [0, 32], sizes = [2, 32], strides = [1, 1]} : vector<2x128xf32> to vector<2x32xf32>
    %591 = vector.extract_strided_slice %588 {offsets = [0, 64], sizes = [2, 64], strides = [1, 1]} : vector<2x128xf32> to vector<2x64xf32>
    %592 = arith.negf %591 : vector<2x64xf32>
    %593 = math.exp %592 : vector<2x64xf32>
    %cst_77 = arith.constant 1.000000e+00 : f32
    %594 = vector.broadcast %cst_77 : f32 to vector<2x64xf32>
    %595 = arith.addf %594, %593 : vector<2x64xf32>
    %596 = arith.divf %594, %595 : vector<2x64xf32>
    %597 = math.tanh %591 : vector<2x64xf32>
    %598 = vector.extract_strided_slice %596 {offsets = [0, 16], sizes = [2, 16], strides = [1, 1]} : vector<2x64xf32> to vector<2x16xf32>
    %599 = arith.mulf %598, %511 : vector<2x16xf32>
    %600 = vector.extract_strided_slice %596 {offsets = [0, 0], sizes = [2, 16], strides = [1, 1]} : vector<2x64xf32> to vector<2x16xf32>
    %601 = vector.extract_strided_slice %597 {offsets = [0, 32], sizes = [2, 16], strides = [1, 1]} : vector<2x64xf32> to vector<2x16xf32>
    %602 = arith.mulf %600, %601 : vector<2x16xf32>
    %603 = arith.addf %599, %602 : vector<2x16xf32>
    %604 = vector.extract_strided_slice %596 {offsets = [0, 48], sizes = [2, 16], strides = [1, 1]} : vector<2x64xf32> to vector<2x16xf32>
    %605 = math.tanh %603 : vector<2x16xf32>
    %606 = arith.mulf %604, %605 : vector<2x16xf32>
    %607 = tpu.concatenate %587, %606 in 1 : vector<2x16xf32>, vector<2x16xf32> -> vector<2x32xf32>
    %608 = arith.truncf %607 : vector<2x32xf32> to vector<2x32xbf16>
    %cst_78 = arith.constant dense<0.000000e+00> : vector<2x256xf32>
    %609 = tpu.matmul %608, %1, %cst_78 {dimension_numbers = #tpu.dot_dimension_numbers<[1], [0], [0], [1], [0, 0, 1, 1], [], []>} : vector<2x32xbf16>, vector<32x256xbf16>, vector<2x256xf32> -> vector<2x256xf32>
    %610 = arith.addf %609, %7 : vector<2x256xf32>
    %611 = vector.extract_strided_slice %610 {offsets = [0, 0], sizes = [2, 96], strides = [1, 1]} : vector<2x256xf32> to vector<2x96xf32>
    %612 = vector.extract_strided_slice %611 {offsets = [0, 32], sizes = [2, 32], strides = [1, 1]} : vector<2x96xf32> to vector<2x32xf32>
    %613 = arith.mulf %612, %570 : vector<2x32xf32>
    %614 = vector.extract_strided_slice %611 {offsets = [0, 0], sizes = [2, 32], strides = [1, 1]} : vector<2x96xf32> to vector<2x32xf32>
    %615 = arith.mulf %614, %571 : vector<2x32xf32>
    %616 = arith.addf %613, %615 : vector<2x32xf32>
    %617 = vector.extract_strided_slice %611 {offsets = [0, 64], sizes = [2, 32], strides = [1, 1]} : vector<2x96xf32> to vector<2x32xf32>
    %618 = arith.addf %616, %617 : vector<2x32xf32>
    %619 = arith.negf %618 : vector<2x32xf32>
    %620 = math.exp %619 : vector<2x32xf32>
    %cst_79 = arith.constant 1.000000e+00 : f32
    %621 = vector.broadcast %cst_79 : f32 to vector<2x32xf32>
    %622 = arith.addf %621, %620 : vector<2x32xf32>
    %623 = arith.divf %621, %622 : vector<2x32xf32>
    %624 = math.tanh %618 : vector<2x32xf32>
    %625 = vector.extract_strided_slice %623 {offsets = [0, 8], sizes = [2, 8], strides = [1, 1]} : vector<2x32xf32> to vector<2x8xf32>
    %626 = arith.mulf %625, %538 : vector<2x8xf32>
    %627 = vector.extract_strided_slice %623 {offsets = [0, 0], sizes = [2, 8], strides = [1, 1]} : vector<2x32xf32> to vector<2x8xf32>
    %628 = vector.extract_strided_slice %624 {offsets = [0, 16], sizes = [2, 8], strides = [1, 1]} : vector<2x32xf32> to vector<2x8xf32>
    %629 = arith.mulf %627, %628 : vector<2x8xf32>
    %630 = arith.addf %626, %629 : vector<2x8xf32>
    %631 = vector.extract_strided_slice %623 {offsets = [0, 24], sizes = [2, 8], strides = [1, 1]} : vector<2x32xf32> to vector<2x8xf32>
    %632 = math.tanh %630 : vector<2x8xf32>
    %633 = arith.mulf %631, %632 : vector<2x8xf32>
    %634 = vector.extract_strided_slice %610 {offsets = [0, 128], sizes = [2, 96], strides = [1, 1]} : vector<2x256xf32> to vector<2x96xf32>
    %635 = vector.extract_strided_slice %634 {offsets = [0, 32], sizes = [2, 32], strides = [1, 1]} : vector<2x96xf32> to vector<2x32xf32>
    %636 = arith.mulf %635, %589 : vector<2x32xf32>
    %637 = vector.extract_strided_slice %634 {offsets = [0, 0], sizes = [2, 32], strides = [1, 1]} : vector<2x96xf32> to vector<2x32xf32>
    %638 = arith.mulf %637, %590 : vector<2x32xf32>
    %639 = arith.addf %636, %638 : vector<2x32xf32>
    %640 = vector.extract_strided_slice %634 {offsets = [0, 64], sizes = [2, 32], strides = [1, 1]} : vector<2x96xf32> to vector<2x32xf32>
    %641 = arith.addf %639, %640 : vector<2x32xf32>
    %642 = arith.negf %641 : vector<2x32xf32>
    %643 = math.exp %642 : vector<2x32xf32>
    %cst_80 = arith.constant 1.000000e+00 : f32
    %644 = vector.broadcast %cst_80 : f32 to vector<2x32xf32>
    %645 = arith.addf %644, %643 : vector<2x32xf32>
    %646 = arith.divf %644, %645 : vector<2x32xf32>
    %647 = math.tanh %641 : vector<2x32xf32>
    %648 = vector.extract_strided_slice %646 {offsets = [0, 8], sizes = [2, 8], strides = [1, 1]} : vector<2x32xf32> to vector<2x8xf32>
    %649 = arith.mulf %648, %561 : vector<2x8xf32>
    %650 = vector.extract_strided_slice %646 {offsets = [0, 0], sizes = [2, 8], strides = [1, 1]} : vector<2x32xf32> to vector<2x8xf32>
    %651 = vector.extract_strided_slice %647 {offsets = [0, 16], sizes = [2, 8], strides = [1, 1]} : vector<2x32xf32> to vector<2x8xf32>
    %652 = arith.mulf %650, %651 : vector<2x8xf32>
    %653 = arith.addf %649, %652 : vector<2x8xf32>
    %654 = vector.extract_strided_slice %646 {offsets = [0, 24], sizes = [2, 8], strides = [1, 1]} : vector<2x32xf32> to vector<2x8xf32>
    %655 = math.tanh %653 : vector<2x8xf32>
    %656 = arith.mulf %654, %655 : vector<2x8xf32>
    %657 = tpu.concatenate %23, %633, %587, %633, %656, %606 in 1 : vector<2x8xf32>, vector<2x8xf32>, vector<2x16xf32>, vector<2x8xf32>, vector<2x8xf32>, vector<2x16xf32> -> vector<2x64xf32>
    %658 = arith.truncf %657 : vector<2x64xf32> to vector<2x64xbf16>
    %cst_81 = arith.constant dense<0.000000e+00> : vector<2x256xf32>
    %659 = tpu.matmul %658, %0, %cst_81 {dimension_numbers = #tpu.dot_dimension_numbers<[1], [0], [0], [1], [0, 0, 1, 1], [], []>} : vector<2x64xbf16>, vector<64x256xbf16>, vector<2x256xf32> -> vector<2x256xf32>
    %660 = arith.addf %659, %4 : vector<2x256xf32>
    %661 = vector.extract_strided_slice %660 {offsets = [0, 0], sizes = [2, 128], strides = [1, 1]} : vector<2x256xf32> to vector<2x128xf32>
    %662 = vector.extract_strided_slice %661 {offsets = [0, 0], sizes = [2, 32], strides = [1, 1]} : vector<2x128xf32> to vector<2x32xf32>
    %663 = vector.extract_strided_slice %661 {offsets = [0, 32], sizes = [2, 32], strides = [1, 1]} : vector<2x128xf32> to vector<2x32xf32>
    %664 = vector.extract_strided_slice %661 {offsets = [0, 64], sizes = [2, 64], strides = [1, 1]} : vector<2x128xf32> to vector<2x64xf32>
    %665 = arith.negf %664 : vector<2x64xf32>
    %666 = math.exp %665 : vector<2x64xf32>
    %cst_82 = arith.constant 1.000000e+00 : f32
    %667 = vector.broadcast %cst_82 : f32 to vector<2x64xf32>
    %668 = arith.addf %667, %666 : vector<2x64xf32>
    %669 = arith.divf %667, %668 : vector<2x64xf32>
    %670 = math.tanh %664 : vector<2x64xf32>
    %671 = vector.extract_strided_slice %669 {offsets = [0, 16], sizes = [2, 16], strides = [1, 1]} : vector<2x64xf32> to vector<2x16xf32>
    %672 = arith.mulf %671, %584 : vector<2x16xf32>
    %673 = vector.extract_strided_slice %669 {offsets = [0, 0], sizes = [2, 16], strides = [1, 1]} : vector<2x64xf32> to vector<2x16xf32>
    %674 = vector.extract_strided_slice %670 {offsets = [0, 32], sizes = [2, 16], strides = [1, 1]} : vector<2x64xf32> to vector<2x16xf32>
    %675 = arith.mulf %673, %674 : vector<2x16xf32>
    %676 = arith.addf %672, %675 : vector<2x16xf32>
    %677 = vector.extract_strided_slice %669 {offsets = [0, 48], sizes = [2, 16], strides = [1, 1]} : vector<2x64xf32> to vector<2x16xf32>
    %678 = math.tanh %676 : vector<2x16xf32>
    %679 = arith.mulf %677, %678 : vector<2x16xf32>
    %680 = vector.extract_strided_slice %660 {offsets = [0, 128], sizes = [2, 128], strides = [1, 1]} : vector<2x256xf32> to vector<2x128xf32>
    %681 = vector.extract_strided_slice %680 {offsets = [0, 0], sizes = [2, 32], strides = [1, 1]} : vector<2x128xf32> to vector<2x32xf32>
    %682 = vector.extract_strided_slice %680 {offsets = [0, 32], sizes = [2, 32], strides = [1, 1]} : vector<2x128xf32> to vector<2x32xf32>
    %683 = vector.extract_strided_slice %680 {offsets = [0, 64], sizes = [2, 64], strides = [1, 1]} : vector<2x128xf32> to vector<2x64xf32>
    %684 = arith.negf %683 : vector<2x64xf32>
    %685 = math.exp %684 : vector<2x64xf32>
    %cst_83 = arith.constant 1.000000e+00 : f32
    %686 = vector.broadcast %cst_83 : f32 to vector<2x64xf32>
    %687 = arith.addf %686, %685 : vector<2x64xf32>
    %688 = arith.divf %686, %687 : vector<2x64xf32>
    %689 = math.tanh %683 : vector<2x64xf32>
    %690 = vector.extract_strided_slice %688 {offsets = [0, 16], sizes = [2, 16], strides = [1, 1]} : vector<2x64xf32> to vector<2x16xf32>
    %691 = arith.mulf %690, %603 : vector<2x16xf32>
    %692 = vector.extract_strided_slice %688 {offsets = [0, 0], sizes = [2, 16], strides = [1, 1]} : vector<2x64xf32> to vector<2x16xf32>
    %693 = vector.extract_strided_slice %689 {offsets = [0, 32], sizes = [2, 16], strides = [1, 1]} : vector<2x64xf32> to vector<2x16xf32>
    %694 = arith.mulf %692, %693 : vector<2x16xf32>
    %695 = arith.addf %691, %694 : vector<2x16xf32>
    %696 = vector.extract_strided_slice %688 {offsets = [0, 48], sizes = [2, 16], strides = [1, 1]} : vector<2x64xf32> to vector<2x16xf32>
    %697 = math.tanh %695 : vector<2x16xf32>
    %698 = arith.mulf %696, %697 : vector<2x16xf32>
    %699 = tpu.concatenate %679, %698 in 1 : vector<2x16xf32>, vector<2x16xf32> -> vector<2x32xf32>
    %700 = arith.truncf %699 : vector<2x32xf32> to vector<2x32xbf16>
    %cst_84 = arith.constant dense<0.000000e+00> : vector<2x256xf32>
    %701 = tpu.matmul %700, %1, %cst_84 {dimension_numbers = #tpu.dot_dimension_numbers<[1], [0], [0], [1], [0, 0, 1, 1], [], []>} : vector<2x32xbf16>, vector<32x256xbf16>, vector<2x256xf32> -> vector<2x256xf32>
    %702 = arith.addf %701, %7 : vector<2x256xf32>
    %703 = vector.extract_strided_slice %702 {offsets = [0, 0], sizes = [2, 96], strides = [1, 1]} : vector<2x256xf32> to vector<2x96xf32>
    %704 = vector.extract_strided_slice %703 {offsets = [0, 32], sizes = [2, 32], strides = [1, 1]} : vector<2x96xf32> to vector<2x32xf32>
    %705 = arith.mulf %704, %662 : vector<2x32xf32>
    %706 = vector.extract_strided_slice %703 {offsets = [0, 0], sizes = [2, 32], strides = [1, 1]} : vector<2x96xf32> to vector<2x32xf32>
    %707 = arith.mulf %706, %663 : vector<2x32xf32>
    %708 = arith.addf %705, %707 : vector<2x32xf32>
    %709 = vector.extract_strided_slice %703 {offsets = [0, 64], sizes = [2, 32], strides = [1, 1]} : vector<2x96xf32> to vector<2x32xf32>
    %710 = arith.addf %708, %709 : vector<2x32xf32>
    %711 = arith.negf %710 : vector<2x32xf32>
    %712 = math.exp %711 : vector<2x32xf32>
    %cst_85 = arith.constant 1.000000e+00 : f32
    %713 = vector.broadcast %cst_85 : f32 to vector<2x32xf32>
    %714 = arith.addf %713, %712 : vector<2x32xf32>
    %715 = arith.divf %713, %714 : vector<2x32xf32>
    %716 = math.tanh %710 : vector<2x32xf32>
    %717 = vector.extract_strided_slice %715 {offsets = [0, 8], sizes = [2, 8], strides = [1, 1]} : vector<2x32xf32> to vector<2x8xf32>
    %718 = arith.mulf %717, %630 : vector<2x8xf32>
    %719 = vector.extract_strided_slice %715 {offsets = [0, 0], sizes = [2, 8], strides = [1, 1]} : vector<2x32xf32> to vector<2x8xf32>
    %720 = vector.extract_strided_slice %716 {offsets = [0, 16], sizes = [2, 8], strides = [1, 1]} : vector<2x32xf32> to vector<2x8xf32>
    %721 = arith.mulf %719, %720 : vector<2x8xf32>
    %722 = arith.addf %718, %721 : vector<2x8xf32>
    %723 = vector.extract_strided_slice %715 {offsets = [0, 24], sizes = [2, 8], strides = [1, 1]} : vector<2x32xf32> to vector<2x8xf32>
    %724 = math.tanh %722 : vector<2x8xf32>
    %725 = arith.mulf %723, %724 : vector<2x8xf32>
    %726 = vector.extract_strided_slice %702 {offsets = [0, 128], sizes = [2, 96], strides = [1, 1]} : vector<2x256xf32> to vector<2x96xf32>
    %727 = vector.extract_strided_slice %726 {offsets = [0, 32], sizes = [2, 32], strides = [1, 1]} : vector<2x96xf32> to vector<2x32xf32>
    %728 = arith.mulf %727, %681 : vector<2x32xf32>
    %729 = vector.extract_strided_slice %726 {offsets = [0, 0], sizes = [2, 32], strides = [1, 1]} : vector<2x96xf32> to vector<2x32xf32>
    %730 = arith.mulf %729, %682 : vector<2x32xf32>
    %731 = arith.addf %728, %730 : vector<2x32xf32>
    %732 = vector.extract_strided_slice %726 {offsets = [0, 64], sizes = [2, 32], strides = [1, 1]} : vector<2x96xf32> to vector<2x32xf32>
    %733 = arith.addf %731, %732 : vector<2x32xf32>
    %734 = arith.negf %733 : vector<2x32xf32>
    %735 = math.exp %734 : vector<2x32xf32>
    %cst_86 = arith.constant 1.000000e+00 : f32
    %736 = vector.broadcast %cst_86 : f32 to vector<2x32xf32>
    %737 = arith.addf %736, %735 : vector<2x32xf32>
    %738 = arith.divf %736, %737 : vector<2x32xf32>
    %739 = math.tanh %733 : vector<2x32xf32>
    %740 = vector.extract_strided_slice %738 {offsets = [0, 8], sizes = [2, 8], strides = [1, 1]} : vector<2x32xf32> to vector<2x8xf32>
    %741 = arith.mulf %740, %653 : vector<2x8xf32>
    %742 = vector.extract_strided_slice %738 {offsets = [0, 0], sizes = [2, 8], strides = [1, 1]} : vector<2x32xf32> to vector<2x8xf32>
    %743 = vector.extract_strided_slice %739 {offsets = [0, 16], sizes = [2, 8], strides = [1, 1]} : vector<2x32xf32> to vector<2x8xf32>
    %744 = arith.mulf %742, %743 : vector<2x8xf32>
    %745 = arith.addf %741, %744 : vector<2x8xf32>
    %746 = vector.extract_strided_slice %738 {offsets = [0, 24], sizes = [2, 8], strides = [1, 1]} : vector<2x32xf32> to vector<2x8xf32>
    %747 = math.tanh %745 : vector<2x8xf32>
    %748 = arith.mulf %746, %747 : vector<2x8xf32>
    %749 = tpu.concatenate %37, %725, %679, %725, %748, %698 in 1 : vector<2x8xf32>, vector<2x8xf32>, vector<2x16xf32>, vector<2x8xf32>, vector<2x8xf32>, vector<2x16xf32> -> vector<2x64xf32>
    %750 = arith.truncf %749 : vector<2x64xf32> to vector<2x64xbf16>
    %cst_87 = arith.constant dense<0.000000e+00> : vector<2x256xf32>
    %751 = tpu.matmul %750, %0, %cst_87 {dimension_numbers = #tpu.dot_dimension_numbers<[1], [0], [0], [1], [0, 0, 1, 1], [], []>} : vector<2x64xbf16>, vector<64x256xbf16>, vector<2x256xf32> -> vector<2x256xf32>
    %752 = arith.addf %751, %4 : vector<2x256xf32>
    %753 = vector.extract_strided_slice %752 {offsets = [0, 0], sizes = [2, 128], strides = [1, 1]} : vector<2x256xf32> to vector<2x128xf32>
    %754 = vector.extract_strided_slice %753 {offsets = [0, 64], sizes = [2, 64], strides = [1, 1]} : vector<2x128xf32> to vector<2x64xf32>
    %755 = arith.negf %754 : vector<2x64xf32>
    %756 = math.exp %755 : vector<2x64xf32>
    %cst_88 = arith.constant 1.000000e+00 : f32
    %757 = vector.broadcast %cst_88 : f32 to vector<2x64xf32>
    %758 = arith.addf %757, %756 : vector<2x64xf32>
    %759 = arith.divf %757, %758 : vector<2x64xf32>
    %760 = math.tanh %754 : vector<2x64xf32>
    %761 = vector.extract_strided_slice %759 {offsets = [0, 16], sizes = [2, 16], strides = [1, 1]} : vector<2x64xf32> to vector<2x16xf32>
    %762 = arith.mulf %761, %676 : vector<2x16xf32>
    %763 = vector.extract_strided_slice %759 {offsets = [0, 0], sizes = [2, 16], strides = [1, 1]} : vector<2x64xf32> to vector<2x16xf32>
    %764 = vector.extract_strided_slice %760 {offsets = [0, 32], sizes = [2, 16], strides = [1, 1]} : vector<2x64xf32> to vector<2x16xf32>
    %765 = arith.mulf %763, %764 : vector<2x16xf32>
    %766 = arith.addf %762, %765 : vector<2x16xf32>
    %767 = vector.extract_strided_slice %759 {offsets = [0, 48], sizes = [2, 16], strides = [1, 1]} : vector<2x64xf32> to vector<2x16xf32>
    %768 = math.tanh %766 : vector<2x16xf32>
    %769 = arith.mulf %767, %768 : vector<2x16xf32>
    %770 = vector.extract_strided_slice %752 {offsets = [0, 128], sizes = [2, 128], strides = [1, 1]} : vector<2x256xf32> to vector<2x128xf32>
    %771 = vector.extract_strided_slice %770 {offsets = [0, 0], sizes = [2, 32], strides = [1, 1]} : vector<2x128xf32> to vector<2x32xf32>
    %772 = vector.extract_strided_slice %770 {offsets = [0, 32], sizes = [2, 32], strides = [1, 1]} : vector<2x128xf32> to vector<2x32xf32>
    %773 = vector.extract_strided_slice %770 {offsets = [0, 64], sizes = [2, 64], strides = [1, 1]} : vector<2x128xf32> to vector<2x64xf32>
    %774 = arith.negf %773 : vector<2x64xf32>
    %775 = math.exp %774 : vector<2x64xf32>
    %cst_89 = arith.constant 1.000000e+00 : f32
    %776 = vector.broadcast %cst_89 : f32 to vector<2x64xf32>
    %777 = arith.addf %776, %775 : vector<2x64xf32>
    %778 = arith.divf %776, %777 : vector<2x64xf32>
    %779 = math.tanh %773 : vector<2x64xf32>
    %780 = vector.extract_strided_slice %778 {offsets = [0, 16], sizes = [2, 16], strides = [1, 1]} : vector<2x64xf32> to vector<2x16xf32>
    %781 = arith.mulf %780, %695 : vector<2x16xf32>
    %782 = vector.extract_strided_slice %778 {offsets = [0, 0], sizes = [2, 16], strides = [1, 1]} : vector<2x64xf32> to vector<2x16xf32>
    %783 = vector.extract_strided_slice %779 {offsets = [0, 32], sizes = [2, 16], strides = [1, 1]} : vector<2x64xf32> to vector<2x16xf32>
    %784 = arith.mulf %782, %783 : vector<2x16xf32>
    %785 = arith.addf %781, %784 : vector<2x16xf32>
    %786 = vector.extract_strided_slice %778 {offsets = [0, 48], sizes = [2, 16], strides = [1, 1]} : vector<2x64xf32> to vector<2x16xf32>
    %787 = math.tanh %785 : vector<2x16xf32>
    %788 = arith.mulf %786, %787 : vector<2x16xf32>
    %789 = tpu.concatenate %769, %788 in 1 : vector<2x16xf32>, vector<2x16xf32> -> vector<2x32xf32>
    %790 = arith.truncf %789 : vector<2x32xf32> to vector<2x32xbf16>
    %cst_90 = arith.constant dense<0.000000e+00> : vector<2x256xf32>
    %791 = tpu.matmul %790, %1, %cst_90 {dimension_numbers = #tpu.dot_dimension_numbers<[1], [0], [0], [1], [0, 0, 1, 1], [], []>} : vector<2x32xbf16>, vector<32x256xbf16>, vector<2x256xf32> -> vector<2x256xf32>
    %792 = arith.addf %791, %7 : vector<2x256xf32>
    %793 = vector.extract_strided_slice %792 {offsets = [0, 128], sizes = [2, 96], strides = [1, 1]} : vector<2x256xf32> to vector<2x96xf32>
    %794 = vector.extract_strided_slice %793 {offsets = [0, 32], sizes = [2, 32], strides = [1, 1]} : vector<2x96xf32> to vector<2x32xf32>
    %795 = arith.mulf %794, %771 : vector<2x32xf32>
    %796 = vector.extract_strided_slice %793 {offsets = [0, 0], sizes = [2, 32], strides = [1, 1]} : vector<2x96xf32> to vector<2x32xf32>
    %797 = arith.mulf %796, %772 : vector<2x32xf32>
    %798 = arith.addf %795, %797 : vector<2x32xf32>
    %799 = vector.extract_strided_slice %793 {offsets = [0, 64], sizes = [2, 32], strides = [1, 1]} : vector<2x96xf32> to vector<2x32xf32>
    %800 = arith.addf %798, %799 : vector<2x32xf32>
    %801 = arith.negf %800 : vector<2x32xf32>
    %802 = math.exp %801 : vector<2x32xf32>
    %cst_91 = arith.constant 1.000000e+00 : f32
    %803 = vector.broadcast %cst_91 : f32 to vector<2x32xf32>
    %804 = arith.addf %803, %802 : vector<2x32xf32>
    %805 = arith.divf %803, %804 : vector<2x32xf32>
    %806 = math.tanh %800 : vector<2x32xf32>
    %807 = vector.extract_strided_slice %805 {offsets = [0, 8], sizes = [2, 8], strides = [1, 1]} : vector<2x32xf32> to vector<2x8xf32>
    %808 = arith.mulf %807, %745 : vector<2x8xf32>
    %809 = vector.extract_strided_slice %805 {offsets = [0, 0], sizes = [2, 8], strides = [1, 1]} : vector<2x32xf32> to vector<2x8xf32>
    %810 = vector.extract_strided_slice %806 {offsets = [0, 16], sizes = [2, 8], strides = [1, 1]} : vector<2x32xf32> to vector<2x8xf32>
    %811 = arith.mulf %809, %810 : vector<2x8xf32>
    %812 = arith.addf %808, %811 : vector<2x8xf32>
    %813 = vector.extract_strided_slice %805 {offsets = [0, 24], sizes = [2, 8], strides = [1, 1]} : vector<2x32xf32> to vector<2x8xf32>
    %814 = math.tanh %812 : vector<2x8xf32>
    %815 = arith.mulf %813, %814 : vector<2x8xf32>
    %c0_92 = arith.constant 0 : index
    %c0_93 = arith.constant 0 : index
    %816 = vector.load %arg5[%c0_92, %c0_93] : memref<65x16xf32, #tpu.memory_space<vmem>>, vector<64x16xf32>
    %c64_94 = arith.constant 64 : index
    %c0_95 = arith.constant 0 : index
    %817 = vector.load %arg5[%c64_94, %c0_95] : memref<65x16xf32, #tpu.memory_space<vmem>>, vector<1x16xf32>
    %818 = vector.shape_cast %817 : vector<1x16xf32> to vector<1x16xf32>
    %819 = vector.broadcast %818 : vector<1x16xf32> to vector<2x16xf32>
    %820 = tpu.concatenate %196, %288, %380, %472, %564, %656, %748, %815 in 1 : vector<2x8xf32>, vector<2x8xf32>, vector<2x8xf32>, vector<2x8xf32>, vector<2x8xf32>, vector<2x8xf32>, vector<2x8xf32>, vector<2x8xf32> -> vector<2x64xf32>
    %cst_96 = arith.constant dense<0.000000e+00> : vector<2x16xf32>
    %821 = tpu.matmul %820, %816, %cst_96 {dimension_numbers = #tpu.dot_dimension_numbers<[1], [0], [0], [1], [0, 0, 1, 1], [], []>} : vector<2x64xf32>, vector<64x16xf32>, vector<2x16xf32> -> vector<2x16xf32>
    %822 = arith.addf %821, %819 : vector<2x16xf32>
    %cst_97 = arith.constant 0.000000e+00 : f32
    %823 = vector.broadcast %cst_97 : f32 to vector<2x112xf32>
    %cst_98 = arith.constant 0.000000e+00 : f32
    %824 = vector.broadcast %cst_98 : f32 to vector<2x112xf32>
    %825 = tpu.concatenate %822, %823 in 1 : vector<2x16xf32>, vector<2x112xf32> -> vector<2x128xf32>
    %c0_99 = arith.constant 0 : index
    %c0_100 = arith.constant 0 : index
    %c0_101 = arith.constant 0 : index
    %826 = vector.load %arg6[%c0_99, %c0_100, %c0_101] : memref<3x2x128xf32, #tpu.memory_space<vmem>>, vector<1x2x128xf32>
    %827 = vector.shape_cast %826 : vector<1x2x128xf32> to vector<2x128xf32>
    %828 = vector.shape_cast %825 : vector<2x128xf32> to vector<1x2x128xf32>
    tpu.vector_store %arg6[%c0_99, %c0_100, %c0_101], %828 {strides = array<i32>} : memref<3x2x128xf32, #tpu.memory_space<vmem>>, vector<1x2x128xf32>,
    %829 = tpu.concatenate %725, %815, %824 in 1 : vector<2x8xf32>, vector<2x8xf32>, vector<2x112xf32> -> vector<2x128xf32>
    %c1_102 = arith.constant 1 : index
    %c0_103 = arith.constant 0 : index
    %c0_104 = arith.constant 0 : index
    %830 = vector.load %arg6[%c1_102, %c0_103, %c0_104] : memref<3x2x128xf32, #tpu.memory_space<vmem>>, vector<1x2x128xf32>
    %831 = vector.shape_cast %830 : vector<1x2x128xf32> to vector<2x128xf32>
    %832 = vector.shape_cast %829 : vector<2x128xf32> to vector<1x2x128xf32>
    tpu.vector_store %arg6[%c1_102, %c0_103, %c0_104], %832 {strides = array<i32>} : memref<3x2x128xf32, #tpu.memory_space<vmem>>, vector<1x2x128xf32>,
    %833 = tpu.concatenate %722, %812, %824 in 1 : vector<2x8xf32>, vector<2x8xf32>, vector<2x112xf32> -> vector<2x128xf32>
    %c2_105 = arith.constant 2 : index
    %c0_106 = arith.constant 0 : index
    %c0_107 = arith.constant 0 : index
    %834 = vector.load %arg6[%c2_105, %c0_106, %c0_107] : memref<3x2x128xf32, #tpu.memory_space<vmem>>, vector<1x2x128xf32>
    %835 = vector.shape_cast %834 : vector<1x2x128xf32> to vector<2x128xf32>
    %836 = vector.shape_cast %833 : vector<2x128xf32> to vector<1x2x128xf32>
    tpu.vector_store %arg6[%c2_105, %c0_106, %c0_107], %836 {strides = array<i32>} : memref<3x2x128xf32, #tpu.memory_space<vmem>>, vector<1x2x128xf32>,
    return
  }
  func.func @transform_0(%arg0: i32) -> (i32, i32, i32) {
    %c0_i32 = arith.constant 0 : i32
    %c0_i32_0 = arith.constant 0 : i32
    %c0_i32_1 = arith.constant 0 : i32
    %c0_i32_2 = arith.constant 0 : i32
    return %c0_i32, %c0_i32_0, %c0_i32_1 : i32, i32, i32
  }
  func.func @transform_1(%arg0: i32) -> (i32, i32, i32) {
    %c0_i32 = arith.constant 0 : i32
    %c0_i32_0 = arith.constant 0 : i32
    %c0_i32_1 = arith.constant 0 : i32
    %c0_i32_2 = arith.constant 0 : i32
    return %c0_i32, %c0_i32_0, %c0_i32_1 : i32, i32, i32
  }
  func.func @transform_2(%arg0: i32) -> (i32, i32) {
    %c0_i32 = arith.constant 0 : i32
    %c0_i32_0 = arith.constant 0 : i32
    %c0_i32_1 = arith.constant 0 : i32
    return %c0_i32, %c0_i32_0 : i32, i32
  }
  func.func @transform_3(%arg0: i32) -> (i32, i32) {
    %c0_i32 = arith.constant 0 : i32
    %c0_i32_0 = arith.constant 0 : i32
    %c0_i32_1 = arith.constant 0 : i32
    return %c0_i32, %c0_i32_0 : i32, i32
  }
  func.func @transform_4(%arg0: i32) -> (i32, i32) {
    %c0_i32 = arith.constant 0 : i32
    %c0_i32_0 = arith.constant 0 : i32
    %c0_i32_1 = arith.constant 0 : i32
    return %c0_i32, %c0_i32_0 : i32, i32
  }
  func.func @transform_5(%arg0: i32) -> (i32, i32, i32) {
    %c0_i32 = arith.constant 0 : i32
    %c0_i32_0 = arith.constant 0 : i32
    %c0_i32_1 = arith.constant 0 : i32
    %c0_i32_2 = arith.constant 0 : i32
    return %c0_i32, %c0_i32_0, %c0_i32_1 : i32, i32, i32
  }
}

</mosaic_0001>

<bundles_post_ra>
// kernel: tpu_custom_call.1
= control target key start
LH: loop header
LB: loop body
LE: loop exit
PB: predicated region body
PF: predicated region fallthrough
CT: control target
= control target key end

     0   :  { %10 = vsyncpa [#allocation3], 0  ;;  %s3917_s0 = inlined_call_operand.vmem [shape: f32[8,2,8], index: 0, kind: input, shape index: {}]   ;;  %s3918_s1 = inlined_call_operand.vmem [shape: f32[4,2,8], index: 1, kind: input, shape index: {}]   ;;  %s3919_s2 = inlined_call_operand.hbm [shape: bf16[96,256], index: 2, kind: input, shape index: {}]   ;;  %s3920_s3 = inlined_call_operand.vmem [shape: f32[2,256], index: 3, kind: input, shape index: {}]   ;;  %s3921_s4 = inlined_call_operand.vmem [shape: f32[65,16], index: 4, kind: input, shape index: {}]   ;;  %s3922_s5 = inlined_call_operand.hbm [shape: f32[3,2,128], index: 5, kind: output, shape index: {}]  }
   0x1   :  { %11 = vsyncpa [#allocation4], 0  ;;  %s3009_s18 = smov [#allocation2]   ;;  %s2961_s22 = scalar_lea.hbm %s3919_s2, 1536 }
   0x2   :  { %s21_s19 = sshll.u32 %s3009_s18, 4  ;;  %p2962_p0 = scmp.ne.s32.totalorder %s3919_s2, %s2961_s22  ;;  %s22_s19 = int_to_ptr.vmem [resolvable:$true] %s21_s19 }
   0x3   :  { %p2965_p1 = scmp.lt.u32.totalorder %s2961_s22, %s3919_s2 }
   0x5   :  { %p2967_p2 = pnand %p2965_p1, %p2962_p0 }
   0x7   :  { %2970 = shalt.err (!%p2967_p2)
}
   0x8   :  { %s2971_s27 = scalar_lea.vmem %s22_s19, 1536  ;;  %p2976_p4 = scmp.lt.s32.totalorder %s22_s19, %s22_s19 }
   0x9   :  { %p2972_p3 = scmp.ne.s32.totalorder %s22_s19, %s2971_s27  ;;  %p2977_p5 = scmp.lt.s32.totalorder %s2971_s27, %s2971_s27 }
   0xb   :  { %p2978_p6 = por %p2977_p5, %p2976_p4 }
   0xd   :  { %p2979_p7 = pnand %p2978_p6, %p2972_p3 }
   0xf   :  { %2982 = shalt.err (!%p2979_p7)
}
  0x10   :  { %s3010_s28 = smov 128   ;;  %s3011_s29 = smov 8  }
  0x11   :  { %27 = dma.hbm_to_vmem [thread:$0]  %s3919_s2, 1536, %s22_s19, [#allocation3], %s3010_s28, %s3010_s28, %s3011_s29  }
  0x12   :  { %3005 = dma.done.wait [#allocation3], 1536  }
  0x13   :  { %3006 = vsyncadd [#allocation3], 4294965760  ;;  %v3012_v0 = vmov 0   ;;  %v88_v1 = vld [vmem:[%s3918_s1] sm:$0x3]  ;;  %s3013_s2 = smov 40   ;;  %v50_v20 = vlaneseq }
  0x14   :  { %190 = vmatprep.mubr.bf16.mxu0 %v3012_v0  ;;  %312 = vmatprep.mubr.bf16.mxu1 %v3012_v0  ;;  %v2523_v2 = vld [vmem:[%s3918_s1 + $0x2] sm:$0x3]  ;;  %v3081_v3 = vld [vmem:[#allocation2 + $0x4] ss:$8 sps:$4 sm:$0xff]   ;;  %v3085_v5 = vld [vmem:[#allocation2 + $0x14] ss:$8 sps:$4 sm:$0xff]  }
  0x15   :  { %96 = vrot.lane.b32.xlu0 %v88_v1, %s3011_s29  ;;  %v3083_v4 = vld [vmem:[#allocation2] ss:$8 sps:$4 sm:$0xff]   ;;  %158 = vmatprep.subr.bf16.mxu0 %v3081_v3  ;;  %v3089_v6 = vld [vmem:[#allocation2 + $0x10] ss:$8 sps:$4 sm:$0xff]   ;;  %v3093_v7 = vld [vmem:[#allocation2 + $0x24] ss:$8 sps:$4 sm:$0xff]  }
  0x16   :  { %159 = vmatpush1.bf16.msra.mxu0 %v3083_v4  ;;  %v3096_v8 = vld [vmem:[#allocation2 + $0x20] ss:$8 sps:$4 sm:$0xff]   ;;  %v3099_v9 = vld [vmem:[#allocation2 + $0x34] ss:$8 sps:$4 sm:$0xff]   ;;  %v3102_v10 = vld [vmem:[#allocation2 + $0x30] ss:$8 sps:$4 sm:$0xff]  }
  0x17   :  { %160 = vmatprep.subr.bf16.mxu0 %v3085_v5  ;;  %vm103_vm0 = vcmask 64512   ;;  %v73_v11 = vld [vmem:[%s3917_s0] sm:$0x3]  ;;  %vm105_vm1 = vcmask 130048   ;;  %vm107_vm2 = vcmask 261120   ;;  %vm109_vm3 = vcmask 326656  }
  0x18   :  { %vm111_vm4 = vcmask 392192   ;;  %vm154_vm5 = vcmask 523264   ;;  %v3119_v21 = vshrl.u32 %v50_v20, 7  ;;  %v48_v23 = vld [vmem:[%s3920_s3] ss:$2 sm:$0x3] }
  0x19   :  { %100 = vrot.lane.b32.xlu0 %v2523_v2, %s3013_s2  ;;  %s3014_s15 = smov 96   ;;  %s3015_s16 = smov 16   ;;  %v3147_v53 = vld [vmem:[#allocation2 + $0x44] ss:$8 sps:$4 sm:$0xff]   ;;  %v3153_v56 = vld [vmem:[#allocation2 + $0x40] ss:$8 sps:$4 sm:$0xff]  }
  0x1a   :  { %161 = vmatpush1.bf16.msra.mxu0 %v3089_v6  ;;  %v52_v22 = vsub.s32 0, %v3119_v21  ;;  %v56_v24 = vsub.s32 1, %v3119_v21  ;;  %280 = vmatprep.subr.bf16.mxu1 %v3147_v53  ;;  %s3016_s17 = smov 32   ;;  %v3155_v57 = vld [vmem:[#allocation2 + $0x54] ss:$8 sps:$4 sm:$0xff]   ;;  %s3018_s22 = smov 80  }
  0x1b   :  { %162 = vmatprep.subr.bf16.mxu0 %v3093_v7  ;;  %281 = vmatpush1.bf16.msra.mxu1 %v3153_v56  ;;  %v3161_v58 = vld [vmem:[#allocation2 + $0x50] ss:$8 sps:$4 sm:$0xff]   ;;  %s3019_s23 = smov 104   ;;  %s3022_s18 = smov 88   ;;  %vm3025_vm6 = vmmov 0   ;;  %vm2393_vm7 = vcmask 195584  }
  0x1c   :  { %v3128_v25 = vrot.slane %v48_v23, %v52_v22  ;;  %v3132_v26 = vrot.slane %v48_v23, %v56_v24  ;;  %282 = vmatprep.subr.bf16.mxu1 %v3155_v57  ;;  %s3023_s19 = smov 120   ;;  %vm2398_vm8 = vcmask 457728   ;;  %s3027_s10 = smov [#allocation5]  }
  0x1e   :  { %163 = vmatpush1.bf16.msra.mxu0 %v3096_v8 }
  0x1f   :  { %164 = vmatprep.subr.bf16.mxu0 %v3099_v9  ;;  %283 = vmatpush1.bf16.msra.mxu1 %v3161_v58 }
  0x20   :  { %386 = vmatprep.subr.bf16.mxu1 %v3081_v3 }
  0x22   :  { %165 = vmatpush1.bf16.msra.mxu0 %v3102_v10 }
  0x23   :  { %488 = vmatprep.subr.bf16.mxu0 %v3147_v53 }
  0x87   :  { %v97_v12 = vpop.permute.xlu0 %96 }
  0x88   :  { %v104_v13 = vsel %vm103_vm0, %v73_v11, %v97_v12  ;;  %v3187_v12 = vld [vmem:[%s3920_s3 + $0x1] ss:$2 sm:$0x3]  ;;  %s3017_s3 = smov 112  }
  0x89   :  { %v106_v14 = vsel %vm105_vm1, %v104_v13, 0.0  ;;  %v3192_v13 = vrot.slane %v3187_v12, %v52_v22 }
  0x8a   :  { %v108_v15 = vsel %vm107_vm2, %v106_v14, 0.0 }
  0x8b   :  { %v3112_v16 = vpop.permute.xlu0 %100 }
  0x8c   :  { %v110_v17 = vsel %vm109_vm3, %v108_v15, %v3112_v16 }
  0x8d   :  { %v112_v18 = vsel %vm111_vm4, %v110_v17, 0.0 }
  0x8e   :  { %v113_v19 = vpack.c.bf16 %v112_v18, %v112_v18 }
  0x90   :  { %2534 = vmatmul.mubr.msk.bf16.vlgmr.msra.gmra.mrb[0].mxu0 %vm154_vm5, %v113_v19 }
  0x91   :  { %520 = vmatprep.mubr.bf16.mxu0 %v3012_v0  ;;  %489 = vmatpush1.bf16.msra.mxu0 %v3153_v56 }
  0x92   :  { %490 = vmatprep.subr.bf16.mxu0 %v3155_v57 }
  0x95   :  { %491 = vmatpush1.bf16.msra.mxu0 %v3161_v58 }
  0x96   :  { %645 = vmatprep.subr.bf16.mxu0 %v3081_v3 }
 0x163   :  { %v192_v27 = vpop.f32.mrb[0].mxu0 }
 0x164   :  { %v3135_v28 = vadd.f32 %v192_v27, %v3128_v25  ;;  %v194_v29 = vpop.f32.mrb[1].mxu0  ;;  %v2524_v27 = vld [vmem:[%s3918_s1 + $0x4] sm:$0x3] }
 0x165   :  { %v196_v30 = vpop.f32.mrb[2].mxu0  ;;  %v195_v31 = vadd.f32 %v194_v29, %v3132_v26 }
 0x166   :  { %2670 = vtanh.f32 %v3135_v28  ;;  %v197_v32 = vpop.f32.mrb[3].mxu0  ;;  %v2535_v35 = vmul.f32 -1.442695, %v3135_v28 }
 0x167   :  { %2672 = vtanh.f32 %v195_v31  ;;  %v2536_v36 = vmul.f32 -1.442695, %v195_v31 }
 0x168   :  { %2674 = vpow2.f32 %v2535_v35 }
 0x169   :  { %2676 = vpow2.f32 %v2536_v36 }
 0x170   :  { %v2671_v33 = vpop.eup %2670 }
 0x171   :  { %208 = vrot.lane.b32.xlu1 %v2671_v33, %s3014_s15  ;;  %v2673_v34 = vpop.eup %2672 }
 0x172   :  { %v2675_v37 = vpop.eup %2674 }
 0x173   :  { %v202_v38 = vadd.f32 1.0, %v2675_v37  ;;  %v2677_v39 = vpop.eup %2676 }
 0x174   :  { %v226_v40 = vadd.f32 1.0, %v2677_v39 }
 0x175   :  { %232 = vrot.lane.b32.xlu1 %v2673_v34, %s3014_s15  ;;  %2678 = vrcp.f32 %v202_v38 }
 0x176   :  { %2680 = vrcp.f32 %v226_v40 }
 0x17f   :  { %v2679_v41 = vpop.eup %2678 }
 0x180   :  { %v2681_v44 = vpop.eup %2680  ;;  %v206_v47 = vmul.f32 0.0, %v2679_v41 }
 0x181   :  { %v230_v50 = vmul.f32 0.0, %v2681_v44 }
 0x1e3   :  { %v209_v42 = vpop.permute.xlu1 %208 }
 0x1e4   :  { %v211_v43 = vmul.f32 %v2679_v41, %v209_v42 }
 0x1e6   :  { %213 = vrot.lane.b32.xlu0 %v211_v43, %s3015_s16 }
 0x1e7   :  { %v233_v45 = vpop.permute.xlu1 %232 }
 0x1e8   :  { %v235_v46 = vmul.f32 %v2681_v44, %v233_v45 }
 0x1ea   :  { %237 = vrot.lane.b32.xlu1 %v235_v46, %s3015_s16 }
 0x258   :  { %v214_v48 = vpop.permute.xlu0 %213 }
 0x259   :  { %v3144_v49 = vadd.f32 %v214_v48, %v206_v47  ;;  %v2516_v47 = vld [vmem:[%s3917_s0 + $0x2] sm:$0x3] }
 0x25b   :  { %2682 = vtanh.f32 %v3144_v49 }
 0x25c   :  { %v238_v51 = vpop.permute.xlu1 %237 }
 0x25d   :  { %v240_v52 = vadd.f32 %v238_v51, %v230_v50 }
 0x25f   :  { %2684 = vtanh.f32 %v240_v52 }
 0x265   :  { %v2683_v54 = vpop.eup %2682 }
 0x266   :  { %219 = vrot.lane.b32.xlu0 %v2683_v54, %s3016_s17 }
 0x269   :  { %v2685_v55 = vpop.eup %2684 }
 0x26a   :  { %243 = vrot.lane.b32.xlu1 %v2685_v55, %s3016_s17 }
 0x2d8   :  { %v220_v59 = vpop.permute.xlu0 %219 }
 0x2d9   :  { %v222_v60 = vmul.f32 %v2679_v41, %v220_v59 }
 0x2db   :  { %248 = vrot.lane.b32.xlu0 %v222_v60, %s3015_s16 }
 0x2dc   :  { %v244_v61 = vpop.permute.xlu1 %243 }
 0x2dd   :  { %v246_v62 = vmul.f32 %v2681_v44, %v244_v61 }
 0x2df   :  { %252 = vrot.lane.b32.xlu1 %v246_v62, %s3016_s17  ;;  %325 = vrot.lane.b32.xlu0 %v3135_v28, %s3014_s15 }
 0x2e3   :  { %321 = vrot.lane.b32.xlu1 %v3135_v28, %s3016_s17 }
 0x34d   :  { %v249_v63 = vpop.permute.xlu0 %248 }
 0x351   :  { %v253_v1 = vpop.permute.xlu1 %252  ;;  %v326_v18 = vpop.permute.xlu0 %325 }
 0x352   :  { %v255_v2 = vsel %vm105_vm1, %v249_v63, %v253_v1 }
 0x353   :  { %v256_v11 = vpack.c.bf16 %v255_v2, %v255_v2 }
 0x355   :  { %2541 = vmatmul.mubr.msk.bf16.vlgmr.msra.gmra.mrb[0].mxu1 %vm107_vm2, %v256_v11  ;;  %v322_v22 = vpop.permute.xlu1 %321 }
 0x356   :  { %387 = vmatpush1.bf16.msra.mxu1 %v3083_v4  ;;  %418 = vmatprep.mubr.bf16.mxu1 %v3012_v0 }
 0x357   :  { %388 = vmatprep.subr.bf16.mxu1 %v3085_v5 }
 0x35a   :  { %389 = vmatpush1.bf16.msra.mxu1 %v3089_v6 }
 0x35b   :  { %390 = vmatprep.subr.bf16.mxu1 %v3093_v7 }
 0x35e   :  { %391 = vmatpush1.bf16.msra.mxu1 %v3096_v8 }
 0x35f   :  { %392 = vmatprep.subr.bf16.mxu1 %v3099_v9 }
 0x362   :  { %393 = vmatpush1.bf16.msra.mxu1 %v3102_v10 }
 0x363   :  { %747 = vmatprep.subr.bf16.mxu1 %v3147_v53 }
 0x428   :  { %v314_v14 = vpop.f32.mrb[0].mxu1 }
 0x429   :  { %v315_v15 = vadd.f32 %v314_v14, %v3192_v13  ;;  %v316_v17 = vpop.f32.mrb[1].mxu1 }
 0x42a   :  { %v317_v19 = vpop.f32.mrb[2].mxu1 }
 0x42b   :  { %v318_v20 = vpop.f32.mrb[3].mxu1  ;;  %335 = vrot.lane.b32.xlu1 %v315_v15, %s3014_s15  ;;  %v328_v23 = vmul.f32 %v326_v18, %v315_v15  ;;  %v324_v28 = vmul.f32 %v322_v22, %v315_v15 }
 0x42d   :  { %330 = vrot.lane.b32.xlu0 %v328_v23, %s3016_s17 }
 0x42f   :  { %347 = vrot.lane.b32.xlu1 %v2524_v27, %s3013_s2 }
 0x49d   :  { %v336_v31 = vpop.permute.xlu1 %335 }
 0x49f   :  { %v331_v29 = vpop.permute.xlu0 %330 }
 0x4a0   :  { %v333_v30 = vadd.f32 %v331_v29, %v324_v28 }
 0x4a1   :  { %v348_v40 = vpop.permute.xlu1 %347 }
 0x4a2   :  { %v338_v32 = vadd.f32 %v336_v31, %v333_v30 }
 0x4a4   :  { %2686 = vtanh.f32 %v338_v32  ;;  %v2542_v34 = vmul.f32 -1.442695, %v338_v32 }
 0x4a6   :  { %2688 = vpow2.f32 %v2542_v34 }
 0x4ae   :  { %v2687_v33 = vpop.eup %2686 }
 0x4af   :  { %352 = vrot.lane.b32.xlu0 %v2687_v33, %s3017_s3 }
 0x4b0   :  { %v2689_v35 = vpop.eup %2688 }
 0x4b1   :  { %v342_v36 = vadd.f32 1.0, %v2689_v35 }
 0x4b3   :  { %2690 = vrcp.f32 %v342_v36 }
 0x4bd   :  { %v2691_v37 = vpop.eup %2690 }
 0x4be   :  { %v350_v41 = vmul.f32 %v2691_v37, %v348_v40 }
 0x521   :  { %v353_v38 = vpop.permute.xlu0 %352 }
 0x522   :  { %v355_v39 = vmul.f32 %v2691_v37, %v353_v38 }
 0x524   :  { %357 = vrot.lane.b32.xlu0 %v355_v39, %s3011_s29 }
 0x596   :  { %v358_v42 = vpop.permute.xlu0 %357 }
 0x597   :  { %v3203_v43 = vadd.f32 %v358_v42, %v350_v41 }
 0x599   :  { %2692 = vtanh.f32 %v3203_v43 }
 0x5a3   :  { %v2693_v44 = vpop.eup %2692 }
 0x5a4   :  { %363 = vrot.lane.b32.xlu1 %v2693_v44, %s3015_s16 }
 0x5a8   :  { %371 = vrot.lane.b32.xlu1 %v222_v60, %s3016_s17 }
 0x616   :  { %v364_v45 = vpop.permute.xlu1 %363 }
 0x617   :  { %v366_v46 = vmul.f32 %v2691_v37, %v364_v45 }
 0x619   :  { %368 = vrot.lane.b32.xlu0 %v366_v46, %s3018_s22 }
 0x61a   :  { %v372_v51 = vpop.permute.xlu1 %371 }
 0x61d   :  { %374 = vrot.lane.b32.xlu0 %v366_v46, %s3019_s23 }
 0x68b   :  { %v369_v48 = vpop.permute.xlu0 %368 }
 0x68c   :  { %v377_v50 = vsel %vm103_vm0, %v2516_v47, %v369_v48 }
 0x68d   :  { %v378_v54 = vsel %vm105_vm1, %v377_v50, %v372_v51  ;;  %v3266_v50 = vrot.slane %v3187_v12, %v56_v24 }
 0x68f   :  { %v375_v52 = vpop.permute.xlu0 %374 }
 0x690   :  { %v379_v55 = vsel %vm107_vm2, %v378_v54, %v375_v52 }
 0x691   :  { %v380_v59 = vsel %vm109_vm3, %v379_v55, %v3112_v16 }
 0x692   :  { %v381_v60 = vsel %vm111_vm4, %v380_v59, 0.0 }
 0x693   :  { %v382_v61 = vpack.c.bf16 %v381_v60, %v381_v60 }
 0x695   :  { %2543 = vmatmul.mubr.msk.bf16.vlgmr.msra.gmra.mrb[4].mxu1 %vm154_vm5, %v382_v61 }
 0x696   :  { %748 = vmatpush1.bf16.msra.mxu1 %v3153_v56  ;;  %779 = vmatprep.mubr.bf16.mxu1 %v3012_v0 }
 0x697   :  { %749 = vmatprep.subr.bf16.mxu1 %v3155_v57 }
 0x69a   :  { %750 = vmatpush1.bf16.msra.mxu1 %v3161_v58 }
 0x69b   :  { %900 = vmatprep.subr.bf16.mxu1 %v3081_v3 }
 0x768   :  { %v420_v62 = vpop.f32.mrb[4].mxu1 }
 0x769   :  { %v421_v63 = vadd.f32 %v420_v62, %v3128_v25  ;;  %v422_v1 = vpop.f32.mrb[5].mxu1 }
 0x76a   :  { %v423_v16 = vadd.f32 %v422_v1, %v3132_v26  ;;  %v424_v2 = vpop.f32.mrb[6].mxu1 }
 0x76b   :  { %2694 = vtanh.f32 %v421_v63  ;;  %v425_v11 = vpop.f32.mrb[7].mxu1  ;;  %v2544_v17 = vmul.f32 -1.442695, %v421_v63 }
 0x76c   :  { %2696 = vtanh.f32 %v423_v16  ;;  %v2545_v18 = vmul.f32 -1.442695, %v423_v16 }
 0x76d   :  { %2698 = vpow2.f32 %v2544_v17 }
 0x76e   :  { %2700 = vpow2.f32 %v2545_v18 }
 0x775   :  { %v2695_v14 = vpop.eup %2694 }
 0x776   :  { %v2697_v15 = vpop.eup %2696  ;;  %436 = vrot.lane.b32.xlu1 %v2695_v14, %s3014_s15 }
 0x777   :  { %460 = vrot.lane.b32.xlu0 %v2697_v15, %s3014_s15  ;;  %v2699_v19 = vpop.eup %2698 }
 0x778   :  { %v2701_v20 = vpop.eup %2700  ;;  %v430_v23 = vadd.f32 1.0, %v2699_v19 }
 0x779   :  { %v454_v27 = vadd.f32 1.0, %v2701_v20 }
 0x77a   :  { %2702 = vrcp.f32 %v430_v23 }
 0x77b   :  { %2704 = vrcp.f32 %v454_v27 }
 0x784   :  { %v2703_v22 = vpop.eup %2702 }
 0x785   :  { %v2705_v29 = vpop.eup %2704  ;;  %v434_v33 = vmul.f32 %v2703_v22, %v3144_v49 }
 0x786   :  { %v458_v35 = vmul.f32 0.0, %v2705_v29 }
 0x7e8   :  { %v437_v28 = vpop.permute.xlu1 %436 }
 0x7e9   :  { %v439_v30 = vmul.f32 %v2703_v22, %v437_v28  ;;  %v461_v31 = vpop.permute.xlu0 %460 }
 0x7ea   :  { %v463_v32 = vmul.f32 %v2705_v29, %v461_v31 }
 0x7eb   :  { %441 = vrot.lane.b32.xlu1 %v439_v30, %s3015_s16 }
 0x7ec   :  { %465 = vrot.lane.b32.xlu0 %v463_v32, %s3015_s16 }
 0x85d   :  { %v442_v34 = vpop.permute.xlu1 %441 }
 0x85e   :  { %v3232_v36 = vadd.f32 %v442_v34, %v434_v33  ;;  %v466_v37 = vpop.permute.xlu0 %465 }
 0x85f   :  { %v3234_v38 = vadd.f32 %v466_v37, %v458_v35 }
 0x860   :  { %2706 = vtanh.f32 %v3232_v36 }
 0x861   :  { %2708 = vtanh.f32 %v3234_v38 }
 0x86a   :  { %v2707_v39 = vpop.eup %2706 }
 0x86b   :  { %v2709_v40 = vpop.eup %2708  ;;  %447 = vrot.lane.b32.xlu1 %v2707_v39, %s3016_s17 }
 0x86c   :  { %471 = vrot.lane.b32.xlu0 %v2709_v40, %s3016_s17 }
 0x8dd   :  { %v448_v41 = vpop.permute.xlu1 %447 }
 0x8de   :  { %v3240_v42 = vmul.f32 %v2703_v22, %v448_v41  ;;  %v472_v49 = vpop.permute.xlu0 %471  ;;  %v2525_v22 = vld [vmem:[%s3918_s1 + $0x6] sm:$0x3]  ;;  %s3020_s1 = smov 64  }
 0x8df   :  { %v3242_v44 = vmul.f32 %v2705_v29, %v472_v49 }
 0x8e0   :  { %476 = vrot.lane.b32.xlu1 %v3240_v42, %s3015_s16 }
 0x8e1   :  { %480 = vrot.lane.b32.xlu0 %v3242_v44, %s3016_s17 }
 0x8e4   :  { %534 = vrot.lane.b32.xlu1 %v421_v63, %s3014_s15 }
 0x8e5   :  { %577 = vrot.lane.b32.xlu0 %v423_v16, %s3014_s15 }
 0x8e8   :  { %530 = vrot.lane.b32.xlu1 %v421_v63, %s3016_s17 }
 0x8ec   :  { %573 = vrot.lane.b32.xlu1 %v423_v16, %s3016_s17 }
 0x952   :  { %v477_v45 = vpop.permute.xlu1 %476 }
 0x953   :  { %v481_v46 = vpop.permute.xlu0 %480 }
 0x954   :  { %v483_v47 = vsel %vm105_vm1, %v477_v45, %v481_v46 }
 0x955   :  { %v484_v48 = vpack.c.bf16 %v483_v47, %v483_v47 }
 0x956   :  { %v535_v55 = vpop.permute.xlu1 %534 }
 0x957   :  { %2546 = vmatmul.mubr.msk.bf16.vlgmr.msra.gmra.mrb[4].mxu0 %vm107_vm2, %v484_v48  ;;  %v578_v61 = vpop.permute.xlu0 %577 }
 0x958   :  { %646 = vmatpush1.bf16.msra.mxu0 %v3083_v4  ;;  %677 = vmatprep.mubr.bf16.mxu0 %v3012_v0 }
 0x959   :  { %647 = vmatprep.subr.bf16.mxu0 %v3085_v5 }
 0x95a   :  { %v531_v21 = vpop.permute.xlu1 %530 }
 0x95c   :  { %648 = vmatpush1.bf16.msra.mxu0 %v3089_v6 }
 0x95d   :  { %649 = vmatprep.subr.bf16.mxu0 %v3093_v7 }
 0x95e   :  { %v574_v24 = vpop.permute.xlu1 %573 }
 0x960   :  { %650 = vmatpush1.bf16.msra.mxu0 %v3096_v8 }
 0x961   :  { %651 = vmatprep.subr.bf16.mxu0 %v3099_v9 }
 0x964   :  { %652 = vmatpush1.bf16.msra.mxu0 %v3102_v10 }
 0x965   :  { %1002 = vmatprep.subr.bf16.mxu0 %v3147_v53 }
 0xa2a   :  { %v522_v51 = vpop.f32.mrb[4].mxu0 }
 0xa2b   :  { %v523_v52 = vadd.f32 %v522_v51, %v3192_v13  ;;  %v524_v54 = vpop.f32.mrb[5].mxu0 }
 0xa2c   :  { %v525_v59 = vadd.f32 %v524_v54, %v3266_v50  ;;  %v526_v60 = vpop.f32.mrb[6].mxu0 }
 0xa2d   :  { %v527_v62 = vpop.f32.mrb[7].mxu0  ;;  %v537_v63 = vmul.f32 %v535_v55, %v523_v52  ;;  %v533_v16 = vmul.f32 %v531_v21, %v523_v52 }
 0xa2e   :  { %v580_v1 = vmul.f32 %v578_v61, %v525_v59  ;;  %v576_v15 = vmul.f32 %v574_v24, %v525_v59 }
 0xa2f   :  { %539 = vrot.lane.b32.xlu0 %v537_v63, %s3016_s17 }
 0xa30   :  { %582 = vrot.lane.b32.xlu1 %v580_v1, %s3016_s17 }
 0xa33   :  { %544 = vrot.lane.b32.xlu0 %v523_v52, %s3014_s15 }
 0xa37   :  { %587 = vrot.lane.b32.xlu0 %v525_v59, %s3014_s15 }
 0xaa1   :  { %v540_v12 = vpop.permute.xlu0 %539 }
 0xaa2   :  { %v542_v2 = vadd.f32 %v540_v12, %v533_v16  ;;  %v583_v11 = vpop.permute.xlu1 %582 }
 0xaa3   :  { %v585_v18 = vadd.f32 %v583_v11, %v576_v15 }
 0xaa5   :  { %v545_v14 = vpop.permute.xlu0 %544 }
 0xaa6   :  { %v547_v17 = vadd.f32 %v545_v14, %v542_v2 }
 0xaa8   :  { %2710 = vtanh.f32 %v547_v17  ;;  %v2547_v28 = vmul.f32 -1.442695, %v547_v17 }
 0xaa9   :  { %v588_v19 = vpop.permute.xlu0 %587 }
 0xaaa   :  { %v590_v20 = vadd.f32 %v588_v19, %v585_v18 }
 0xaac   :  { %2712 = vtanh.f32 %v590_v20  ;;  %v2548_v29 = vmul.f32 -1.442695, %v590_v20 }
 0xaad   :  { %2714 = vpow2.f32 %v2547_v28 }
 0xaae   :  { %2716 = vpow2.f32 %v2548_v29 }
 0xab2   :  { %v2711_v23 = vpop.eup %2710 }
 0xab3   :  { %557 = vrot.lane.b32.xlu1 %v2711_v23, %s3017_s3 }
 0xab6   :  { %v2713_v27 = vpop.eup %2712 }
 0xab7   :  { %604 = vrot.lane.b32.xlu0 %v2713_v27, %s3017_s3  ;;  %v2715_v30 = vpop.eup %2714 }
 0xab8   :  { %v551_v31 = vadd.f32 1.0, %v2715_v30  ;;  %v2717_v32 = vpop.eup %2716 }
 0xab9   :  { %v594_v33 = vadd.f32 1.0, %v2717_v32 }
 0xaba   :  { %2718 = vrcp.f32 %v551_v31 }
 0xabb   :  { %599 = vrot.lane.b32.xlu0 %v2525_v22, %s3013_s2  ;;  %2720 = vrcp.f32 %v594_v33 }
 0xac4   :  { %v2719_v34 = vpop.eup %2718 }
 0xac5   :  { %v2721_v39 = vpop.eup %2720  ;;  %v555_v49 = vmul.f32 %v2719_v34, %v3203_v43 }
 0xb25   :  { %v558_v35 = vpop.permute.xlu1 %557 }
 0xb26   :  { %v560_v37 = vmul.f32 %v2719_v34, %v558_v35 }
 0xb28   :  { %562 = vrot.lane.b32.xlu1 %v560_v37, %s3011_s29 }
 0xb29   :  { %v605_v40 = vpop.permute.xlu0 %604 }
 0xb2a   :  { %v607_v41 = vmul.f32 %v2721_v39, %v605_v40 }
 0xb2c   :  { %609 = vrot.lane.b32.xlu1 %v607_v41, %s3011_s29 }
 0xb2d   :  { %v600_v45 = vpop.permute.xlu0 %599 }
 0xb2e   :  { %v602_v48 = vmul.f32 %v2721_v39, %v600_v45 }
 0xb9a   :  { %v563_v46 = vpop.permute.xlu1 %562 }
 0xb9b   :  { %v3283_v47 = vadd.f32 %v563_v46, %v555_v49 }
 0xb9d   :  { %2722 = vtanh.f32 %v3283_v47 }
 0xb9e   :  { %v610_v51 = vpop.permute.xlu1 %609 }
 0xb9f   :  { %v3286_v52 = vadd.f32 %v610_v51, %v602_v48 }
 0xba1   :  { %2724 = vtanh.f32 %v3286_v52 }
 0xba7   :  { %v2723_v54 = vpop.eup %2722 }
 0xba8   :  { %568 = vrot.lane.b32.xlu0 %v2723_v54, %s3015_s16 }
 0xbab   :  { %v2725_v55 = vpop.eup %2724 }
 0xbac   :  { %615 = vrot.lane.b32.xlu1 %v2725_v55, %s3015_s16 }
 0xbb0   :  { %623 = vrot.lane.b32.xlu1 %v3240_v42, %s3016_s17  ;;  %v2517_v42 = vld [vmem:[%s3917_s0 + $0x4] sm:$0x3] }
 0xc1a   :  { %v569_v43 = vpop.permute.xlu0 %568 }
 0xc1b   :  { %v571_v59 = vmul.f32 %v2719_v34, %v569_v43 }
 0xc1d   :  { %620 = vrot.lane.b32.xlu0 %v571_v59, %s3018_s22 }
 0xc1e   :  { %v616_v60 = vpop.permute.xlu1 %615 }
 0xc1f   :  { %v3294_v61 = vmul.f32 %v2721_v39, %v616_v60 }
 0xc21   :  { %626 = vrot.lane.b32.xlu0 %v571_v59, %s3019_s23  ;;  %630 = vrot.lane.b32.xlu1 %v3294_v61, %s3017_s3 }
 0xc22   :  { %v624_v63 = vpop.permute.xlu1 %623 }
 0xc25   :  { %633 = vrot.lane.b32.xlu0 %v3242_v44, %s3020_s1 }
 0xc8f   :  { %v621_v62 = vpop.permute.xlu0 %620 }
 0xc90   :  { %v636_v1 = vsel %vm103_vm0, %v2517_v42, %v621_v62 }
 0xc91   :  { %v637_v24 = vsel %vm105_vm1, %v636_v1, %v624_v63 }
 0xc93   :  { %v627_v21 = vpop.permute.xlu0 %626  ;;  %v631_v16 = vpop.permute.xlu1 %630 }
 0xc94   :  { %v638_v12 = vsel %vm107_vm2, %v637_v24, %v627_v21 }
 0xc95   :  { %v639_v2 = vsel %vm109_vm3, %v638_v12, %v631_v16 }
 0xc97   :  { %v634_v11 = vpop.permute.xlu0 %633 }
 0xc98   :  { %v640_v14 = vsel %vm111_vm4, %v639_v2, %v634_v11 }
 0xc99   :  { %v641_v44 = vpack.c.bf16 %v640_v14, %v640_v14 }
 0xc9b   :  { %2549 = vmatmul.mubr.msk.bf16.vlgmr.msra.gmra.mrb[8].mxu0 %vm154_vm5, %v641_v44 }
 0xc9c   :  { %1003 = vmatpush1.bf16.msra.mxu0 %v3153_v56  ;;  %1034 = vmatprep.mubr.bf16.mxu0 %v3012_v0 }
 0xc9d   :  { %1004 = vmatprep.subr.bf16.mxu0 %v3155_v57 }
 0xca0   :  { %1005 = vmatpush1.bf16.msra.mxu0 %v3161_v58 }
 0xca1   :  { %1155 = vmatprep.subr.bf16.mxu0 %v3081_v3 }
 0xd6e   :  { %v679_v15 = vpop.f32.mrb[8].mxu0 }
 0xd6f   :  { %v680_v17 = vadd.f32 %v679_v15, %v3128_v25  ;;  %v681_v18 = vpop.f32.mrb[9].mxu0 }
 0xd70   :  { %v682_v19 = vadd.f32 %v681_v18, %v3132_v26  ;;  %v683_v20 = vpop.f32.mrb[10].mxu0 }
 0xd71   :  { %2726 = vtanh.f32 %v680_v17  ;;  %v684_v23 = vpop.f32.mrb[11].mxu0  ;;  %v2550_v28 = vmul.f32 -1.442695, %v680_v17 }
 0xd72   :  { %2728 = vtanh.f32 %v682_v19  ;;  %v2551_v29 = vmul.f32 -1.442695, %v682_v19 }
 0xd73   :  { %2730 = vpow2.f32 %v2550_v28 }
 0xd74   :  { %2732 = vpow2.f32 %v2551_v29 }
 0xd7b   :  { %v2727_v27 = vpop.eup %2726 }
 0xd7c   :  { %v2729_v22 = vpop.eup %2728  ;;  %695 = vrot.lane.b32.xlu1 %v2727_v27, %s3014_s15 }
 0xd7d   :  { %719 = vrot.lane.b32.xlu0 %v2729_v22, %s3014_s15  ;;  %v2731_v30 = vpop.eup %2730 }
 0xd7e   :  { %v2733_v31 = vpop.eup %2732  ;;  %v689_v32 = vadd.f32 1.0, %v2731_v30 }
 0xd7f   :  { %v713_v33 = vadd.f32 1.0, %v2733_v31 }
 0xd80   :  { %2734 = vrcp.f32 %v689_v32 }
 0xd81   :  { %2736 = vrcp.f32 %v713_v33 }
 0xd8a   :  { %v2735_v34 = vpop.eup %2734 }
 0xd8b   :  { %v2737_v37 = vpop.eup %2736  ;;  %v693_v49 = vmul.f32 %v2735_v34, %v3232_v36 }
 0xd8c   :  { %v717_v46 = vmul.f32 %v2737_v37, %v3234_v38 }
 0xdee   :  { %v696_v35 = vpop.permute.xlu1 %695 }
 0xdef   :  { %v698_v39 = vmul.f32 %v2735_v34, %v696_v35  ;;  %v720_v40 = vpop.permute.xlu0 %719 }
 0xdf0   :  { %v722_v41 = vmul.f32 %v2737_v37, %v720_v40 }
 0xdf1   :  { %700 = vrot.lane.b32.xlu1 %v698_v39, %s3015_s16 }
 0xdf2   :  { %724 = vrot.lane.b32.xlu0 %v722_v41, %s3015_s16 }
 0xe63   :  { %v701_v45 = vpop.permute.xlu1 %700 }
 0xe64   :  { %v3323_v48 = vadd.f32 %v701_v45, %v693_v49  ;;  %v725_v51 = vpop.permute.xlu0 %724 }
 0xe65   :  { %v3325_v54 = vadd.f32 %v725_v51, %v717_v46 }
 0xe66   :  { %2738 = vtanh.f32 %v3323_v48 }
 0xe67   :  { %2740 = vtanh.f32 %v3325_v54 }
 0xe70   :  { %v2739_v55 = vpop.eup %2738 }
 0xe71   :  { %v2741_v43 = vpop.eup %2740  ;;  %706 = vrot.lane.b32.xlu1 %v2739_v55, %s3016_s17 }
 0xe72   :  { %730 = vrot.lane.b32.xlu0 %v2741_v43, %s3016_s17 }
 0xee3   :  { %v707_v59 = vpop.permute.xlu1 %706 }
 0xee4   :  { %v3331_v36 = vmul.f32 %v2735_v34, %v707_v59  ;;  %v731_v60 = vpop.permute.xlu0 %730 }
 0xee5   :  { %v3333_v38 = vmul.f32 %v2737_v37, %v731_v60 }
 0xee6   :  { %735 = vrot.lane.b32.xlu1 %v3331_v36, %s3015_s16 }
 0xee7   :  { %739 = vrot.lane.b32.xlu0 %v3333_v38, %s3016_s17 }
 0xeea   :  { %793 = vrot.lane.b32.xlu1 %v680_v17, %s3014_s15 }
 0xeeb   :  { %836 = vrot.lane.b32.xlu0 %v682_v19, %s3014_s15 }
 0xeee   :  { %789 = vrot.lane.b32.xlu1 %v680_v17, %s3016_s17 }
 0xef2   :  { %832 = vrot.lane.b32.xlu1 %v682_v19, %s3016_s17 }
 0xf58   :  { %v736_v42 = vpop.permute.xlu1 %735 }
 0xf59   :  { %v740_v62 = vpop.permute.xlu0 %739 }
 0xf5a   :  { %v742_v63 = vsel %vm105_vm1, %v736_v42, %v740_v62 }
 0xf5b   :  { %v743_v1 = vpack.c.bf16 %v742_v63, %v742_v63 }
 0xf5c   :  { %v794_v12 = vpop.permute.xlu1 %793 }
 0xf5d   :  { %2552 = vmatmul.mubr.msk.bf16.vlgmr.msra.gmra.mrb[8].mxu1 %vm107_vm2, %v743_v1  ;;  %v837_v2 = vpop.permute.xlu0 %836  ;;  %v2518_v1 = vld [vmem:[%s3917_s0 + $0x6] sm:$0x3] }
 0xf5e   :  { %901 = vmatpush1.bf16.msra.mxu1 %v3083_v4  ;;  %932 = vmatprep.mubr.bf16.mxu1 %v3012_v0 }
 0xf5f   :  { %902 = vmatprep.subr.bf16.mxu1 %v3085_v5 }
 0xf62   :  { %903 = vmatpush1.bf16.msra.mxu1 %v3089_v6 }
 0xf63   :  { %904 = vmatprep.subr.bf16.mxu1 %v3093_v7 }
 0xf66   :  { %905 = vmatpush1.bf16.msra.mxu1 %v3096_v8  ;;  %v790_v8 = vpop.permute.xlu1 %789 }
 0xf67   :  { %906 = vmatprep.subr.bf16.mxu1 %v3099_v9 }
 0xf6a   :  { %907 = vmatpush1.bf16.msra.mxu1 %v3102_v10  ;;  %v833_v9 = vpop.permute.xlu1 %832 }
 0xf6b   :  { %1257 = vmatprep.subr.bf16.mxu1 %v3147_v53 }
0x1030   :  { %v781_v21 = vpop.f32.mrb[8].mxu1 }
0x1031   :  { %v782_v24 = vadd.f32 %v781_v21, %v3192_v13  ;;  %v783_v4 = vpop.f32.mrb[9].mxu1 }
0x1032   :  { %v784_v16 = vadd.f32 %v783_v4, %v3266_v50  ;;  %v785_v5 = vpop.f32.mrb[10].mxu1 }
0x1033   :  { %v786_v6 = vpop.f32.mrb[11].mxu1  ;;  %v796_v11 = vmul.f32 %v794_v12, %v782_v24  ;;  %v792_v14 = vmul.f32 %v790_v8, %v782_v24 }
0x1034   :  { %v839_v7 = vmul.f32 %v837_v2, %v784_v16  ;;  %v835_v18 = vmul.f32 %v833_v9, %v784_v16 }
0x1035   :  { %798 = vrot.lane.b32.xlu0 %v796_v11, %s3016_s17 }
0x1036   :  { %841 = vrot.lane.b32.xlu1 %v839_v7, %s3016_s17 }
0x1039   :  { %803 = vrot.lane.b32.xlu0 %v782_v24, %s3014_s15 }
0x103d   :  { %846 = vrot.lane.b32.xlu0 %v784_v16, %s3014_s15 }
0x10a7   :  { %v799_v10 = vpop.permute.xlu0 %798 }
0x10a8   :  { %v801_v44 = vadd.f32 %v799_v10, %v792_v14  ;;  %v842_v15 = vpop.permute.xlu1 %841 }
0x10a9   :  { %v844_v20 = vadd.f32 %v842_v15, %v835_v18 }
0x10ab   :  { %v804_v17 = vpop.permute.xlu0 %803 }
0x10ac   :  { %v806_v19 = vadd.f32 %v804_v17, %v801_v44 }
0x10ae   :  { %2742 = vtanh.f32 %v806_v19  ;;  %v2553_v29 = vmul.f32 -1.442695, %v806_v19 }
0x10af   :  { %v847_v23 = vpop.permute.xlu0 %846 }
0x10b0   :  { %v849_v27 = vadd.f32 %v847_v23, %v844_v20 }
0x10b2   :  { %2744 = vtanh.f32 %v849_v27  ;;  %v2554_v30 = vmul.f32 -1.442695, %v849_v27 }
0x10b3   :  { %2746 = vpow2.f32 %v2553_v29 }
0x10b4   :  { %2748 = vpow2.f32 %v2554_v30 }
0x10b8   :  { %v2743_v22 = vpop.eup %2742 }
0x10b9   :  { %816 = vrot.lane.b32.xlu1 %v2743_v22, %s3017_s3 }
0x10bc   :  { %v2745_v28 = vpop.eup %2744 }
0x10bd   :  { %859 = vrot.lane.b32.xlu0 %v2745_v28, %s3017_s3  ;;  %v2747_v31 = vpop.eup %2746 }
0x10be   :  { %v810_v32 = vadd.f32 1.0, %v2747_v31  ;;  %v2749_v33 = vpop.eup %2748 }
0x10bf   :  { %v853_v34 = vadd.f32 1.0, %v2749_v33 }
0x10c0   :  { %2750 = vrcp.f32 %v810_v32 }
0x10c1   :  { %2752 = vrcp.f32 %v853_v34 }
0x10ca   :  { %v2751_v35 = vpop.eup %2750 }
0x10cb   :  { %v2753_v40 = vpop.eup %2752  ;;  %v814_v45 = vmul.f32 %v2751_v35, %v3283_v47 }
0x10cc   :  { %v857_v55 = vmul.f32 %v2753_v40, %v3286_v52 }
0x112b   :  { %v817_v37 = vpop.permute.xlu1 %816 }
0x112c   :  { %v819_v39 = vmul.f32 %v2751_v35, %v817_v37 }
0x112e   :  { %821 = vrot.lane.b32.xlu1 %v819_v39, %s3011_s29 }
0x112f   :  { %v860_v41 = vpop.permute.xlu0 %859 }
0x1130   :  { %v862_v49 = vmul.f32 %v2753_v40, %v860_v41 }
0x1132   :  { %864 = vrot.lane.b32.xlu0 %v862_v49, %s3011_s29 }
0x11a0   :  { %v822_v46 = vpop.permute.xlu1 %821 }
0x11a1   :  { %v3365_v51 = vadd.f32 %v822_v46, %v814_v45 }
0x11a3   :  { %2754 = vtanh.f32 %v3365_v51 }
0x11a4   :  { %v865_v43 = vpop.permute.xlu0 %864 }
0x11a5   :  { %v3369_v59 = vadd.f32 %v865_v43, %v857_v55  ;;  %v3428_v43 = vld [vmem:[#allocation2] ss:$8 sps:$4 sm:$0xff]  }
0x11a7   :  { %2756 = vtanh.f32 %v3369_v59 }
0x11ad   :  { %v2755_v60 = vpop.eup %2754 }
0x11ae   :  { %827 = vrot.lane.b32.xlu1 %v2755_v60, %s3015_s16  ;;  %v3432_v60 = vld [vmem:[#allocation2 + $0x14] ss:$8 sps:$4 sm:$0xff]  }
0x11b1   :  { %v2757_v42 = vpop.eup %2756 }
0x11b2   :  { %870 = vrot.lane.b32.xlu0 %v2757_v42, %s3015_s16  ;;  %v3435_v42 = vld [vmem:[#allocation2 + $0x10] ss:$8 sps:$4 sm:$0xff]  }
0x11b6   :  { %878 = vrot.lane.b32.xlu0 %v3331_v36, %s3016_s17 }
0x1220   :  { %v828_v47 = vpop.permute.xlu1 %827 }
0x1221   :  { %v830_v62 = vmul.f32 %v2751_v35, %v828_v47  ;;  %v3438_v47 = vld [vmem:[#allocation2 + $0x24] ss:$8 sps:$4 sm:$0xff]  }
0x1223   :  { %875 = vrot.lane.b32.xlu1 %v830_v62, %s3018_s22 }
0x1224   :  { %v871_v63 = vpop.permute.xlu0 %870 }
0x1225   :  { %v3377_v52 = vmul.f32 %v2753_v40, %v871_v63  ;;  %v3444_v63 = vld [vmem:[#allocation2 + $0x34] ss:$8 sps:$4 sm:$0xff]  }
0x1227   :  { %885 = vrot.lane.b32.xlu0 %v3377_v52, %s3017_s3  ;;  %881 = vrot.lane.b32.xlu1 %v830_v62, %s3019_s23  ;;  %v3441_v62 = vld [vmem:[#allocation2 + $0x20] ss:$8 sps:$4 sm:$0xff]  }
0x1228   :  { %v879_v21 = vpop.permute.xlu0 %878 }
0x122b   :  { %888 = vrot.lane.b32.xlu1 %v3333_v38, %s3020_s1 }
0x1295   :  { %v876_v36 = vpop.permute.xlu1 %875 }
0x1296   :  { %v891_v24 = vsel %vm103_vm0, %v2518_v1, %v876_v36  ;;  %v3447_v1 = vld [vmem:[#allocation2 + $0x30] ss:$8 sps:$4 sm:$0xff]  }
0x1297   :  { %v892_v4 = vsel %vm105_vm1, %v891_v24, %v879_v21 }
0x1299   :  { %v882_v12 = vpop.permute.xlu1 %881  ;;  %v886_v16 = vpop.permute.xlu0 %885 }
0x129a   :  { %v893_v5 = vsel %vm107_vm2, %v892_v4, %v882_v12 }
0x129b   :  { %v894_v2 = vsel %vm109_vm3, %v893_v5, %v886_v16 }
0x129d   :  { %v889_v6 = vpop.permute.xlu1 %888 }
0x129e   :  { %v895_v11 = vsel %vm111_vm4, %v894_v2, %v889_v6 }
0x129f   :  { %v896_v38 = vpack.c.bf16 %v895_v11, %v895_v11 }
0x12a1   :  { %2555 = vmatmul.mubr.msk.bf16.vlgmr.msra.gmra.mrb[12].mxu1 %vm154_vm5, %v896_v38 }
0x12a2   :  { %1258 = vmatpush1.bf16.msra.mxu1 %v3153_v56  ;;  %1289 = vmatprep.mubr.bf16.mxu1 %v3012_v0 }
0x12a3   :  { %1259 = vmatprep.subr.bf16.mxu1 %v3155_v57 }
0x12a6   :  { %1260 = vmatpush1.bf16.msra.mxu1 %v3161_v58 }
0x12a7   :  { %1410 = vmatprep.subr.bf16.mxu1 %v3081_v3 }
0x1374   :  { %v934_v7 = vpop.f32.mrb[12].mxu1 }
0x1375   :  { %v935_v8 = vadd.f32 %v934_v7, %v3128_v25  ;;  %v936_v9 = vpop.f32.mrb[13].mxu1 }
0x1376   :  { %v937_v10 = vadd.f32 %v936_v9, %v3132_v26  ;;  %v938_v14 = vpop.f32.mrb[14].mxu1 }
0x1377   :  { %2758 = vtanh.f32 %v935_v8  ;;  %v939_v44 = vpop.f32.mrb[15].mxu1  ;;  %v2556_v57 = vmul.f32 -1.442695, %v935_v8 }
0x1378   :  { %2760 = vtanh.f32 %v937_v10  ;;  %v2557_v58 = vmul.f32 -1.442695, %v937_v10 }
0x1379   :  { %2762 = vpow2.f32 %v2556_v57 }
0x137a   :  { %2764 = vpow2.f32 %v2557_v58 }
0x1381   :  { %v2759_v15 = vpop.eup %2758 }
0x1382   :  { %v2761_v56 = vpop.eup %2760  ;;  %950 = vrot.lane.b32.xlu0 %v2759_v15, %s3014_s15 }
0x1383   :  { %974 = vrot.lane.b32.xlu1 %v2761_v56, %s3014_s15  ;;  %v2763_v3 = vpop.eup %2762 }
0x1384   :  { %v2765_v17 = vpop.eup %2764  ;;  %v944_v18 = vadd.f32 1.0, %v2763_v3 }
0x1385   :  { %v968_v19 = vadd.f32 1.0, %v2765_v17 }
0x1386   :  { %2766 = vrcp.f32 %v944_v18 }
0x1387   :  { %2768 = vrcp.f32 %v968_v19 }
0x1390   :  { %v2767_v20 = vpop.eup %2766 }
0x1391   :  { %v2769_v27 = vpop.eup %2768  ;;  %v948_v30 = vmul.f32 %v2767_v20, %v3323_v48 }
0x1392   :  { %v972_v32 = vmul.f32 %v2769_v27, %v3325_v54 }
0x13f4   :  { %v951_v23 = vpop.permute.xlu0 %950 }
0x13f5   :  { %v953_v22 = vmul.f32 %v2767_v20, %v951_v23  ;;  %v975_v28 = vpop.permute.xlu1 %974 }
0x13f6   :  { %v977_v29 = vmul.f32 %v2769_v27, %v975_v28 }
0x13f7   :  { %955 = vrot.lane.b32.xlu0 %v953_v22, %s3015_s16 }
0x13f8   :  { %979 = vrot.lane.b32.xlu1 %v977_v29, %s3015_s16 }
0x1469   :  { %v956_v31 = vpop.permute.xlu0 %955 }
0x146a   :  { %v3406_v33 = vadd.f32 %v956_v31, %v948_v30  ;;  %v980_v34 = vpop.permute.xlu1 %979 }
0x146b   :  { %v3408_v35 = vadd.f32 %v980_v34, %v972_v32 }
0x146c   :  { %2770 = vtanh.f32 %v3406_v33 }
0x146d   :  { %2772 = vtanh.f32 %v3408_v35 }
0x1476   :  { %v2771_v37 = vpop.eup %2770 }
0x1477   :  { %v2773_v39 = vpop.eup %2772  ;;  %961 = vrot.lane.b32.xlu0 %v2771_v37, %s3016_s17 }
0x1478   :  { %985 = vrot.lane.b32.xlu1 %v2773_v39, %s3016_s17 }
0x14e9   :  { %v962_v40 = vpop.permute.xlu0 %961 }
0x14ea   :  { %v3414_v48 = vmul.f32 %v2767_v20, %v962_v40  ;;  %v986_v41 = vpop.permute.xlu1 %985 }
0x14eb   :  { %v3416_v54 = vmul.f32 %v2769_v27, %v986_v41 }
0x14ec   :  { %990 = vrot.lane.b32.xlu0 %v3414_v48, %s3015_s16 }
0x14ed   :  { %994 = vrot.lane.b32.xlu1 %v3416_v54, %s3016_s17 }
0x14f0   :  { %1048 = vrot.lane.b32.xlu0 %v935_v8, %s3014_s15 }
0x14f1   :  { %1091 = vrot.lane.b32.xlu1 %v937_v10, %s3014_s15 }
0x14f4   :  { %1044 = vrot.lane.b32.xlu0 %v935_v8, %s3016_s17 }
0x14f8   :  { %1087 = vrot.lane.b32.xlu0 %v937_v10, %s3016_s17 }
0x155e   :  { %v991_v49 = vpop.permute.xlu0 %990 }
0x155f   :  { %v995_v45 = vpop.permute.xlu1 %994 }
0x1560   :  { %v997_v46 = vsel %vm105_vm1, %v991_v49, %v995_v45 }
0x1561   :  { %v998_v55 = vpack.c.bf16 %v997_v46, %v997_v46 }
0x1562   :  { %v1049_v4 = vpop.permute.xlu0 %1048 }
0x1563   :  { %2558 = vmatmul.mubr.msk.bf16.vlgmr.msra.gmra.mrb[12].mxu0 %vm107_vm2, %v998_v55  ;;  %v1092_v5 = vpop.permute.xlu1 %1091 }
0x1564   :  { %1156 = vmatpush1.bf16.msra.mxu0 %v3428_v43  ;;  %1187 = vmatprep.mubr.bf16.mxu0 %v3012_v0 }
0x1565   :  { %1157 = vmatprep.subr.bf16.mxu0 %v3432_v60 }
0x1568   :  { %1158 = vmatpush1.bf16.msra.mxu0 %v3435_v42 }
0x1569   :  { %1159 = vmatprep.subr.bf16.mxu0 %v3438_v47 }
0x156c   :  { %1160 = vmatpush1.bf16.msra.mxu0 %v3441_v62 }
0x156d   :  { %1161 = vmatprep.subr.bf16.mxu0 %v3444_v63 }
0x1570   :  { %1162 = vmatpush1.bf16.msra.mxu0 %v3447_v1 }
0x1571   :  { %1512 = vmatprep.subr.bf16.mxu0 %v3147_v53  ;;  %v1045_v53 = vpop.permute.xlu0 %1044 }
0x1575   :  { %v1088_v38 = vpop.permute.xlu0 %1087 }
0x1636   :  { %v1036_v36 = vpop.f32.mrb[12].mxu0 }
0x1637   :  { %v1037_v21 = vadd.f32 %v1036_v36, %v3192_v13  ;;  %v1038_v24 = vpop.f32.mrb[13].mxu0 }
0x1638   :  { %v1039_v12 = vadd.f32 %v1038_v24, %v3266_v50  ;;  %v1040_v16 = vpop.f32.mrb[14].mxu0  ;;  %v2519_v24 = vld [vmem:[%s3917_s0 + $0x8] sm:$0x3] }
0x1639   :  { %v1041_v2 = vpop.f32.mrb[15].mxu0  ;;  %v1051_v6 = vmul.f32 %v1049_v4, %v1037_v21  ;;  %v1047_v8 = vmul.f32 %v1045_v53, %v1037_v21 }
0x163a   :  { %v1094_v11 = vmul.f32 %v1092_v5, %v1039_v12  ;;  %v1090_v44 = vmul.f32 %v1088_v38, %v1039_v12 }
0x163b   :  { %1053 = vrot.lane.b32.xlu1 %v1051_v6, %s3016_s17 }
0x163c   :  { %1096 = vrot.lane.b32.xlu0 %v1094_v11, %s3016_s17 }
0x163f   :  { %1058 = vrot.lane.b32.xlu1 %v1037_v21, %s3014_s15 }
0x1643   :  { %1101 = vrot.lane.b32.xlu1 %v1039_v12, %s3014_s15 }
0x16ad   :  { %v1054_v7 = vpop.permute.xlu1 %1053 }
0x16ae   :  { %v1056_v9 = vadd.f32 %v1054_v7, %v1047_v8  ;;  %v1097_v10 = vpop.permute.xlu0 %1096  ;;  %v3490_v7 = vld [vmem:[#allocation2 + $0x40] ss:$8 sps:$4 sm:$0xff]   ;;  %v3494_v8 = vld [vmem:[#allocation2 + $0x54] ss:$8 sps:$4 sm:$0xff]  }
0x16af   :  { %v1099_v56 = vadd.f32 %v1097_v10, %v1090_v44  ;;  %v3500_v10 = vld [vmem:[#allocation2 + $0x4] ss:$8 sps:$4 sm:$0xff]  }
0x16b1   :  { %v1059_v14 = vpop.permute.xlu1 %1058 }
0x16b2   :  { %v1061_v15 = vadd.f32 %v1059_v14, %v1056_v9  ;;  %v3497_v9 = vld [vmem:[#allocation2 + $0x50] ss:$8 sps:$4 sm:$0xff]  }
0x16b4   :  { %2774 = vtanh.f32 %v1061_v15  ;;  %v2559_v18 = vmul.f32 -1.442695, %v1061_v15 }
0x16b5   :  { %v1102_v57 = vpop.permute.xlu1 %1101 }
0x16b6   :  { %v1104_v58 = vadd.f32 %v1102_v57, %v1099_v56 }
0x16b8   :  { %2776 = vtanh.f32 %v1104_v58  ;;  %v2560_v19 = vmul.f32 -1.442695, %v1104_v58 }
0x16b9   :  { %2778 = vpow2.f32 %v2559_v18 }
0x16ba   :  { %2780 = vpow2.f32 %v2560_v19 }
0x16be   :  { %v2775_v3 = vpop.eup %2774 }
0x16bf   :  { %1071 = vrot.lane.b32.xlu0 %v2775_v3, %s3017_s3 }
0x16c2   :  { %v2777_v17 = vpop.eup %2776 }
0x16c3   :  { %1114 = vrot.lane.b32.xlu1 %v2777_v17, %s3017_s3  ;;  %v2779_v20 = vpop.eup %2778 }
0x16c4   :  { %v1065_v23 = vadd.f32 1.0, %v2779_v20  ;;  %v2781_v27 = vpop.eup %2780 }
0x16c5   :  { %v1108_v22 = vadd.f32 1.0, %v2781_v27 }
0x16c6   :  { %2782 = vrcp.f32 %v1065_v23 }
0x16c7   :  { %2784 = vrcp.f32 %v1108_v22 }
0x16d0   :  { %v2783_v28 = vpop.eup %2782 }
0x16d1   :  { %v2785_v31 = vpop.eup %2784  ;;  %v1069_v37 = vmul.f32 %v2783_v28, %v3365_v51 }
0x16d2   :  { %v1112_v41 = vmul.f32 %v2785_v31, %v3369_v59 }
0x1731   :  { %v1072_v29 = vpop.permute.xlu0 %1071 }
0x1732   :  { %v1074_v30 = vmul.f32 %v2783_v28, %v1072_v29 }
0x1734   :  { %1076 = vrot.lane.b32.xlu0 %v1074_v30, %s3011_s29 }
0x1735   :  { %v1115_v32 = vpop.permute.xlu1 %1114 }
0x1736   :  { %v1117_v34 = vmul.f32 %v2785_v31, %v1115_v32 }
0x1738   :  { %1119 = vrot.lane.b32.xlu1 %v1117_v34, %s3011_s29 }
0x17a6   :  { %v1077_v39 = vpop.permute.xlu0 %1076 }
0x17a7   :  { %v3462_v40 = vadd.f32 %v1077_v39, %v1069_v37 }
0x17a9   :  { %2786 = vtanh.f32 %v3462_v40 }
0x17aa   :  { %v1120_v49 = vpop.permute.xlu1 %1119 }
0x17ab   :  { %v3466_v45 = vadd.f32 %v1120_v49, %v1112_v41 }
0x17ad   :  { %2788 = vtanh.f32 %v3466_v45 }
0x17b3   :  { %v2787_v46 = vpop.eup %2786 }
0x17b4   :  { %1082 = vrot.lane.b32.xlu0 %v2787_v46, %s3015_s16 }
0x17b7   :  { %v2789_v55 = vpop.eup %2788 }
0x17b8   :  { %1125 = vrot.lane.b32.xlu1 %v2789_v55, %s3015_s16 }
0x17bc   :  { %1133 = vrot.lane.b32.xlu1 %v3414_v48, %s3016_s17 }
0x1826   :  { %v1083_v51 = vpop.permute.xlu0 %1082 }
0x1827   :  { %v1085_v36 = vmul.f32 %v2783_v28, %v1083_v51 }
0x1829   :  { %1130 = vrot.lane.b32.xlu0 %v1085_v36, %s3018_s22 }
0x182a   :  { %v1126_v21 = vpop.permute.xlu1 %1125 }
0x182b   :  { %v3474_v59 = vmul.f32 %v2785_v31, %v1126_v21 }
0x182d   :  { %1140 = vrot.lane.b32.xlu1 %v3474_v59, %s3017_s3  ;;  %1136 = vrot.lane.b32.xlu0 %v1085_v36, %s3019_s23 }
0x182e   :  { %v1134_v4 = vpop.permute.xlu1 %1133 }
0x1831   :  { %1143 = vrot.lane.b32.xlu0 %v3416_v54, %s3020_s1 }
0x189b   :  { %v1131_v48 = vpop.permute.xlu0 %1130 }
0x189c   :  { %v1146_v12 = vsel %vm103_vm0, %v2519_v24, %v1131_v48 }
0x189d   :  { %v1147_v16 = vsel %vm105_vm1, %v1146_v12, %v1134_v4 }
0x189f   :  { %v1137_v5 = vpop.permute.xlu0 %1136  ;;  %v1141_v2 = vpop.permute.xlu1 %1140 }
0x18a0   :  { %v1148_v6 = vsel %vm107_vm2, %v1147_v16, %v1137_v5  ;;  %v3541_v5 = vld [vmem:[#allocation2 + $0x44] ss:$8 sps:$4 sm:$0xff]  }
0x18a1   :  { %v1149_v11 = vsel %vm109_vm3, %v1148_v6, %v1141_v2 }
0x18a3   :  { %v1144_v53 = vpop.permute.xlu0 %1143 }
0x18a4   :  { %v1150_v38 = vsel %vm111_vm4, %v1149_v11, %v1144_v53 }
0x18a5   :  { %v1151_v54 = vpack.c.bf16 %v1150_v38, %v1150_v38 }
0x18a7   :  { %2561 = vmatmul.mubr.msk.bf16.vlgmr.msra.gmra.mrb[16].mxu0 %vm154_vm5, %v1151_v54 }
0x18a8   :  { %1513 = vmatpush1.bf16.msra.mxu0 %v3490_v7  ;;  %1544 = vmatprep.mubr.bf16.mxu0 %v3012_v0 }
0x18a9   :  { %1514 = vmatprep.subr.bf16.mxu0 %v3494_v8 }
0x18ac   :  { %1515 = vmatpush1.bf16.msra.mxu0 %v3497_v9 }
0x18ad   :  { %1665 = vmatprep.subr.bf16.mxu0 %v3500_v10 }
0x197a   :  { %v1189_v14 = vpop.f32.mrb[16].mxu0 }
0x197b   :  { %v1190_v44 = vadd.f32 %v1189_v14, %v3128_v25  ;;  %v1191_v15 = vpop.f32.mrb[17].mxu0 }
0x197c   :  { %v1192_v56 = vadd.f32 %v1191_v15, %v3132_v26  ;;  %v1193_v57 = vpop.f32.mrb[18].mxu0 }
0x197d   :  { %2790 = vtanh.f32 %v1190_v44  ;;  %v1194_v58 = vpop.f32.mrb[19].mxu0  ;;  %v2562_v18 = vmul.f32 -1.442695, %v1190_v44 }
0x197e   :  { %2792 = vtanh.f32 %v1192_v56  ;;  %v2563_v19 = vmul.f32 -1.442695, %v1192_v56 }
0x197f   :  { %2794 = vpow2.f32 %v2562_v18 }
0x1980   :  { %2796 = vpow2.f32 %v2563_v19 }
0x1987   :  { %v2791_v3 = vpop.eup %2790 }
0x1988   :  { %v2793_v17 = vpop.eup %2792  ;;  %1205 = vrot.lane.b32.xlu1 %v2791_v3, %s3014_s15 }
0x1989   :  { %1229 = vrot.lane.b32.xlu0 %v2793_v17, %s3014_s15  ;;  %v2795_v20 = vpop.eup %2794 }
0x198a   :  { %v2797_v23 = vpop.eup %2796  ;;  %v1199_v27 = vadd.f32 1.0, %v2795_v20 }
0x198b   :  { %v1223_v22 = vadd.f32 1.0, %v2797_v23 }
0x198c   :  { %2798 = vrcp.f32 %v1199_v27 }
0x198d   :  { %2800 = vrcp.f32 %v1223_v22 }
0x1996   :  { %v2799_v28 = vpop.eup %2798 }
0x1997   :  { %v2801_v30 = vpop.eup %2800  ;;  %v1203_v37 = vmul.f32 %v2799_v28, %v3406_v33 }
0x1998   :  { %v1227_v41 = vmul.f32 %v2801_v30, %v3408_v35 }
0x19fa   :  { %v1206_v29 = vpop.permute.xlu1 %1205 }
0x19fb   :  { %v1208_v31 = vmul.f32 %v2799_v28, %v1206_v29  ;;  %v1230_v32 = vpop.permute.xlu0 %1229 }
0x19fc   :  { %v1232_v34 = vmul.f32 %v2801_v30, %v1230_v32 }
0x19fd   :  { %1210 = vrot.lane.b32.xlu1 %v1208_v31, %s3015_s16 }
0x19fe   :  { %1234 = vrot.lane.b32.xlu0 %v1232_v34, %s3015_s16 }
0x1a6f   :  { %v1211_v39 = vpop.permute.xlu1 %1210 }
0x1a70   :  { %v3511_v49 = vadd.f32 %v1211_v39, %v1203_v37  ;;  %v1235_v46 = vpop.permute.xlu0 %1234 }
0x1a71   :  { %v3513_v55 = vadd.f32 %v1235_v46, %v1227_v41 }
0x1a72   :  { %2802 = vtanh.f32 %v3511_v49 }
0x1a73   :  { %2804 = vtanh.f32 %v3513_v55 }
0x1a7c   :  { %v2803_v51 = vpop.eup %2802 }
0x1a7d   :  { %v2805_v36 = vpop.eup %2804  ;;  %1216 = vrot.lane.b32.xlu1 %v2803_v51, %s3016_s17 }
0x1a7e   :  { %1240 = vrot.lane.b32.xlu0 %v2805_v36, %s3016_s17 }
0x1aef   :  { %v1217_v21 = vpop.permute.xlu1 %1216 }
0x1af0   :  { %v3519_v33 = vmul.f32 %v2799_v28, %v1217_v21  ;;  %v1241_v24 = vpop.permute.xlu0 %1240 }
0x1af1   :  { %v3521_v35 = vmul.f32 %v2801_v30, %v1241_v24 }
0x1af2   :  { %1245 = vrot.lane.b32.xlu1 %v3519_v33, %s3015_s16 }
0x1af3   :  { %1249 = vrot.lane.b32.xlu0 %v3521_v35, %s3016_s17 }
0x1af6   :  { %1303 = vrot.lane.b32.xlu1 %v1190_v44, %s3014_s15 }
0x1af7   :  { %1346 = vrot.lane.b32.xlu0 %v1192_v56, %s3014_s15 }
0x1afa   :  { %1299 = vrot.lane.b32.xlu1 %v1190_v44, %s3016_s17 }
0x1afe   :  { %1342 = vrot.lane.b32.xlu1 %v1192_v56, %s3016_s17 }
0x1b64   :  { %v1246_v48 = vpop.permute.xlu1 %1245 }
0x1b65   :  { %v1250_v4 = vpop.permute.xlu0 %1249 }
0x1b66   :  { %v1252_v12 = vsel %vm105_vm1, %v1246_v48, %v1250_v4 }
0x1b67   :  { %v1253_v16 = vpack.c.bf16 %v1252_v12, %v1252_v12 }
0x1b68   :  { %v1304_v53 = vpop.permute.xlu1 %1303 }
0x1b69   :  { %2564 = vmatmul.mubr.msk.bf16.vlgmr.msra.gmra.mrb[16].mxu1 %vm107_vm2, %v1253_v16  ;;  %v1347_v14 = vpop.permute.xlu0 %1346 }
0x1b6a   :  { %1411 = vmatpush1.bf16.msra.mxu1 %v3428_v43  ;;  %1442 = vmatprep.mubr.bf16.mxu1 %v3012_v0 }
0x1b6b   :  { %1412 = vmatprep.subr.bf16.mxu1 %v3432_v60 }
0x1b6c   :  { %v1300_v57 = vpop.permute.xlu1 %1299 }
0x1b6e   :  { %1413 = vmatpush1.bf16.msra.mxu1 %v3435_v42 }
0x1b6f   :  { %1414 = vmatprep.subr.bf16.mxu1 %v3438_v47 }
0x1b70   :  { %v1343_v58 = vpop.permute.xlu1 %1342 }
0x1b72   :  { %1415 = vmatpush1.bf16.msra.mxu1 %v3441_v62 }
0x1b73   :  { %1416 = vmatprep.subr.bf16.mxu1 %v3444_v63 }
0x1b76   :  { %1417 = vmatpush1.bf16.msra.mxu1 %v3447_v1 }
0x1b77   :  { %1767 = vmatprep.subr.bf16.mxu1 %v3541_v5 }
0x1c3c   :  { %v1291_v2 = vpop.f32.mrb[16].mxu1 }
0x1c3d   :  { %v1292_v6 = vadd.f32 %v1291_v2, %v3192_v13  ;;  %v1293_v11 = vpop.f32.mrb[17].mxu1 }
0x1c3e   :  { %v1294_v38 = vadd.f32 %v1293_v11, %v3266_v50  ;;  %v1295_v54 = vpop.f32.mrb[18].mxu1 }
0x1c3f   :  { %v1306_v44 = vmul.f32 %v1304_v53, %v1292_v6  ;;  %v1296_v15 = vpop.f32.mrb[19].mxu1  ;;  %v1302_v17 = vmul.f32 %v1300_v57, %v1292_v6 }
0x1c40   :  { %v1349_v56 = vmul.f32 %v1347_v14, %v1294_v38  ;;  %v1345_v23 = vmul.f32 %v1343_v58, %v1294_v38  ;;  %v2520_v15 = vld [vmem:[%s3917_s0 + $0xa] sm:$0x3] }
0x1c41   :  { %1308 = vrot.lane.b32.xlu0 %v1306_v44, %s3016_s17 }
0x1c42   :  { %1351 = vrot.lane.b32.xlu1 %v1349_v56, %s3016_s17 }
0x1c45   :  { %1313 = vrot.lane.b32.xlu0 %v1292_v6, %s3014_s15 }
0x1c49   :  { %1356 = vrot.lane.b32.xlu0 %v1294_v38, %s3014_s15 }
0x1cb3   :  { %v1309_v3 = vpop.permute.xlu0 %1308 }
0x1cb4   :  { %v1311_v18 = vadd.f32 %v1309_v3, %v1302_v17  ;;  %v1352_v19 = vpop.permute.xlu1 %1351 }
0x1cb5   :  { %v1354_v22 = vadd.f32 %v1352_v19, %v1345_v23 }
0x1cb7   :  { %v1314_v20 = vpop.permute.xlu0 %1313 }
0x1cb8   :  { %v1316_v27 = vadd.f32 %v1314_v20, %v1311_v18 }
0x1cba   :  { %2806 = vtanh.f32 %v1316_v27  ;;  %v2565_v32 = vmul.f32 -1.442695, %v1316_v27 }
0x1cbb   :  { %v1357_v28 = vpop.permute.xlu0 %1356 }
0x1cbc   :  { %v1359_v29 = vadd.f32 %v1357_v28, %v1354_v22 }
0x1cbe   :  { %2808 = vtanh.f32 %v1359_v29  ;;  %v2566_v34 = vmul.f32 -1.442695, %v1359_v29 }
0x1cbf   :  { %2810 = vpow2.f32 %v2565_v32 }
0x1cc0   :  { %2812 = vpow2.f32 %v2566_v34 }
0x1cc4   :  { %v2807_v30 = vpop.eup %2806 }
0x1cc5   :  { %1326 = vrot.lane.b32.xlu1 %v2807_v30, %s3017_s3 }
0x1cc8   :  { %v2809_v31 = vpop.eup %2808 }
0x1cc9   :  { %1369 = vrot.lane.b32.xlu0 %v2809_v31, %s3017_s3  ;;  %v2811_v37 = vpop.eup %2810 }
0x1cca   :  { %v1320_v39 = vadd.f32 1.0, %v2811_v37  ;;  %v2813_v41 = vpop.eup %2812 }
0x1ccb   :  { %v1363_v46 = vadd.f32 1.0, %v2813_v41 }
0x1ccc   :  { %2814 = vrcp.f32 %v1320_v39 }
0x1ccd   :  { %2816 = vrcp.f32 %v1363_v46 }
0x1cd6   :  { %v2815_v51 = vpop.eup %2814 }
0x1cd7   :  { %v2817_v24 = vpop.eup %2816  ;;  %v1324_v12 = vmul.f32 %v2815_v51, %v3462_v40 }
0x1cd8   :  { %v1367_v6 = vmul.f32 %v2817_v24, %v3466_v45 }
0x1d37   :  { %v1327_v36 = vpop.permute.xlu1 %1326 }
0x1d38   :  { %v1329_v21 = vmul.f32 %v2815_v51, %v1327_v36 }
0x1d3a   :  { %1331 = vrot.lane.b32.xlu1 %v1329_v21, %s3011_s29 }
0x1d3b   :  { %v1370_v48 = vpop.permute.xlu0 %1369 }
0x1d3c   :  { %v1372_v4 = vmul.f32 %v2817_v24, %v1370_v48 }
0x1d3e   :  { %1374 = vrot.lane.b32.xlu0 %v1372_v4, %s3011_s29 }
0x1dac   :  { %v1332_v16 = vpop.permute.xlu1 %1331 }
0x1dad   :  { %v3555_v2 = vadd.f32 %v1332_v16, %v1324_v12 }
0x1daf   :  { %2818 = vtanh.f32 %v3555_v2 }
0x1db0   :  { %v1375_v11 = vpop.permute.xlu0 %1374 }
0x1db1   :  { %v3559_v53 = vadd.f32 %v1375_v11, %v1367_v6 }
0x1db3   :  { %2820 = vtanh.f32 %v3559_v53 }
0x1db9   :  { %v2819_v38 = vpop.eup %2818 }
0x1dba   :  { %1337 = vrot.lane.b32.xlu1 %v2819_v38, %s3015_s16 }
0x1dbd   :  { %v2821_v54 = vpop.eup %2820 }
0x1dbe   :  { %1380 = vrot.lane.b32.xlu0 %v2821_v54, %s3015_s16 }
0x1dc2   :  { %1388 = vrot.lane.b32.xlu0 %v3519_v33, %s3016_s17 }
0x1e2c   :  { %v1338_v40 = vpop.permute.xlu1 %1337 }
0x1e2d   :  { %v1340_v14 = vmul.f32 %v2815_v51, %v1338_v40 }
0x1e2f   :  { %1385 = vrot.lane.b32.xlu1 %v1340_v14, %s3018_s22 }
0x1e30   :  { %v1381_v44 = vpop.permute.xlu0 %1380 }
0x1e31   :  { %v3567_v45 = vmul.f32 %v2817_v24, %v1381_v44 }
0x1e33   :  { %1395 = vrot.lane.b32.xlu0 %v3567_v45, %s3017_s3  ;;  %1391 = vrot.lane.b32.xlu1 %v1340_v14, %s3019_s23 }
0x1e34   :  { %v1389_v56 = vpop.permute.xlu0 %1388 }
0x1e37   :  { %1398 = vrot.lane.b32.xlu1 %v3521_v35, %s3020_s1 }
0x1ea1   :  { %v1386_v33 = vpop.permute.xlu1 %1385 }
0x1ea2   :  { %v1401_v57 = vsel %vm103_vm0, %v2520_v15, %v1386_v33 }
0x1ea3   :  { %v1402_v58 = vsel %vm105_vm1, %v1401_v57, %v1389_v56 }
0x1ea5   :  { %v1392_v3 = vpop.permute.xlu1 %1391  ;;  %v1396_v17 = vpop.permute.xlu0 %1395 }
0x1ea6   :  { %v1403_v18 = vsel %vm107_vm2, %v1402_v58, %v1392_v3 }
0x1ea7   :  { %v1404_v19 = vsel %vm109_vm3, %v1403_v18, %v1396_v17 }
0x1ea9   :  { %v1399_v20 = vpop.permute.xlu1 %1398 }
0x1eaa   :  { %v1405_v23 = vsel %vm111_vm4, %v1404_v19, %v1399_v20 }
0x1eab   :  { %v1406_v35 = vpack.c.bf16 %v1405_v23, %v1405_v23 }
0x1ead   :  { %2567 = vmatmul.mubr.msk.bf16.vlgmr.msra.gmra.mrb[20].mxu1 %vm154_vm5, %v1406_v35 }
0x1eae   :  { %1768 = vmatpush1.bf16.msra.mxu1 %v3490_v7  ;;  %1799 = vmatprep.mubr.bf16.mxu1 %v3012_v0 }
0x1eaf   :  { %1769 = vmatprep.subr.bf16.mxu1 %v3494_v8 }
0x1eb2   :  { %1770 = vmatpush1.bf16.msra.mxu1 %v3497_v9 }
0x1eb3   :  { %1920 = vmatprep.subr.bf16.mxu1 %v3500_v10 }
0x1f80   :  { %v1444_v27 = vpop.f32.mrb[20].mxu1 }
0x1f81   :  { %v1445_v22 = vadd.f32 %v1444_v27, %v3128_v25  ;;  %v1446_v28 = vpop.f32.mrb[21].mxu1 }
0x1f82   :  { %v1447_v29 = vadd.f32 %v1446_v28, %v3132_v26  ;;  %v1448_v30 = vpop.f32.mrb[22].mxu1 }
0x1f83   :  { %2822 = vtanh.f32 %v1445_v22  ;;  %v1449_v31 = vpop.f32.mrb[23].mxu1  ;;  %v2568_v37 = vmul.f32 -1.442695, %v1445_v22 }
0x1f84   :  { %2824 = vtanh.f32 %v1447_v29  ;;  %v2569_v39 = vmul.f32 -1.442695, %v1447_v29 }
0x1f85   :  { %2826 = vpow2.f32 %v2568_v37 }
0x1f86   :  { %2828 = vpow2.f32 %v2569_v39 }
0x1f8d   :  { %v2823_v32 = vpop.eup %2822 }
0x1f8e   :  { %v2825_v34 = vpop.eup %2824  ;;  %1460 = vrot.lane.b32.xlu0 %v2823_v32, %s3014_s15 }
0x1f8f   :  { %1484 = vrot.lane.b32.xlu1 %v2825_v34, %s3014_s15  ;;  %v2827_v41 = vpop.eup %2826 }
0x1f90   :  { %v2829_v46 = vpop.eup %2828  ;;  %v1454_v51 = vadd.f32 1.0, %v2827_v41 }
0x1f91   :  { %v1478_v36 = vadd.f32 1.0, %v2829_v46 }
0x1f92   :  { %2830 = vrcp.f32 %v1454_v51 }
0x1f93   :  { %2832 = vrcp.f32 %v1478_v36 }
0x1f9c   :  { %v2831_v21 = vpop.eup %2830 }
0x1f9d   :  { %v2833_v48 = vpop.eup %2832  ;;  %v1458_v6 = vmul.f32 %v2831_v21, %v3511_v49 }
0x1f9e   :  { %v1482_v38 = vmul.f32 %v2833_v48, %v3513_v55 }
0x2000   :  { %v1461_v24 = vpop.permute.xlu0 %1460 }
0x2001   :  { %v1463_v4 = vmul.f32 %v2831_v21, %v1461_v24  ;;  %v1485_v12 = vpop.permute.xlu1 %1484 }
0x2002   :  { %v1487_v16 = vmul.f32 %v2833_v48, %v1485_v12 }
0x2003   :  { %1465 = vrot.lane.b32.xlu0 %v1463_v4, %s3015_s16 }
0x2004   :  { %1489 = vrot.lane.b32.xlu1 %v1487_v16, %s3015_s16 }
0x2075   :  { %v1466_v11 = vpop.permute.xlu0 %1465 }
0x2076   :  { %v3596_v54 = vadd.f32 %v1466_v11, %v1458_v6  ;;  %v1490_v40 = vpop.permute.xlu1 %1489 }
0x2077   :  { %v3598_v14 = vadd.f32 %v1490_v40, %v1482_v38 }
0x2078   :  { %2834 = vtanh.f32 %v3596_v54 }
0x2079   :  { %2836 = vtanh.f32 %v3598_v14 }
0x2082   :  { %v2835_v44 = vpop.eup %2834 }
0x2083   :  { %v2837_v15 = vpop.eup %2836  ;;  %1471 = vrot.lane.b32.xlu0 %v2835_v44, %s3016_s17 }
0x2084   :  { %1495 = vrot.lane.b32.xlu1 %v2837_v15, %s3016_s17 }
0x20f5   :  { %v1472_v33 = vpop.permute.xlu0 %1471 }
0x20f6   :  { %v3604_v49 = vmul.f32 %v2831_v21, %v1472_v33  ;;  %v1496_v56 = vpop.permute.xlu1 %1495 }
0x20f7   :  { %v3606_v55 = vmul.f32 %v2833_v48, %v1496_v56 }
0x20f8   :  { %1500 = vrot.lane.b32.xlu0 %v3604_v49, %s3015_s16 }
0x20f9   :  { %1504 = vrot.lane.b32.xlu1 %v3606_v55, %s3016_s17 }
0x20fc   :  { %1558 = vrot.lane.b32.xlu0 %v1445_v22, %s3014_s15 }
0x20fd   :  { %1601 = vrot.lane.b32.xlu1 %v1447_v29, %s3014_s15 }
0x2100   :  { %1554 = vrot.lane.b32.xlu0 %v1445_v22, %s3016_s17 }
0x2104   :  { %1597 = vrot.lane.b32.xlu0 %v1447_v29, %s3016_s17 }
0x216a   :  { %v1501_v57 = vpop.permute.xlu0 %1500 }
0x216b   :  { %v1505_v58 = vpop.permute.xlu1 %1504 }
0x216c   :  { %v1507_v3 = vsel %vm105_vm1, %v1501_v57, %v1505_v58 }
0x216d   :  { %v1508_v17 = vpack.c.bf16 %v1507_v3, %v1507_v3 }
0x216e   :  { %v1559_v23 = vpop.permute.xlu0 %1558 }
0x216f   :  { %2570 = vmatmul.mubr.msk.bf16.vlgmr.msra.gmra.mrb[20].mxu0 %vm107_vm2, %v1508_v17  ;;  %v1602_v22 = vpop.permute.xlu1 %1601 }
0x2170   :  { %1666 = vmatpush1.bf16.msra.mxu0 %v3428_v43  ;;  %1697 = vmatprep.mubr.bf16.mxu0 %v3012_v0 }
0x2171   :  { %1667 = vmatprep.subr.bf16.mxu0 %v3432_v60 }
0x2172   :  { %v1555_v31 = vpop.permute.xlu0 %1554 }
0x2174   :  { %1668 = vmatpush1.bf16.msra.mxu0 %v3435_v42 }
0x2175   :  { %1669 = vmatprep.subr.bf16.mxu0 %v3438_v47 }
0x2176   :  { %v1598_v32 = vpop.permute.xlu0 %1597 }
0x2178   :  { %1670 = vmatpush1.bf16.msra.mxu0 %v3441_v62 }
0x2179   :  { %1671 = vmatprep.subr.bf16.mxu0 %v3444_v63 }
0x217c   :  { %1672 = vmatpush1.bf16.msra.mxu0 %v3447_v1 }
0x217d   :  { %2022 = vmatprep.subr.bf16.mxu0 %v3541_v5 }
0x2242   :  { %v1546_v18 = vpop.f32.mrb[20].mxu0 }
0x2243   :  { %v1547_v19 = vadd.f32 %v1546_v18, %v3192_v13  ;;  %v1548_v20 = vpop.f32.mrb[21].mxu0 }
0x2244   :  { %v1549_v35 = vadd.f32 %v1548_v20, %v3266_v50  ;;  %v1550_v27 = vpop.f32.mrb[22].mxu0 }
0x2245   :  { %v1561_v28 = vmul.f32 %v1559_v23, %v1547_v19  ;;  %v1551_v29 = vpop.f32.mrb[23].mxu0  ;;  %v1557_v37 = vmul.f32 %v1555_v31, %v1547_v19 }
0x2246   :  { %v1604_v30 = vmul.f32 %v1602_v22, %v1549_v35  ;;  %v1600_v51 = vmul.f32 %v1598_v32, %v1549_v35 }
0x2247   :  { %1563 = vrot.lane.b32.xlu1 %v1561_v28, %s3016_s17 }
0x2248   :  { %1606 = vrot.lane.b32.xlu0 %v1604_v30, %s3016_s17  ;;  %v2521_v30 = vld [vmem:[%s3917_s0 + $0xc] sm:$0x3] }
0x224b   :  { %1568 = vrot.lane.b32.xlu1 %v1547_v19, %s3014_s15 }
0x224f   :  { %1611 = vrot.lane.b32.xlu1 %v1549_v35, %s3014_s15 }
0x22b9   :  { %v1564_v34 = vpop.permute.xlu1 %1563 }
0x22ba   :  { %v1566_v39 = vadd.f32 %v1564_v34, %v1557_v37  ;;  %v1607_v41 = vpop.permute.xlu0 %1606 }
0x22bb   :  { %v1609_v21 = vadd.f32 %v1607_v41, %v1600_v51 }
0x22bd   :  { %v1569_v46 = vpop.permute.xlu1 %1568 }
0x22be   :  { %v1571_v36 = vadd.f32 %v1569_v46, %v1566_v39 }
0x22c0   :  { %2838 = vtanh.f32 %v1571_v36  ;;  %v2571_v16 = vmul.f32 -1.442695, %v1571_v36 }
0x22c1   :  { %v1612_v24 = vpop.permute.xlu1 %1611 }
0x22c2   :  { %v1614_v48 = vadd.f32 %v1612_v24, %v1609_v21 }
0x22c4   :  { %2840 = vtanh.f32 %v1614_v48  ;;  %v2572_v6 = vmul.f32 -1.442695, %v1614_v48 }
0x22c5   :  { %2842 = vpow2.f32 %v2571_v16 }
0x22c6   :  { %2844 = vpow2.f32 %v2572_v6 }
0x22ca   :  { %v2839_v4 = vpop.eup %2838 }
0x22cb   :  { %1581 = vrot.lane.b32.xlu0 %v2839_v4, %s3017_s3 }
0x22ce   :  { %v2841_v12 = vpop.eup %2840 }
0x22cf   :  { %1624 = vrot.lane.b32.xlu1 %v2841_v12, %s3017_s3  ;;  %v2843_v11 = vpop.eup %2842 }
0x22d0   :  { %v1575_v38 = vadd.f32 1.0, %v2843_v11  ;;  %v2845_v40 = vpop.eup %2844 }
0x22d1   :  { %v1618_v44 = vadd.f32 1.0, %v2845_v40 }
0x22d2   :  { %2846 = vrcp.f32 %v1575_v38 }
0x22d3   :  { %2848 = vrcp.f32 %v1618_v44 }
0x22dc   :  { %v2847_v15 = vpop.eup %2846 }
0x22dd   :  { %v2849_v57 = vpop.eup %2848  ;;  %v1579_v17 = vmul.f32 %v2847_v15, %v3555_v2 }
0x22de   :  { %v1622_v20 = vmul.f32 %v2849_v57, %v3559_v53 }
0x233d   :  { %v1582_v33 = vpop.permute.xlu0 %1581 }
0x233e   :  { %v1584_v56 = vmul.f32 %v2847_v15, %v1582_v33 }
0x2340   :  { %1586 = vrot.lane.b32.xlu0 %v1584_v56, %s3011_s29 }
0x2341   :  { %v1625_v58 = vpop.permute.xlu1 %1624 }
0x2342   :  { %v1627_v3 = vmul.f32 %v2849_v57, %v1625_v58 }
0x2344   :  { %1629 = vrot.lane.b32.xlu1 %v1627_v3, %s3011_s29 }
0x23b2   :  { %v1587_v18 = vpop.permute.xlu0 %1586 }
0x23b3   :  { %v3638_v19 = vadd.f32 %v1587_v18, %v1579_v17 }
0x23b5   :  { %2850 = vtanh.f32 %v3638_v19 }
0x23b6   :  { %v1630_v23 = vpop.permute.xlu1 %1629 }
0x23b7   :  { %v3642_v35 = vadd.f32 %v1630_v23, %v1622_v20 }
0x23b9   :  { %2852 = vtanh.f32 %v3642_v35 }
0x23bf   :  { %v2851_v27 = vpop.eup %2850 }
0x23c0   :  { %1592 = vrot.lane.b32.xlu0 %v2851_v27, %s3015_s16 }
0x23c3   :  { %v2853_v22 = vpop.eup %2852 }
0x23c4   :  { %1635 = vrot.lane.b32.xlu1 %v2853_v22, %s3015_s16 }
0x23c8   :  { %1643 = vrot.lane.b32.xlu1 %v3604_v49, %s3016_s17 }
0x2432   :  { %v1593_v2 = vpop.permute.xlu0 %1592 }
0x2433   :  { %v1595_v28 = vmul.f32 %v2847_v15, %v1593_v2 }
0x2435   :  { %1640 = vrot.lane.b32.xlu0 %v1595_v28, %s3018_s22 }
0x2436   :  { %v1636_v29 = vpop.permute.xlu1 %1635 }
0x2437   :  { %v3650_v53 = vmul.f32 %v2849_v57, %v1636_v29 }
0x2439   :  { %1650 = vrot.lane.b32.xlu1 %v3650_v53, %s3017_s3  ;;  %1646 = vrot.lane.b32.xlu0 %v1595_v28, %s3019_s23 }
0x243a   :  { %v1644_v31 = vpop.permute.xlu1 %1643 }
0x243d   :  { %1653 = vrot.lane.b32.xlu0 %v3606_v55, %s3020_s1 }
0x24a7   :  { %v1641_v49 = vpop.permute.xlu0 %1640 }
0x24a8   :  { %v1656_v32 = vsel %vm103_vm0, %v2521_v30, %v1641_v49 }
0x24a9   :  { %v1657_v34 = vsel %vm105_vm1, %v1656_v32, %v1644_v31 }
0x24ab   :  { %v1647_v37 = vpop.permute.xlu0 %1646  ;;  %v1651_v39 = vpop.permute.xlu1 %1650 }
0x24ac   :  { %v1658_v41 = vsel %vm107_vm2, %v1657_v34, %v1647_v37 }
0x24ad   :  { %v1659_v46 = vsel %vm109_vm3, %v1658_v41, %v1651_v39 }
0x24af   :  { %v1654_v51 = vpop.permute.xlu0 %1653 }
0x24b0   :  { %v1660_v36 = vsel %vm111_vm4, %v1659_v46, %v1654_v51 }
0x24b1   :  { %v1661_v55 = vpack.c.bf16 %v1660_v36, %v1660_v36 }
0x24b3   :  { %2573 = vmatmul.mubr.msk.bf16.vlgmr.msra.gmra.mrb[24].mxu0 %vm154_vm5, %v1661_v55 }
0x24b4   :  { %2023 = vmatpush1.bf16.msra.mxu0 %v3490_v7  ;;  %2054 = vmatprep.mubr.bf16.mxu0 %v3012_v0 }
0x24b5   :  { %2024 = vmatprep.subr.bf16.mxu0 %v3494_v8 }
0x24b8   :  { %2025 = vmatpush1.bf16.msra.mxu0 %v3497_v9 }
0x24b9   :  { %2175 = vmatprep.subr.bf16.mxu0 %v3500_v10 }
0x2586   :  { %v1699_v21 = vpop.f32.mrb[24].mxu0 }
0x2587   :  { %v1700_v24 = vadd.f32 %v1699_v21, %v3128_v25  ;;  %v1701_v48 = vpop.f32.mrb[25].mxu0 }
0x2588   :  { %v1702_v4 = vadd.f32 %v1701_v48, %v3132_v26  ;;  %v1703_v12 = vpop.f32.mrb[26].mxu0 }
0x2589   :  { %2854 = vtanh.f32 %v1700_v24  ;;  %v1704_v16 = vpop.f32.mrb[27].mxu0  ;;  %v2574_v38 = vmul.f32 -1.442695, %v1700_v24 }
0x258a   :  { %2856 = vtanh.f32 %v1702_v4  ;;  %v2575_v40 = vmul.f32 -1.442695, %v1702_v4 }
0x258b   :  { %2858 = vpow2.f32 %v2574_v38 }
0x258c   :  { %2860 = vpow2.f32 %v2575_v40 }
0x2593   :  { %v2855_v6 = vpop.eup %2854 }
0x2594   :  { %v2857_v11 = vpop.eup %2856  ;;  %1715 = vrot.lane.b32.xlu1 %v2855_v6, %s3014_s15 }
0x2595   :  { %1739 = vrot.lane.b32.xlu0 %v2857_v11, %s3014_s15  ;;  %v2859_v10 = vpop.eup %2858 }
0x2596   :  { %v2861_v44 = vpop.eup %2860  ;;  %v1709_v15 = vadd.f32 1.0, %v2859_v10 }
0x2597   :  { %v1733_v33 = vadd.f32 1.0, %v2861_v44 }
0x2598   :  { %2862 = vrcp.f32 %v1709_v15 }
0x2599   :  { %2864 = vrcp.f32 %v1733_v33 }
0x25a2   :  { %v2863_v56 = vpop.eup %2862 }
0x25a3   :  { %v2865_v58 = vpop.eup %2864  ;;  %v1713_v20 = vmul.f32 %v2863_v56, %v3596_v54 }
0x25a4   :  { %v1737_v27 = vmul.f32 %v2865_v58, %v3598_v14 }
0x2606   :  { %v1716_v57 = vpop.permute.xlu1 %1715 }
0x2607   :  { %v1718_v3 = vmul.f32 %v2863_v56, %v1716_v57  ;;  %v1740_v17 = vpop.permute.xlu0 %1739 }
0x2608   :  { %v1742_v18 = vmul.f32 %v2865_v58, %v1740_v17 }
0x2609   :  { %1720 = vrot.lane.b32.xlu1 %v1718_v3, %s3015_s16 }
0x260a   :  { %1744 = vrot.lane.b32.xlu0 %v1742_v18, %s3015_s16 }
0x267b   :  { %v1721_v23 = vpop.permute.xlu1 %1720 }
0x267c   :  { %v3679_v22 = vadd.f32 %v1721_v23, %v1713_v20  ;;  %v1745_v2 = vpop.permute.xlu0 %1744 }
0x267d   :  { %v3681_v28 = vadd.f32 %v1745_v2, %v1737_v27 }
0x267e   :  { %2866 = vtanh.f32 %v3679_v22 }
0x267f   :  { %2868 = vtanh.f32 %v3681_v28 }
0x2688   :  { %v2867_v29 = vpop.eup %2866 }
0x2689   :  { %v2869_v30 = vpop.eup %2868  ;;  %1726 = vrot.lane.b32.xlu1 %v2867_v29, %s3016_s17 }
0x268a   :  { %1750 = vrot.lane.b32.xlu0 %v2869_v30, %s3016_s17 }
0x26fb   :  { %v1727_v49 = vpop.permute.xlu1 %1726 }
0x26fc   :  { %v3687_v54 = vmul.f32 %v2863_v56, %v1727_v49  ;;  %v1751_v31 = vpop.permute.xlu0 %1750 }
0x26fd   :  { %v3689_v14 = vmul.f32 %v2865_v58, %v1751_v31 }
0x26fe   :  { %1755 = vrot.lane.b32.xlu1 %v3687_v54, %s3015_s16 }
0x26ff   :  { %1759 = vrot.lane.b32.xlu0 %v3689_v14, %s3016_s17 }
0x2702   :  { %1813 = vrot.lane.b32.xlu1 %v1700_v24, %s3014_s15 }
0x2703   :  { %1856 = vrot.lane.b32.xlu0 %v1702_v4, %s3014_s15 }
0x2706   :  { %1809 = vrot.lane.b32.xlu1 %v1700_v24, %s3016_s17 }
0x270a   :  { %1852 = vrot.lane.b32.xlu1 %v1702_v4, %s3016_s17 }
0x2770   :  { %v1756_v32 = vpop.permute.xlu1 %1755 }
0x2771   :  { %v1760_v34 = vpop.permute.xlu0 %1759 }
0x2772   :  { %v1762_v37 = vsel %vm105_vm1, %v1756_v32, %v1760_v34 }
0x2773   :  { %v1763_v39 = vpack.c.bf16 %v1762_v37, %v1762_v37 }
0x2774   :  { %v1814_v51 = vpop.permute.xlu1 %1813 }
0x2775   :  { %2576 = vmatmul.mubr.msk.bf16.vlgmr.msra.gmra.mrb[24].mxu1 %vm107_vm2, %v1763_v39  ;;  %v1857_v55 = vpop.permute.xlu0 %1856 }
0x2776   :  { %1921 = vmatpush1.bf16.msra.mxu1 %v3428_v43  ;;  %1952 = vmatprep.mubr.bf16.mxu1 %v3012_v0 }
0x2777   :  { %1922 = vmatprep.subr.bf16.mxu1 %v3432_v60 }
0x277a   :  { %1923 = vmatpush1.bf16.msra.mxu1 %v3435_v42 }
0x277b   :  { %1924 = vmatprep.subr.bf16.mxu1 %v3438_v47 }
0x277e   :  { %1925 = vmatpush1.bf16.msra.mxu1 %v3441_v62  ;;  %v1810_v62 = vpop.permute.xlu1 %1809 }
0x277f   :  { %1926 = vmatprep.subr.bf16.mxu1 %v3444_v63 }
0x2782   :  { %1927 = vmatpush1.bf16.msra.mxu1 %v3447_v1  ;;  %v1853_v63 = vpop.permute.xlu1 %1852 }
0x2783   :  { %2277 = vmatprep.subr.bf16.mxu1 %v3541_v5 }
0x2848   :  { %v1801_v41 = vpop.f32.mrb[24].mxu1 }
0x2849   :  { %v1802_v46 = vadd.f32 %v1801_v41, %v3192_v13  ;;  %v1803_v43 = vpop.f32.mrb[25].mxu1 }
0x284a   :  { %v1804_v36 = vadd.f32 %v1803_v43, %v3266_v50  ;;  %v1805_v60 = vpop.f32.mrb[26].mxu1 }
0x284b   :  { %v1816_v42 = vmul.f32 %v1814_v51, %v1802_v46  ;;  %v1806_v21 = vpop.f32.mrb[27].mxu1  ;;  %v1812_v5 = vmul.f32 %v1810_v62, %v1802_v46 }
0x284c   :  { %v1859_v47 = vmul.f32 %v1857_v55, %v1804_v36  ;;  %v1855_v12 = vmul.f32 %v1853_v63, %v1804_v36 }
0x284d   :  { %1818 = vrot.lane.b32.xlu0 %v1816_v42, %s3016_s17 }
0x284e   :  { %1861 = vrot.lane.b32.xlu1 %v1859_v47, %s3016_s17 }
0x2851   :  { %1823 = vrot.lane.b32.xlu0 %v1802_v46, %s3014_s15  ;;  %v2522_v46 = vld [vmem:[%s3917_s0 + $0xe] sm:$0x3]  ;;  %s3021_s0 = smov 72  }
0x2855   :  { %1866 = vrot.lane.b32.xlu0 %v1804_v36, %s3014_s15 }
0x28bf   :  { %v1819_v1 = vpop.permute.xlu0 %1818 }
0x28c0   :  { %v1821_v24 = vadd.f32 %v1819_v1, %v1812_v5  ;;  %v1862_v48 = vpop.permute.xlu1 %1861 }
0x28c1   :  { %v1864_v6 = vadd.f32 %v1862_v48, %v1855_v12 }
0x28c3   :  { %v1824_v4 = vpop.permute.xlu0 %1823 }
0x28c4   :  { %v1826_v16 = vadd.f32 %v1824_v4, %v1821_v24 }
0x28c6   :  { %2870 = vtanh.f32 %v1826_v16  ;;  %v2577_v44 = vmul.f32 -1.442695, %v1826_v16 }
0x28c7   :  { %v1867_v11 = vpop.permute.xlu0 %1866 }
0x28c8   :  { %v1869_v38 = vadd.f32 %v1867_v11, %v1864_v6 }
0x28ca   :  { %2872 = vtanh.f32 %v1869_v38  ;;  %v2578_v15 = vmul.f32 -1.442695, %v1869_v38 }
0x28cb   :  { %2874 = vpow2.f32 %v2577_v44 }
0x28cc   :  { %2876 = vpow2.f32 %v2578_v15 }
0x28d0   :  { %v2871_v40 = vpop.eup %2870 }
0x28d1   :  { %1836 = vrot.lane.b32.xlu1 %v2871_v40, %s3017_s3 }
0x28d4   :  { %v2873_v10 = vpop.eup %2872 }
0x28d5   :  { %1879 = vrot.lane.b32.xlu0 %v2873_v10, %s3017_s3  ;;  %v2875_v33 = vpop.eup %2874 }
0x28d6   :  { %v1830_v56 = vadd.f32 1.0, %v2875_v33  ;;  %v2877_v57 = vpop.eup %2876 }
0x28d7   :  { %v1873_v58 = vadd.f32 1.0, %v2877_v57 }
0x28d8   :  { %2878 = vrcp.f32 %v1830_v56 }
0x28d9   :  { %2880 = vrcp.f32 %v1873_v58 }
0x28e2   :  { %v2879_v3 = vpop.eup %2878 }
0x28e3   :  { %v2881_v20 = vpop.eup %2880  ;;  %v1834_v2 = vmul.f32 %v2879_v3, %v3638_v19 }
0x28e4   :  { %v1877_v49 = vmul.f32 %v2881_v20, %v3642_v35 }
0x2943   :  { %v1837_v17 = vpop.permute.xlu1 %1836 }
0x2944   :  { %v1839_v18 = vmul.f32 %v2879_v3, %v1837_v17 }
0x2946   :  { %1841 = vrot.lane.b32.xlu1 %v1839_v18, %s3011_s29 }
0x2947   :  { %v1880_v23 = vpop.permute.xlu0 %1879 }
0x2948   :  { %v1882_v27 = vmul.f32 %v2881_v20, %v1880_v23 }
0x294a   :  { %1884 = vrot.lane.b32.xlu0 %v1882_v27, %s3011_s29 }
0x29b8   :  { %v1842_v29 = vpop.permute.xlu1 %1841 }
0x29b9   :  { %v3721_v30 = vadd.f32 %v1842_v29, %v1834_v2 }
0x29bb   :  { %2882 = vtanh.f32 %v3721_v30 }
0x29bc   :  { %v1885_v31 = vpop.permute.xlu0 %1884 }
0x29bd   :  { %v3725_v32 = vadd.f32 %v1885_v31, %v1877_v49 }
0x29bf   :  { %2884 = vtanh.f32 %v3725_v32 }
0x29c5   :  { %v2883_v34 = vpop.eup %2882 }
0x29c6   :  { %1847 = vrot.lane.b32.xlu1 %v2883_v34, %s3015_s16 }
0x29c9   :  { %v2885_v37 = vpop.eup %2884 }
0x29ca   :  { %1890 = vrot.lane.b32.xlu0 %v2885_v37, %s3015_s16 }
0x29ce   :  { %1898 = vrot.lane.b32.xlu0 %v3687_v54, %s3016_s17 }
0x2a38   :  { %v1848_v19 = vpop.permute.xlu1 %1847 }
0x2a39   :  { %v1850_v39 = vmul.f32 %v2879_v3, %v1848_v19  ;;  %v2954_v19 = vld [vmem:[#allocation2] ss:$8 sps:$4 sm:$0xff]  }
0x2a3b   :  { %1895 = vrot.lane.b32.xlu1 %v1850_v39, %s3018_s22 }
0x2a3c   :  { %v1891_v41 = vpop.permute.xlu0 %1890 }
0x2a3d   :  { %v1893_v35 = vmul.f32 %v2881_v20, %v1891_v41  ;;  %v2956_v41 = vld [vmem:[#allocation2 + $0x10] ss:$8 sps:$4 sm:$0xff]  }
0x2a3f   :  { %1905 = vrot.lane.b32.xlu0 %v1893_v35, %s3017_s3  ;;  %1901 = vrot.lane.b32.xlu1 %v1850_v39, %s3019_s23  ;;  %v2955_v39 = vld [vmem:[#allocation2 + $0x14] ss:$8 sps:$4 sm:$0xff]   ;;  %v2957_v35 = vld [vmem:[#allocation2 + $0x24] ss:$8 sps:$4 sm:$0xff]  }
0x2a40   :  { %v1899_v51 = vpop.permute.xlu0 %1898 }
0x2a43   :  { %1908 = vrot.lane.b32.xlu1 %v3689_v14, %s3020_s1 }
0x2aad   :  { %v1896_v43 = vpop.permute.xlu1 %1895 }
0x2aae   :  { %v1911_v54 = vsel %vm103_vm0, %v2522_v46, %v1896_v43  ;;  %v2958_v46 = vld [vmem:[#allocation2 + $0x20] ss:$8 sps:$4 sm:$0xff]   ;;  %v2959_v43 = vld [vmem:[#allocation2 + $0x34] ss:$8 sps:$4 sm:$0xff]  }
0x2aaf   :  { %v1912_v36 = vsel %vm105_vm1, %v1911_v54, %v1899_v51  ;;  %v2960_v51 = vld [vmem:[#allocation2 + $0x30] ss:$8 sps:$4 sm:$0xff]  }
0x2ab1   :  { %v1902_v60 = vpop.permute.xlu1 %1901  ;;  %v3742_v55 = vpop.permute.xlu0 %1905 }
0x2ab2   :  { %v1913_v42 = vsel %vm107_vm2, %v1912_v36, %v1902_v60 }
0x2ab3   :  { %v1914_v21 = vsel %vm109_vm3, %v1913_v42, %v3742_v55 }
0x2ab5   :  { %v1909_v47 = vpop.permute.xlu1 %1908 }
0x2ab6   :  { %v1915_v14 = vsel %vm111_vm4, %v1914_v21, %v1909_v47 }
0x2ab7   :  { %v1916_v62 = vpack.c.bf16 %v1915_v14, %v1915_v14 }
0x2ab9   :  { %2579 = vmatmul.mubr.msk.bf16.vlgmr.msra.gmra.mrb[28].mxu1 %vm154_vm5, %v1916_v62 }
0x2aba   :  { %2278 = vmatpush1.bf16.msra.mxu1 %v3490_v7  ;;  %2309 = vmatprep.mubr.bf16.mxu1 %v3012_v0 }
0x2abb   :  { %2279 = vmatprep.subr.bf16.mxu1 %v3494_v8 }
0x2abe   :  { %2280 = vmatpush1.bf16.msra.mxu1 %v3497_v9 }
0x2b8c   :  { %v1954_v63 = vpop.f32.mrb[28].mxu1 }
0x2b8d   :  { %v1955_v1 = vadd.f32 %v1954_v63, %v3128_v25  ;;  %v1956_v5 = vpop.f32.mrb[29].mxu1 }
0x2b8e   :  { %v1957_v24 = vadd.f32 %v1956_v5, %v3132_v26  ;;  %v1958_v48 = vpop.f32.mrb[30].mxu1 }
0x2b8f   :  { %2886 = vtanh.f32 %v1955_v1  ;;  %v1959_v4 = vpop.f32.mrb[31].mxu1  ;;  %v2580_v7 = vmul.f32 -1.442695, %v1955_v1 }
0x2b90   :  { %2888 = vtanh.f32 %v1957_v24  ;;  %v2581_v8 = vmul.f32 -1.442695, %v1957_v24 }
0x2b91   :  { %2890 = vpow2.f32 %v2580_v7 }
0x2b92   :  { %2892 = vpow2.f32 %v2581_v8 }
0x2b99   :  { %v2887_v12 = vpop.eup %2886 }
0x2b9a   :  { %v2889_v16 = vpop.eup %2888  ;;  %1970 = vrot.lane.b32.xlu0 %v2887_v12, %s3014_s15 }
0x2b9b   :  { %1994 = vrot.lane.b32.xlu1 %v2889_v16, %s3014_s15  ;;  %v2891_v9 = vpop.eup %2890 }
0x2b9c   :  { %v2893_v6 = vpop.eup %2892  ;;  %v1964_v11 = vadd.f32 1.0, %v2891_v9 }
0x2b9d   :  { %v1988_v38 = vadd.f32 1.0, %v2893_v6 }
0x2b9e   :  { %2894 = vrcp.f32 %v1964_v11 }
0x2b9f   :  { %2896 = vrcp.f32 %v1988_v38 }
0x2ba8   :  { %v2895_v40 = vpop.eup %2894 }
0x2ba9   :  { %v2897_v44 = vpop.eup %2896  ;;  %v1968_v57 = vmul.f32 %v2895_v40, %v3679_v22 }
0x2baa   :  { %v1992_v3 = vmul.f32 %v2897_v44, %v3681_v28 }
0x2c0c   :  { %v1971_v10 = vpop.permute.xlu0 %1970 }
0x2c0d   :  { %v1973_v15 = vmul.f32 %v2895_v40, %v1971_v10  ;;  %v1995_v33 = vpop.permute.xlu1 %1994 }
0x2c0e   :  { %v1997_v56 = vmul.f32 %v2897_v44, %v1995_v33 }
0x2c0f   :  { %1975 = vrot.lane.b32.xlu0 %v1973_v15, %s3015_s16 }
0x2c10   :  { %1999 = vrot.lane.b32.xlu1 %v1997_v56, %s3015_s16 }
0x2c81   :  { %v1976_v58 = vpop.permute.xlu0 %1975 }
0x2c82   :  { %v3761_v17 = vadd.f32 %v1976_v58, %v1968_v57  ;;  %v2000_v18 = vpop.permute.xlu1 %1999 }
0x2c83   :  { %v3763_v20 = vadd.f32 %v2000_v18, %v1992_v3 }
0x2c84   :  { %2898 = vtanh.f32 %v3761_v17 }
0x2c85   :  { %2900 = vtanh.f32 %v3763_v20 }
0x2c8e   :  { %v2899_v23 = vpop.eup %2898 }
0x2c8f   :  { %v2901_v27 = vpop.eup %2900  ;;  %1981 = vrot.lane.b32.xlu0 %v2899_v23, %s3016_s17 }
0x2c90   :  { %2005 = vrot.lane.b32.xlu1 %v2901_v27, %s3016_s17 }
0x2d01   :  { %v1982_v2 = vpop.permute.xlu0 %1981 }
0x2d02   :  { %v3769_v22 = vmul.f32 %v2895_v40, %v1982_v2  ;;  %v2006_v29 = vpop.permute.xlu1 %2005 }
0x2d03   :  { %v3771_v28 = vmul.f32 %v2897_v44, %v2006_v29 }
0x2d04   :  { %2010 = vrot.lane.b32.xlu0 %v3769_v22, %s3015_s16 }
0x2d05   :  { %2014 = vrot.lane.b32.xlu1 %v3771_v28, %s3016_s17 }
0x2d08   :  { %2068 = vrot.lane.b32.xlu0 %v1955_v1, %s3014_s15 }
0x2d09   :  { %2111 = vrot.lane.b32.xlu1 %v1957_v24, %s3014_s15 }
0x2d0c   :  { %2064 = vrot.lane.b32.xlu0 %v1955_v1, %s3016_s17 }
0x2d10   :  { %2107 = vrot.lane.b32.xlu0 %v1957_v24, %s3016_s17 }
0x2d76   :  { %v2011_v49 = vpop.permute.xlu0 %2010 }
0x2d77   :  { %v2015_v31 = vpop.permute.xlu1 %2014 }
0x2d78   :  { %v2017_v34 = vsel %vm105_vm1, %v2011_v49, %v2015_v31 }
0x2d79   :  { %v2018_v37 = vpack.c.bf16 %v2017_v34, %v2017_v34 }
0x2d7a   :  { %v2069_v42 = vpop.permute.xlu0 %2068 }
0x2d7b   :  { %2582 = vmatmul.mubr.msk.bf16.vlgmr.msra.gmra.mrb[28].mxu0 %vm107_vm2, %v2018_v37  ;;  %v2112_v47 = vpop.permute.xlu1 %2111 }
0x2d7c   :  { %2176 = vmatpush1.bf16.msra.mxu0 %v2954_v19  ;;  %2207 = vmatprep.mubr.bf16.mxu0 %v3012_v0 }
0x2d7d   :  { %2177 = vmatprep.subr.bf16.mxu0 %v2955_v39 }
0x2d7e   :  { %v2065_v1 = vpop.permute.xlu0 %2064 }
0x2d80   :  { %2178 = vmatpush1.bf16.msra.mxu0 %v2956_v41 }
0x2d81   :  { %2179 = vmatprep.subr.bf16.mxu0 %v2957_v35 }
0x2d82   :  { %v2108_v5 = vpop.permute.xlu0 %2107 }
0x2d84   :  { %2180 = vmatpush1.bf16.msra.mxu0 %v2958_v46 }
0x2d85   :  { %2181 = vmatprep.subr.bf16.mxu0 %v2959_v43 }
0x2d88   :  { %2182 = vmatpush1.bf16.msra.mxu0 %v2960_v51 }
0x2e4e   :  { %v2056_v54 = vpop.f32.mrb[28].mxu0 }
0x2e4f   :  { %v2057_v36 = vadd.f32 %v2056_v54, %v3192_v13  ;;  %v2058_v60 = vpop.f32.mrb[29].mxu0 }
0x2e50   :  { %v2059_v21 = vadd.f32 %v2058_v60, %v3266_v50  ;;  %v2060_v0 = vpop.f32.mrb[30].mxu0 }
0x2e51   :  { %v2071_v14 = vmul.f32 %v2069_v42, %v2057_v36  ;;  %v2061_v62 = vpop.f32.mrb[31].mxu0  ;;  %v2067_v24 = vmul.f32 %v2065_v1, %v2057_v36 }
0x2e52   :  { %v2114_v63 = vmul.f32 %v2112_v47, %v2059_v21  ;;  %v2110_v16 = vmul.f32 %v2108_v5, %v2059_v21 }
0x2e53   :  { %2073 = vrot.lane.b32.xlu1 %v2071_v14, %s3016_s17 }
0x2e54   :  { %2116 = vrot.lane.b32.xlu0 %v2114_v63, %s3016_s17 }
0x2e57   :  { %2078 = vrot.lane.b32.xlu1 %v2057_v36, %s3014_s15 }
0x2e5b   :  { %2121 = vrot.lane.b32.xlu1 %v2059_v21, %s3014_s15 }
0x2ec5   :  { %v2074_v13 = vpop.permute.xlu1 %2073 }
0x2ec6   :  { %v2076_v48 = vadd.f32 %v2074_v13, %v2067_v24  ;;  %v2117_v4 = vpop.permute.xlu0 %2116 }
0x2ec7   :  { %v2119_v8 = vadd.f32 %v2117_v4, %v2110_v16 }
0x2ec9   :  { %v2079_v12 = vpop.permute.xlu1 %2078 }
0x2eca   :  { %v2081_v7 = vadd.f32 %v2079_v12, %v2076_v48 }
0x2ecc   :  { %2902 = vtanh.f32 %v2081_v7  ;;  %v2583_v40 = vmul.f32 -1.442695, %v2081_v7 }
0x2ecd   :  { %v2122_v9 = vpop.permute.xlu1 %2121 }
0x2ece   :  { %v2124_v6 = vadd.f32 %v2122_v9, %v2119_v8 }
0x2ed0   :  { %2904 = vtanh.f32 %v2124_v6  ;;  %v2584_v10 = vmul.f32 -1.442695, %v2124_v6 }
0x2ed1   :  { %2906 = vpow2.f32 %v2583_v40 }
0x2ed2   :  { %2908 = vpow2.f32 %v2584_v10 }
0x2ed6   :  { %v2903_v11 = vpop.eup %2902 }
0x2ed7   :  { %2091 = vrot.lane.b32.xlu0 %v2903_v11, %s3017_s3 }
0x2eda   :  { %v2905_v38 = vpop.eup %2904 }
0x2edb   :  { %2134 = vrot.lane.b32.xlu1 %v2905_v38, %s3017_s3  ;;  %v2907_v44 = vpop.eup %2906 }
0x2edc   :  { %v2085_v15 = vadd.f32 1.0, %v2907_v44  ;;  %v2909_v33 = vpop.eup %2908 }
0x2edd   :  { %v2128_v56 = vadd.f32 1.0, %v2909_v33 }
0x2ede   :  { %2910 = vrcp.f32 %v2085_v15 }
0x2edf   :  { %2912 = vrcp.f32 %v2128_v56 }
0x2ee8   :  { %v2911_v57 = vpop.eup %2910 }
0x2ee9   :  { %v2913_v18 = vpop.eup %2912  ;;  %v2089_v2 = vmul.f32 %v2911_v57, %v3721_v30 }
0x2eea   :  { %v2132_v31 = vmul.f32 %v2913_v18, %v3725_v32 }
0x2f49   :  { %v2092_v58 = vpop.permute.xlu0 %2091 }
0x2f4a   :  { %v2094_v3 = vmul.f32 %v2911_v57, %v2092_v58 }
0x2f4c   :  { %2096 = vrot.lane.b32.xlu0 %v2094_v3, %s3011_s29 }
0x2f4d   :  { %v2135_v23 = vpop.permute.xlu1 %2134 }
0x2f4e   :  { %v2137_v27 = vmul.f32 %v2913_v18, %v2135_v23 }
0x2f50   :  { %2139 = vrot.lane.b32.xlu1 %v2137_v27, %s3011_s29 }
0x2fbe   :  { %v2097_v29 = vpop.permute.xlu0 %2096 }
0x2fbf   :  { %v3795_v49 = vadd.f32 %v2097_v29, %v2089_v2 }
0x2fc1   :  { %2914 = vtanh.f32 %v3795_v49 }
0x2fc2   :  { %v2140_v34 = vpop.permute.xlu1 %2139 }
0x2fc3   :  { %v3799_v37 = vadd.f32 %v2140_v34, %v2132_v31 }
0x2fc5   :  { %2916 = vtanh.f32 %v3799_v37 }
0x2fcb   :  { %v2915_v19 = vpop.eup %2914 }
0x2fcc   :  { %2102 = vrot.lane.b32.xlu0 %v2915_v19, %s3015_s16 }
0x2fcf   :  { %v2917_v39 = vpop.eup %2916 }
0x2fd0   :  { %2145 = vrot.lane.b32.xlu1 %v2917_v39, %s3015_s16 }
0x2fd4   :  { %2153 = vrot.lane.b32.xlu1 %v3769_v22, %s3016_s17 }
0x303e   :  { %v2103_v30 = vpop.permute.xlu0 %2102 }
0x303f   :  { %v3806_v41 = vmul.f32 %v2911_v57, %v2103_v30 }
0x3041   :  { %2150 = vrot.lane.b32.xlu0 %v3806_v41, %s3018_s22 }
0x3042   :  { %v2146_v32 = vpop.permute.xlu1 %2145 }
0x3043   :  { %v3810_v35 = vmul.f32 %v2913_v18, %v2146_v32 }
0x3045   :  { %2160 = vrot.lane.b32.xlu1 %v3810_v35, %s3017_s3  ;;  %2156 = vrot.lane.b32.xlu0 %v3806_v41, %s3019_s23 }
0x3046   :  { %v2154_v22 = vpop.permute.xlu1 %2153 }
0x3049   :  { %2163 = vrot.lane.b32.xlu0 %v3771_v28, %s3020_s1 }
0x30b3   :  { %v2151_v46 = vpop.permute.xlu0 %2150 }
0x30b4   :  { %v2166_v43 = vsel %vm103_vm0, 0.0, %v2151_v46 }
0x30b5   :  { %v2167_v51 = vsel %vm105_vm1, %v2166_v43, %v2154_v22 }
0x30b7   :  { %v2157_v54 = vpop.permute.xlu0 %2156  ;;  %v2161_v36 = vpop.permute.xlu1 %2160 }
0x30b8   :  { %v2168_v60 = vsel %vm107_vm2, %v2167_v51, %v2157_v54 }
0x30b9   :  { %v2169_v42 = vsel %vm109_vm3, %v2168_v60, %v2161_v36 }
0x30bb   :  { %v2164_v21 = vpop.permute.xlu0 %2163 }
0x30bc   :  { %v2170_v0 = vsel %vm111_vm4, %v2169_v42, %v2164_v21 }
0x30bd   :  { %v2171_v47 = vpack.c.bf16 %v2170_v0, %v2170_v0 }
0x30bf   :  { %2585 = vmatmul.mubr.msk.bf16.vlgmr.msra.gmra.mrb[32].mxu0 %vm154_vm5, %v2171_v47 }
0x3192   :  { %v2209_v14 = vpop.f32.mrb[32].mxu0 }
0x3193   :  { %v2210_v28 = vadd.f32 %v2209_v14, %v3128_v25  ;;  %v2211_v62 = vpop.f32.mrb[33].mxu0 }
0x3194   :  { %v2212_v63 = vadd.f32 %v2211_v62, %v3132_v26  ;;  %v2213_v1 = vpop.f32.mrb[34].mxu0 }
0x3195   :  { %2918 = vtanh.f32 %v2210_v28  ;;  %v2214_v5 = vpop.f32.mrb[35].mxu0  ;;  %v2586_v48 = vmul.f32 -1.442695, %v2210_v28  ;;  %v2365_v1 = vld [vmem:[%s3921_s4 + $0x28] sm:$0xff] }
0x3196   :  { %2920 = vtanh.f32 %v2212_v63  ;;  %v2587_v4 = vmul.f32 -1.442695, %v2212_v63 }
0x3197   :  { %2922 = vpow2.f32 %v2586_v48 }
0x3198   :  { %2924 = vpow2.f32 %v2587_v4 }
0x319f   :  { %v2919_v13 = vpop.eup %2918 }
0x31a0   :  { %v2921_v24 = vpop.eup %2920  ;;  %2225 = vrot.lane.b32.xlu1 %v2919_v13, %s3014_s15  ;;  %v2366_v13 = vld [vmem:[%s3921_s4 + $0x30] sm:$0xff] }
0x31a1   :  { %2249 = vrot.lane.b32.xlu0 %v2921_v24, %s3014_s15  ;;  %v2923_v12 = vpop.eup %2922  ;;  %v2367_v24 = vld [vmem:[%s3921_s4 + $0x38] sm:$0xff] }
0x31a2   :  { %v2925_v16 = vpop.eup %2924  ;;  %v2219_v25 = vadd.f32 1.0, %v2923_v12  ;;  %v2630_v4 = vpack.c.bf16 %v2367_v24, %v2366_v13 }
0x31a3   :  { %v2243_v7 = vadd.f32 1.0, %v2925_v16 }
0x31a4   :  { %2926 = vrcp.f32 %v2219_v25  ;;  %v3026_v25 = vmov 0.0  }
0x31a5   :  { %2928 = vrcp.f32 %v2243_v7 }
0x31ae   :  { %v2927_v26 = vpop.eup %2926 }
0x31af   :  { %v2929_v9 = vpop.eup %2928  ;;  %v2223_v40 = vmul.f32 %v2927_v26, %v3761_v17 }
0x31b0   :  { %v2247_v44 = vmul.f32 %v2929_v9, %v3763_v20 }
0x3212   :  { %v2226_v8 = vpop.permute.xlu1 %2225 }
0x3213   :  { %v2228_v6 = vmul.f32 %v2927_v26, %v2226_v8  ;;  %v2250_v11 = vpop.permute.xlu0 %2249 }
0x3214   :  { %v2252_v38 = vmul.f32 %v2929_v9, %v2250_v11 }
0x3215   :  { %2230 = vrot.lane.b32.xlu1 %v2228_v6, %s3015_s16 }
0x3216   :  { %2254 = vrot.lane.b32.xlu0 %v2252_v38, %s3015_s16 }
0x3287   :  { %v2231_v10 = vpop.permute.xlu1 %2230 }
0x3288   :  { %v2233_v15 = vadd.f32 %v2231_v10, %v2223_v40  ;;  %v2255_v33 = vpop.permute.xlu0 %2254 }
0x3289   :  { %v2257_v56 = vadd.f32 %v2255_v33, %v2247_v44 }
0x328a   :  { %2930 = vtanh.f32 %v2233_v15 }
0x328b   :  { %2932 = vtanh.f32 %v2257_v56 }
0x3294   :  { %v2931_v57 = vpop.eup %2930 }
0x3295   :  { %v2933_v58 = vpop.eup %2932  ;;  %2236 = vrot.lane.b32.xlu1 %v2931_v57, %s3016_s17 }
0x3296   :  { %2260 = vrot.lane.b32.xlu0 %v2933_v58, %s3016_s17 }
0x3307   :  { %v2237_v3 = vpop.permute.xlu1 %2236 }
0x3308   :  { %v2239_v18 = vmul.f32 %v2927_v26, %v2237_v3  ;;  %v2261_v23 = vpop.permute.xlu0 %2260 }
0x3309   :  { %v2263_v27 = vmul.f32 %v2929_v9, %v2261_v23 }
0x330a   :  { %2265 = vrot.lane.b32.xlu1 %v2239_v18, %s3015_s16 }
0x330b   :  { %2269 = vrot.lane.b32.xlu0 %v2263_v27, %s3016_s17 }
0x330e   :  { %2322 = vrot.lane.b32.xlu1 %v2212_v63, %s3014_s15 }
0x330f   :  { %2318 = vrot.lane.b32.xlu0 %v2212_v63, %s3016_s17  ;;  %v2364_v63 = vld [vmem:[%s3921_s4 + $0x20] sm:$0xff] }
0x3310   :  { %v2627_v5 = vpack.c.bf16 %v2365_v1, %v2364_v63 }
0x337c   :  { %v2266_v17 = vpop.permute.xlu1 %2265 }
0x337d   :  { %v2270_v20 = vpop.permute.xlu0 %2269 }
0x337e   :  { %v2272_v2 = vsel %vm105_vm1, %v2266_v17, %v2270_v20  ;;  %v2590_v20 = vld [vmem:[%s3921_s4 + $0x40] ss:$0 sm:$0xff] }
0x337f   :  { %v2273_v29 = vpack.c.bf16 %v2272_v2, %v2272_v2 }
0x3380   :  { %v2323_v30 = vpop.permute.xlu1 %2322 }
0x3381   :  { %2588 = vmatmul.mubr.msk.bf16.vlgmr.msra.gmra.mrb[32].mxu1 %vm107_vm2, %v2273_v29  ;;  %v2319_v22 = vpop.permute.xlu0 %2318 }
0x3382   :  { %2617 = vmatprep.mubr.msk.f32.mxu1 %vm3025_vm6, %v3026_v25 }
0x3454   :  { %v2311_v31 = vpop.f32.mrb[32].mxu1 }
0x3455   :  { %v2312_v34 = vpop.f32.mrb[33].mxu1 }
0x3456   :  { %v2313_v19 = vadd.f32 %v2312_v34, %v3266_v50  ;;  %v2314_v39 = vpop.f32.mrb[34].mxu1 }
0x3457   :  { %v2315_v32 = vpop.f32.mrb[35].mxu1 }
0x3458   :  { %v2325_v46 = vmul.f32 %v2323_v30, %v2313_v19  ;;  %2332 = vrot.lane.b32.xlu0 %v2313_v19, %s3014_s15  ;;  %v2321_v43 = vmul.f32 %v2319_v22, %v2313_v19 }
0x345a   :  { %2327 = vrot.lane.b32.xlu1 %v2325_v46, %s3016_s17 }
0x34ca   :  { %v2333_v36 = vpop.permute.xlu0 %2332 }
0x34cc   :  { %v2328_v51 = vpop.permute.xlu1 %2327 }
0x34cd   :  { %v2330_v54 = vadd.f32 %v2328_v51, %v2321_v43 }
0x34cf   :  { %v2335_v60 = vadd.f32 %v2333_v36, %v2330_v54 }
0x34d1   :  { %2934 = vtanh.f32 %v2335_v60  ;;  %v2589_v50 = vmul.f32 -1.442695, %v2335_v60 }
0x34d3   :  { %2936 = vpow2.f32 %v2589_v50 }
0x34db   :  { %v2935_v42 = vpop.eup %2934 }
0x34dc   :  { %2345 = vrot.lane.b32.xlu1 %v2935_v42, %s3017_s3 }
0x34dd   :  { %v2937_v21 = vpop.eup %2936 }
0x34de   :  { %v2339_v0 = vadd.f32 1.0, %v2937_v21 }
0x34e0   :  { %2373 = vrot.lane.b32.xlu1 %v3294_v61, %s3021_s0  ;;  %2938 = vrcp.f32 %v2339_v0  ;;  %v2360_v61 = vld [vmem:[%s3921_s4] sm:$0xff] }
0x34e4   :  { %2379 = vrot.lane.b32.xlu1 %v3474_v59, %s3022_s18  ;;  %v2361_v59 = vld [vmem:[%s3921_s4 + $0x8] sm:$0xff] }
0x34e5   :  { %v2621_v62 = vpack.c.bf16 %v2361_v59, %v2360_v61 }
0x34e8   :  { %2385 = vrot.lane.b32.xlu1 %v3650_v53, %s3019_s23  ;;  %v2362_v53 = vld [vmem:[%s3921_s4 + $0x10] sm:$0xff] }
0x34ea   :  { %v2939_v47 = vpop.eup %2938 }
0x34eb   :  { %v2343_v48 = vmul.f32 %v2939_v47, %v3799_v37 }
0x34ec   :  { %2388 = vrot.lane.b32.xlu1 %v3810_v35, %s3023_s19  ;;  %v3024_v35 = vmov 0.0|0.0  }
0x34ed   :  { %2620 = vmatprep.subr.bf16.mxu1 %v3024_v35 }
0x34ee   :  { %2622 = vmatpush3.bf16.msra.mxu1 %v2621_v62 }
0x34ef   :  { %2623 = vmatprep.subr.bf16.mxu1 %v3024_v35 }
0x354e   :  { %v2346_v14 = vpop.permute.xlu1 %2345 }
0x354f   :  { %v2348_v28 = vmul.f32 %v2939_v47, %v2346_v14 }
0x3551   :  { %2350 = vrot.lane.b32.xlu0 %v2348_v28, %s3011_s29 }
0x3552   :  { %v2374_v26 = vpop.permute.xlu1 %2373 }
0x3555   :  { %2376 = vrot.lane.b32.xlu0 %v3377_v52, %s3018_s22  ;;  %v2363_v52 = vld [vmem:[%s3921_s4 + $0x18] sm:$0xff] }
0x3556   :  { %v2380_v37 = vpop.permute.xlu1 %2379 }
0x3559   :  { %2382 = vrot.lane.b32.xlu0 %v3567_v45, %s3014_s15  ;;  %v2624_v45 = vpack.c.bf16 %v2363_v52, %v2362_v53 }
0x355a   :  { %v2386_v40 = vpop.permute.xlu1 %2385 }
0x355b   :  { %2625 = vmatpush3.bf16.msra.mxu1 %v2624_v45 }
0x355c   :  { %2626 = vmatprep.subr.bf16.mxu1 %v3024_v35 }
0x355e   :  { %v2389_v15 = vpop.permute.xlu1 %2388 }
0x355f   :  { %2628 = vmatpush3.bf16.msra.mxu1 %v2627_v5 }
0x3560   :  { %2629 = vmatprep.subr.bf16.mxu1 %v3024_v35 }
0x3563   :  { %2631 = vmatpush3.bf16.msra.mxu1 %v2630_v4 }
0x35c3   :  { %v2351_v12 = vpop.permute.xlu0 %2350 }
0x35c4   :  { %v2353_v16 = vadd.f32 %v2351_v12, %v2343_v48 }
0x35c6   :  { %2940 = vtanh.f32 %v2353_v16 }
0x35c7   :  { %v2377_v8 = vpop.permute.xlu0 %2376 }
0x35c8   :  { %v2391_v9 = vsel %vm103_vm0, %v2374_v26, %v2377_v8 }
0x35c9   :  { %v2392_v11 = vsel %vm105_vm1, %v2391_v9, %v2380_v37 }
0x35cb   :  { %v2383_v6 = vpop.permute.xlu0 %2382 }
0x35cc   :  { %v2394_v38 = vsel %vm2393_vm7, %v2392_v11, %v2383_v6 }
0x35cd   :  { %v2395_v10 = vsel %vm107_vm2, %v2394_v38, %v2386_v40 }
0x35ce   :  { %v2396_v44 = vsel %vm109_vm3, %v2395_v10, %v3742_v55 }
0x35cf   :  { %v2397_v33 = vsel %vm111_vm4, %v2396_v44, %v2389_v15 }
0x35d0   :  { %v2941_v7 = vpop.eup %2940 }
0x35d1   :  { %2356 = vrot.lane.b32.xlu0 %v2941_v7, %s3015_s16 }
0x35d5   :  { %2475 = vrot.lane.b32.xlu0 %v3806_v41, %s3021_s0 }
0x35d9   :  { %2487 = vrot.lane.b32.xlu0 %v3795_v49, %s3022_s18 }
0x3643   :  { %v2357_v41 = vpop.permute.xlu0 %2356 }
0x3644   :  { %v2359_v49 = vmul.f32 %v2939_v47, %v2357_v41 }
0x3646   :  { %v2399_v56 = vsel %vm2398_vm8, %v2397_v33, %v2359_v49  ;;  %2479 = vrot.lane.b32.xlu1 %v2359_v49, %s3018_s22 }
0x3647   :  { %2618 = vmatmul.mubr.msk.f32.vlgmr.msra.gmra.mrb[36].mxu1 %vm154_vm5, %v2399_v56  ;;  %v2476_v57 = vpop.permute.xlu0 %2475 }
0x364a   :  { %2491 = vrot.lane.b32.xlu1 %v2353_v16, %s3014_s15  ;;  %s2503_s15 = sshll.u32 %s3027_s10, 4  ;;  %s2504_s15 = int_to_ptr.vmem [resolvable:$true] %s2503_s15 }
0x364b   :  { %v2488_v55 = vpop.permute.xlu0 %2487  ;;  %s2983_s2 = scalar_lea.vmem %s2504_s15, 96  ;;  %p2988_p9 = scmp.lt.s32.totalorder %s2504_s15, %s2504_s15 }
0x364c   :  { %p2984_p8 = scmp.ne.s32.totalorder %s2504_s15, %s2983_s2  ;;  %p2989_p10 = scmp.lt.s32.totalorder %s2983_s2, %s2983_s2 }
0x364e   :  { %p2990_p11 = por %p2989_p10, %p2988_p9 }
0x3650   :  { %p2991_p12 = pnand %p2990_p11, %p2984_p8 }
0x36b8   :  { %v2480_v58 = vpop.permute.xlu1 %2479 }
0x36b9   :  { %v2482_v3 = vsel %vm103_vm0, %v2476_v57, %v2480_v58 }
0x36ba   :  { %v2483_v18 = vsel %vm105_vm1, %v2482_v3, 0.0 }
0x36bb   :  { %2485 = vst [vmem:[#allocation5 + $0x2] sm:$0x3] %v2483_v18 }
0x36bc   :  { %v2492_v23 = vpop.permute.xlu1 %2491 }
0x36bd   :  { %v2494_v27 = vsel %vm103_vm0, %v2488_v55, %v2492_v23 }
0x36be   :  { %v2495_v17 = vsel %vm105_vm1, %v2494_v27, 0.0 }
0x36bf   :  { %2497 = vst [vmem:[#allocation5 + $0x4] sm:$0x3] %v2495_v17 }
0x371a   :  { %v2469_v2 = vpop.f32.mrb[36].mxu1 }
0x371b   :  { %v2470_v29 = vadd.f32 %v2590_v20, %v2469_v2  ;;  %v2619_v31 = vpop.f32.mrb[37].mxu1 }
0x371d   :  { %v2473_v34 = vsel %vm105_vm1, %v2470_v29, 0.0 }
0x371e   :  { %2474 = vst [vmem:[#allocation5] sm:$0x3] %v2473_v34 }
0x371f   :  { %2994 = shalt.err (!%p2991_p12)
}
0x3720   :  { %s2995_s4 = scalar_lea.hbm %s3922_s5, 96 }
0x3721   :  { %p2996_p13 = scmp.ne.s32.totalorder %s3922_s5, %s2995_s4  ;;  %p2999_p0 = scmp.lt.u32.totalorder %s2995_s4, %s3922_s5 }
0x3723   :  { %p3001_p1 = pnand %p2999_p0, %p2996_p13 }
0x3725   :  { %3004 = shalt.err (!%p3001_p1)
}
0x3726   :  { %s3028_s19 = smov 2  }
0x3727   :  { %2509 = dma.vmem_to_hbm [thread:$0]  %s2504_s15, 96, %s3922_s5, [#allocation4], %s3016_s17, %s3016_s17, %s3028_s19  }
0x3728   :  { %3007 = dma.done.wait [#allocation4], 96  }
0x3729   :  { %3008 = vsyncadd [#allocation4], 4294967200 }
0x372a   :  { %2513 = vsyncpa [#allocation3], 1 }
0x372b   :  { %2514 = vsyncpa [#allocation4], 1 }

</bundles_post_ra>
